<compile_context>
chip_gen: v5e
topology: v5e:2x2
jax: 0.10.0
libtpu: 0.0.40
codegen_flags: <defaults>
</compile_context>

<pallas_src>
import functools

import jax
import jax.numpy as jnp
from jax.experimental import pallas as pl
from jax.experimental.pallas import tpu as pltpu

EPS = 1e-5
LANE = 128


def _round_up(x, m):
    return (x + m - 1) // m * m


# ---------------------------------------------------------------------------
# Fused kernel: whole BasicBlock for one batch element.
# ---------------------------------------------------------------------------
def _instance_norm(y, gamma, beta):
    """y: (P, C) f32; normalize over axis 0 (spatial) per channel.

    Single fused sum / sum-of-squares pass (f32 accumulators); the uncentered
    variance is clamped at 0 for safety. Padded channels (gamma == beta == 0)
    come out exactly 0.
    """
    inv_n = 1.0 / y.shape[0]
    s1 = jnp.sum(y, axis=0, keepdims=True)
    s2 = jnp.sum(y * y, axis=0, keepdims=True)
    mean = s1 * inv_n
    var = jnp.maximum(s2 * inv_n - mean * mean, 0.0)
    scale = jax.lax.rsqrt(var + EPS) * gamma
    return y * scale + (beta - mean * scale)


def _basic_block_kernel(x_ref, w1_ref, g1_ref, b1_ref, w2_ref, g2_ref, b2_ref,
                        *rest, stride, ph, ho, wo, has_projection):
    if has_projection:
        wsc_ref, gsc_ref, bsc_ref, out_ref, out1_ref = rest
    else:
        out_ref, out1_ref = rest

    npix = ho * wo
    cin_p = x_ref.shape[-1]
    cout_p = out_ref.shape[-1]
    f32 = jnp.float32
    taps = [(kh, kw) for kh in range(3) for kw in range(3)]

    def x_window(kh, kw):
        # Window of the stride-phase-decomposed, zero-padded input that conv
        # offset (kh, kw) needs:  xpad[kh + ih*stride, kw + iw*stride, :].
        p = (kh % stride) * stride + (kw % stride)      # phase plane index
        r0 = p * ph + kh // stride                      # row offset in plane
        c0 = kw // stride
        return x_ref[0, r0:r0 + ho, c0:c0 + wo, :]      # (ho, wo, cin_p) bf16

    # -- conv1: 3x3/stride as a sum of 9 shifted bf16 matmuls (f32 accum) ----
    acc = jnp.zeros((npix, cout_p), f32)
    for t, (kh, kw) in enumerate(taps):
        lhs = x_window(kh, kw).reshape(npix, cin_p)
        acc = acc + jnp.dot(lhs, w1_ref[t], preferred_element_type=f32)
    y1 = jnp.maximum(_instance_norm(acc, g1_ref[...], b1_ref[...]), 0.0)

    # -- stage relu(in1(conv1)) in a zero-padded bf16 VMEM scratch ------------
    out1_ref[...] = jnp.zeros(out1_ref.shape, out1_ref.dtype)
    out1_ref[1:1 + ho, 1:1 + wo, :] = (
        y1.reshape(ho, wo, cout_p).astype(out1_ref.dtype))

    # -- conv2: 3x3/1, again 9 shifted matmuls over the VMEM scratch ----------
    acc = jnp.zeros((npix, cout_p), f32)
    for t, (kh, kw) in enumerate(taps):
        lhs = out1_ref[kh:kh + ho, kw:kw + wo, :].reshape(npix, cout_p)
        acc = acc + jnp.dot(lhs, w2_ref[t], preferred_element_type=f32)
    y2 = _instance_norm(acc, g2_ref[...], b2_ref[...])

    # -- shortcut, fused into the same kernel ---------------------------------
    xs = x_window(1, 1).reshape(npix, cin_p)            # == x[ih*s, iw*s, :]
    if has_projection:                                  # 1x1 conv + inst. norm
        sc = jnp.dot(xs, wsc_ref[...], preferred_element_type=f32)
        sc = _instance_norm(sc, gsc_ref[...], bsc_ref[...])
    else:                                               # identity (cin_p == cout_p)
        sc = xs.astype(f32)

    out_ref[0] = jnp.maximum(y2 + sc, 0.0).astype(out_ref.dtype)


# ---------------------------------------------------------------------------
# Host-side layout prep (cheap, single pass, no 9x patch blow-up)
# ---------------------------------------------------------------------------
def _phase_decompose(xpad, stride):
    """(N, Hp, Wp, C) -> (N, s*s*PH, PW, C) with
       out[n, (a*s+b)*PH + i, j, :] == xpad[n, a + i*s, b + j*s, :]."""
    n, hp, wp, c = xpad.shape
    s = stride
    ph, pw = -(-hp // s), -(-wp // s)
    xpad = jnp.pad(xpad, ((0, 0), (0, ph * s - hp), (0, pw * s - wp), (0, 0)))
    x = xpad.reshape(n, ph, s, pw, s, c).transpose(0, 2, 4, 1, 3, 5)
    return x.reshape(n, s * s * ph, pw, c), ph, pw


def _prep_w3x3(w_oihw, cin_p, cout_p):
    cout, cin, kh, kw = w_oihw.shape
    w = jnp.transpose(w_oihw, (2, 3, 1, 0))             # (3, 3, cin, cout)
    w = jnp.pad(w, ((0, 0), (0, 0), (0, cin_p - cin), (0, cout_p - cout)))
    return w.reshape(kh * kw, cin_p, cout_p).astype(jnp.bfloat16)


def _prep_w1x1(w_oihw, cin_p, cout_p):
    cout, cin = w_oihw.shape[:2]
    w = jnp.transpose(w_oihw[:, :, 0, 0], (1, 0))       # (cin, cout)
    w = jnp.pad(w, ((0, cin_p - cin), (0, cout_p - cout)))
    return w.astype(jnp.bfloat16)


def _prep_affine(g, b, cout_p):
    pad = (0, cout_p - g.shape[0])                      # padded gamma/beta = 0
    return (jnp.pad(g, pad).reshape(1, cout_p).astype(jnp.float32),
            jnp.pad(b, pad).reshape(1, cout_p).astype(jnp.float32))


def basic_block_forward_nhwc(x_nhwc, params, stride):
    """Fused BasicBlock forward. x_nhwc: (N, H, W, Cin) -> (N, Ho, Wo, Cout)."""
    n, h, w, cin = x_nhwc.shape
    cout = params["conv1_w"].shape[0]
    has_projection = (stride != 1) or (cin != cout)

    cout_p = _round_up(cout, LANE)                      # lane-dense channels
    cin_p = _round_up(cin, 8) if has_projection else cout_p
    ho = (h - 1) // stride + 1
    wo = (w - 1) // stride + 1
    npix = ho * wo

    # Pad channels + 1px spatial halo (conv1 padding), split into stride phases
    # so every kernel tap is a contiguous window, cast to bf16 (halves DMA).
    xp = jnp.pad(x_nhwc, ((0, 0), (1, 1), (1, 1), (0, cin_p - cin)))
    xph, ph, pw = _phase_decompose(xp, stride)
    xph = xph.astype(jnp.bfloat16)

    w1 = _prep_w3x3(params["conv1_w"], cin_p, cout_p)   # (9, cin_p, cout_p)
    w2 = _prep_w3x3(params["conv2_w"], cout_p, cout_p)  # (9, cout_p, cout_p)
    g1, b1 = _prep_affine(params["bn1_g"], params["bn1_b"], cout_p)
    g2, b2 = _prep_affine(params["bn2_g"], params["bn2_b"], cout_p)

    rep2 = lambda i: (0, 0)                             # replicated 2-D params
    args = [xph, w1, g1, b1, w2, g2, b2]
    in_specs = [
        pl.BlockSpec((1, stride * stride * ph, pw, cin_p), lambda i: (i, 0, 0, 0)),
        pl.BlockSpec((9, cin_p, cout_p), lambda i: (0, 0, 0)),
        pl.BlockSpec((1, cout_p), rep2),
        pl.BlockSpec((1, cout_p), rep2),
        pl.BlockSpec((9, cout_p, cout_p), lambda i: (0, 0, 0)),
        pl.BlockSpec((1, cout_p), rep2),
        pl.BlockSpec((1, cout_p), rep2),
    ]
    if has_projection:
        wsc = _prep_w1x1(params["sc_w"], cin_p, cout_p)
        gsc, bsc = _prep_affine(params["sc_g"], params["sc_b"], cout_p)
        args += [wsc, gsc, bsc]
        in_specs += [pl.BlockSpec((cin_p, cout_p), rep2),
                     pl.BlockSpec((1, cout_p), rep2),
                     pl.BlockSpec((1, cout_p), rep2)]

    kernel = functools.partial(_basic_block_kernel, stride=stride, ph=ph,
                               ho=ho, wo=wo, has_projection=has_projection)

    # Explicit VMEM budget (doubly important on v7x's 64 MiB physical VMEM).
    bf2, f4 = 2, 4
    vmem = (2 * (stride * stride * ph * pw * cin_p * bf2 + npix * cout_p * f4)
            + (9 * cin_p + 9 * cout_p + cin_p) * cout_p * bf2
            + (ho + 2) * (wo + 2) * cout_p * bf2
            + 4 * npix * cout_p * f4 + (2 << 20))
    vmem = int(min(max(vmem, 8 << 20), 64 << 20))

    out = pl.pallas_call(
        kernel,
        out_shape=jax.ShapeDtypeStruct((n, npix, cout_p), x_nhwc.dtype),
        grid=(n,),
        in_specs=in_specs,
        out_specs=pl.BlockSpec((1, npix, cout_p), lambda i: (i, 0, 0)),
        scratch_shapes=[pltpu.VMEM((ho + 2, wo + 2, cout_p), jnp.bfloat16)],
        compiler_params=pltpu.CompilerParams(
            dimension_semantics=("parallel",),          # batch across cores
            vmem_limit_bytes=vmem),
    )(*args)

    # TODO(synk): for very large feature maps on v7x (64 MiB VMEM), split the
    # spatial dim over a second parallel grid axis with two-pass norm stats.
    return out.reshape(n, ho, wo, cout_p)[..., :cout]


def basic_block_forward(x_nchw, params, stride):
    """NCHW wrapper matching the PyTorch interface. When chaining blocks,
    prefer basic_block_forward_nhwc to avoid the layout round trips."""
    out = basic_block_forward_nhwc(jnp.transpose(x_nchw, (0, 2, 3, 1)),
                                   params, stride)
    return jnp.transpose(out, (0, 3, 1, 2))


# ---------------------------------------------------------------------------
# Pure-JAX reference (exact module semantics, f32) for correctness checking
# ---------------------------------------------------------------------------
def _ref_conv(x, w, stride, pad):
    return jax.lax.conv_general_dilated(
        x, w, (stride, stride), [(pad, pad), (pad, pad)],
        dimension_numbers=("NCHW", "OIHW", "NCHW"))


def _ref_inorm(x, g, b):
    mean = x.mean(axis=(2, 3), keepdims=True)
    var = ((x - mean) ** 2).mean(axis=(2, 3), keepdims=True)
    xn = (x - mean) / jnp.sqrt(var + EPS)
    return xn * g[None, :, None, None] + b[None, :, None, None]


def basic_block_reference(x, params, stride):
    cout = params["conv1_w"].shape[0]
    out = jax.nn.relu(_ref_inorm(_ref_conv(x, params["conv1_w"], stride, 1),
                                 params["bn1_g"], params["bn1_b"]))
    out = _ref_inorm(_ref_conv(out, params["conv2_w"], 1, 1),
                     params["bn2_g"], params["bn2_b"])
    if stride != 1 or x.shape[1] != cout:
        sc = _ref_inorm(_ref_conv(x, params["sc_w"], stride, 0),
                        params["sc_g"], params["sc_b"])
    else:
        sc = x
    return jax.nn.relu(out + sc)


# ---------------------------------------------------------------------------
if __name__ == "__main__":
    key = jax.random.PRNGKey(0)
    fwd = jax.jit(basic_block_forward, static_argnums=2)

    # ---- test 1: projection shortcut (stride=2, Cin != Cout) ---------------
    in_planes, planes, stride = 4, 8, 2
    n, h, w = 2, 16, 16
    ks = jax.random.split(key, 10)
    params = {
        "conv1_w": 0.1 * jax.random.normal(ks[0], (planes, in_planes, 3, 3), jnp.float32),
        "bn1_g": 1.0 + 0.1 * jax.random.normal(ks[1], (planes,), jnp.float32),
        "bn1_b": 0.1 * jax.random.normal(ks[2], (planes,), jnp.float32),
        "conv2_w": 0.1 * jax.random.normal(ks[3], (planes, planes, 3, 3), jnp.float32),
        "bn2_g": 1.0 + 0.1 * jax.random.normal(ks[4], (planes,), jnp.float32),
        "bn2_b": 0.1 * jax.random.normal(ks[5], (planes,), jnp.float32),
        "sc_w": 0.1 * jax.random.normal(ks[6], (planes, in_planes, 1, 1), jnp.float32),
        "sc_g": jnp.ones((planes,), jnp.float32),
        "sc_b": jnp.zeros((planes,), jnp.float32),
    }
    x = jax.random.normal(ks[7], (n, in_planes, h, w), jnp.float32)

    out = jax.block_until_ready(fwd(x, params, stride))
    ref = jax.block_until_ready(basic_block_reference(x, params, stride))
    assert out.shape == ref.shape == (n, planes, h // stride, w // stride)
    assert jnp.allclose(out, ref, atol=5e-2, rtol=5e-2), "projection block mismatch"

    # ---- test 2: identity shortcut (stride=1, Cin == Cout) -----------------
    planes2, h2, w2 = 8, 8, 8
    params2 = {
        "conv1_w": 0.1 * jax.random.normal(ks[8], (planes2, planes2, 3, 3), jnp.float32),
        "bn1_g": jnp.ones((planes2,), jnp.float32),
        "bn1_b": jnp.zeros((planes2,), jnp.float32),
        "conv2_w": 0.1 * jax.random.normal(ks[9], (planes2, planes2, 3, 3), jnp.float32),
        "bn2_g": jnp.ones((planes2,), jnp.float32),
        "bn2_b": jnp.zeros((planes2,), jnp.float32),
    }
    x2 = jax.random.normal(ks[7], (n, planes2, h2, w2), jnp.float32)
    out2 = jax.block_until_ready(fwd(x2, params2, 1))
    ref2 = jax.block_until_ready(basic_block_reference(x2, params2, 1))
    assert out2.shape == ref2.shape == (n, planes2, h2, w2)
    assert jnp.allclose(out2, ref2, atol=5e-2, rtol=5e-2), "identity block mismatch"

    print("KERNEL_OK")
</pallas_src>

<mosaic_0001>
module attributes {stable_mosaic.version = 11 : i64} {
  func.func @_basic_block_kernel(%arg0: i32, %arg1: memref<1x36x9x8xbf16, #tpu.memory_space<vmem>>, %arg2: memref<9x8x128xbf16, #tpu.memory_space<vmem>>, %arg3: memref<1x128xf32, #tpu.memory_space<vmem>>, %arg4: memref<1x128xf32, #tpu.memory_space<vmem>>, %arg5: memref<9x128x128xbf16, #tpu.memory_space<vmem>>, %arg6: memref<1x128xf32, #tpu.memory_space<vmem>>, %arg7: memref<1x128xf32, #tpu.memory_space<vmem>>, %arg8: memref<8x128xbf16, #tpu.memory_space<vmem>>, %arg9: memref<1x128xf32, #tpu.memory_space<vmem>>, %arg10: memref<1x128xf32, #tpu.memory_space<vmem>>, %arg11: memref<1x64x128xf32, #tpu.memory_space<vmem>>, %arg12: memref<10x10x128xbf16, #tpu.memory_space<vmem>>) attributes {dimension_semantics = [#tpu.dimension_semantics<parallel>], iteration_bounds = array<i64: 2>, scalar_prefetch = 0 : i64, scratch_operands = 1 : i64, tpu.core_type = #tpu.core_type<tc>, window_params = [{transform_indices = @transform_0, window_bounds = array<i64: 1, 36, 9, 8>}, {pipeline_mode = #tpu.pipeline_mode<synchronous>, transform_indices = @transform_1, window_bounds = array<i64: 9, 8, 128>}, {pipeline_mode = #tpu.pipeline_mode<synchronous>, transform_indices = @transform_2, window_bounds = array<i64: 1, 128>}, {pipeline_mode = #tpu.pipeline_mode<synchronous>, transform_indices = @transform_3, window_bounds = array<i64: 1, 128>}, {pipeline_mode = #tpu.pipeline_mode<synchronous>, transform_indices = @transform_4, window_bounds = array<i64: 9, 128, 128>}, {pipeline_mode = #tpu.pipeline_mode<synchronous>, transform_indices = @transform_5, window_bounds = array<i64: 1, 128>}, {pipeline_mode = #tpu.pipeline_mode<synchronous>, transform_indices = @transform_6, window_bounds = array<i64: 1, 128>}, {pipeline_mode = #tpu.pipeline_mode<synchronous>, transform_indices = @transform_7, window_bounds = array<i64: 8, 128>}, {pipeline_mode = #tpu.pipeline_mode<synchronous>, transform_indices = @transform_8, window_bounds = array<i64: 1, 128>}, {pipeline_mode = #tpu.pipeline_mode<synchronous>, transform_indices = @transform_9, window_bounds = array<i64: 1, 128>}, {transform_indices = @transform_10, window_bounds = array<i64: 1, 64, 128>}]} {
    %cst = arith.constant 0.000000e+00 : f32
    %0 = vector.broadcast %cst : f32 to vector<64x128xf32>
    %c0 = arith.constant 0 : index
    %c0_0 = arith.constant 0 : index
    %c0_1 = arith.constant 0 : index
    %c0_2 = arith.constant 0 : index
    %1 = vector.load %arg1[%c0, %c0_0, %c0_1, %c0_2] : memref<1x36x9x8xbf16, #tpu.memory_space<vmem>>, vector<1x8x8x8xbf16>
    %2 = vector.shape_cast %1 : vector<1x8x8x8xbf16> to vector<8x8x8xbf16>
    %3 = vector.shape_cast %2 : vector<8x8x8xbf16> to vector<64x8xbf16>
    %c0_3 = arith.constant 0 : index
    %c0_4 = arith.constant 0 : index
    %c0_5 = arith.constant 0 : index
    %4 = vector.load %arg2[%c0_3, %c0_4, %c0_5] : memref<9x8x128xbf16, #tpu.memory_space<vmem>>, vector<1x8x128xbf16>
    %5 = vector.shape_cast %4 : vector<1x8x128xbf16> to vector<8x128xbf16>
    %cst_6 = arith.constant dense<0.000000e+00> : vector<64x128xf32>
    %6 = tpu.matmul %3, %5, %cst_6 {dimension_numbers = #tpu.dot_dimension_numbers<[1], [0], [0], [1], [0, 0, 1, 1], [], []>} : vector<64x8xbf16>, vector<8x128xbf16>, vector<64x128xf32> -> vector<64x128xf32>
    %7 = arith.addf %0, %6 : vector<64x128xf32>
    %c0_7 = arith.constant 0 : index
    %c9 = arith.constant 9 : index
    %c0_8 = arith.constant 0 : index
    %c0_9 = arith.constant 0 : index
    %8 = vector.load %arg1[%c0_7, %c9, %c0_8, %c0_9] : memref<1x36x9x8xbf16, #tpu.memory_space<vmem>>, vector<1x8x8x8xbf16>
    %9 = vector.shape_cast %8 : vector<1x8x8x8xbf16> to vector<8x8x8xbf16>
    %10 = vector.shape_cast %9 : vector<8x8x8xbf16> to vector<64x8xbf16>
    %c1 = arith.constant 1 : index
    %c0_10 = arith.constant 0 : index
    %c0_11 = arith.constant 0 : index
    %11 = vector.load %arg2[%c1, %c0_10, %c0_11] : memref<9x8x128xbf16, #tpu.memory_space<vmem>>, vector<1x8x128xbf16>
    %12 = vector.shape_cast %11 : vector<1x8x128xbf16> to vector<8x128xbf16>
    %cst_12 = arith.constant dense<0.000000e+00> : vector<64x128xf32>
    %13 = tpu.matmul %10, %12, %cst_12 {dimension_numbers = #tpu.dot_dimension_numbers<[1], [0], [0], [1], [0, 0, 1, 1], [], []>} : vector<64x8xbf16>, vector<8x128xbf16>, vector<64x128xf32> -> vector<64x128xf32>
    %14 = arith.addf %7, %13 : vector<64x128xf32>
    %c0_13 = arith.constant 0 : index
    %c0_14 = arith.constant 0 : index
    %c1_15 = arith.constant 1 : index
    %c0_16 = arith.constant 0 : index
    %15 = vector.load %arg1[%c0_13, %c0_14, %c1_15, %c0_16] : memref<1x36x9x8xbf16, #tpu.memory_space<vmem>>, vector<1x8x8x8xbf16>
    %16 = vector.shape_cast %15 : vector<1x8x8x8xbf16> to vector<8x8x8xbf16>
    %17 = vector.shape_cast %16 : vector<8x8x8xbf16> to vector<64x8xbf16>
    %c2 = arith.constant 2 : index
    %c0_17 = arith.constant 0 : index
    %c0_18 = arith.constant 0 : index
    %18 = vector.load %arg2[%c2, %c0_17, %c0_18] : memref<9x8x128xbf16, #tpu.memory_space<vmem>>, vector<1x8x128xbf16>
    %19 = vector.shape_cast %18 : vector<1x8x128xbf16> to vector<8x128xbf16>
    %cst_19 = arith.constant dense<0.000000e+00> : vector<64x128xf32>
    %20 = tpu.matmul %17, %19, %cst_19 {dimension_numbers = #tpu.dot_dimension_numbers<[1], [0], [0], [1], [0, 0, 1, 1], [], []>} : vector<64x8xbf16>, vector<8x128xbf16>, vector<64x128xf32> -> vector<64x128xf32>
    %21 = arith.addf %14, %20 : vector<64x128xf32>
    %c0_20 = arith.constant 0 : index
    %c18 = arith.constant 18 : index
    %c0_21 = arith.constant 0 : index
    %c0_22 = arith.constant 0 : index
    %22 = vector.load %arg1[%c0_20, %c18, %c0_21, %c0_22] : memref<1x36x9x8xbf16, #tpu.memory_space<vmem>>, vector<1x8x8x8xbf16>
    %23 = vector.shape_cast %22 : vector<1x8x8x8xbf16> to vector<8x8x8xbf16>
    %24 = vector.shape_cast %23 : vector<8x8x8xbf16> to vector<64x8xbf16>
    %c3 = arith.constant 3 : index
    %c0_23 = arith.constant 0 : index
    %c0_24 = arith.constant 0 : index
    %25 = vector.load %arg2[%c3, %c0_23, %c0_24] : memref<9x8x128xbf16, #tpu.memory_space<vmem>>, vector<1x8x128xbf16>
    %26 = vector.shape_cast %25 : vector<1x8x128xbf16> to vector<8x128xbf16>
    %cst_25 = arith.constant dense<0.000000e+00> : vector<64x128xf32>
    %27 = tpu.matmul %24, %26, %cst_25 {dimension_numbers = #tpu.dot_dimension_numbers<[1], [0], [0], [1], [0, 0, 1, 1], [], []>} : vector<64x8xbf16>, vector<8x128xbf16>, vector<64x128xf32> -> vector<64x128xf32>
    %28 = arith.addf %21, %27 : vector<64x128xf32>
    %c0_26 = arith.constant 0 : index
    %c27 = arith.constant 27 : index
    %c0_27 = arith.constant 0 : index
    %c0_28 = arith.constant 0 : index
    %29 = vector.load %arg1[%c0_26, %c27, %c0_27, %c0_28] : memref<1x36x9x8xbf16, #tpu.memory_space<vmem>>, vector<1x8x8x8xbf16>
    %30 = vector.shape_cast %29 : vector<1x8x8x8xbf16> to vector<8x8x8xbf16>
    %31 = vector.shape_cast %30 : vector<8x8x8xbf16> to vector<64x8xbf16>
    %c4 = arith.constant 4 : index
    %c0_29 = arith.constant 0 : index
    %c0_30 = arith.constant 0 : index
    %32 = vector.load %arg2[%c4, %c0_29, %c0_30] : memref<9x8x128xbf16, #tpu.memory_space<vmem>>, vector<1x8x128xbf16>
    %33 = vector.shape_cast %32 : vector<1x8x128xbf16> to vector<8x128xbf16>
    %cst_31 = arith.constant dense<0.000000e+00> : vector<64x128xf32>
    %34 = tpu.matmul %31, %33, %cst_31 {dimension_numbers = #tpu.dot_dimension_numbers<[1], [0], [0], [1], [0, 0, 1, 1], [], []>} : vector<64x8xbf16>, vector<8x128xbf16>, vector<64x128xf32> -> vector<64x128xf32>
    %35 = arith.addf %28, %34 : vector<64x128xf32>
    %c0_32 = arith.constant 0 : index
    %c18_33 = arith.constant 18 : index
    %c1_34 = arith.constant 1 : index
    %c0_35 = arith.constant 0 : index
    %36 = vector.load %arg1[%c0_32, %c18_33, %c1_34, %c0_35] : memref<1x36x9x8xbf16, #tpu.memory_space<vmem>>, vector<1x8x8x8xbf16>
    %37 = vector.shape_cast %36 : vector<1x8x8x8xbf16> to vector<8x8x8xbf16>
    %38 = vector.shape_cast %37 : vector<8x8x8xbf16> to vector<64x8xbf16>
    %c5 = arith.constant 5 : index
    %c0_36 = arith.constant 0 : index
    %c0_37 = arith.constant 0 : index
    %39 = vector.load %arg2[%c5, %c0_36, %c0_37] : memref<9x8x128xbf16, #tpu.memory_space<vmem>>, vector<1x8x128xbf16>
    %40 = vector.shape_cast %39 : vector<1x8x128xbf16> to vector<8x128xbf16>
    %cst_38 = arith.constant dense<0.000000e+00> : vector<64x128xf32>
    %41 = tpu.matmul %38, %40, %cst_38 {dimension_numbers = #tpu.dot_dimension_numbers<[1], [0], [0], [1], [0, 0, 1, 1], [], []>} : vector<64x8xbf16>, vector<8x128xbf16>, vector<64x128xf32> -> vector<64x128xf32>
    %42 = arith.addf %35, %41 : vector<64x128xf32>
    %c0_39 = arith.constant 0 : index
    %c1_40 = arith.constant 1 : index
    %c0_41 = arith.constant 0 : index
    %c0_42 = arith.constant 0 : index
    %43 = vector.load %arg1[%c0_39, %c1_40, %c0_41, %c0_42] : memref<1x36x9x8xbf16, #tpu.memory_space<vmem>>, vector<1x8x8x8xbf16>
    %44 = vector.shape_cast %43 : vector<1x8x8x8xbf16> to vector<8x8x8xbf16>
    %45 = vector.shape_cast %44 : vector<8x8x8xbf16> to vector<64x8xbf16>
    %c6 = arith.constant 6 : index
    %c0_43 = arith.constant 0 : index
    %c0_44 = arith.constant 0 : index
    %46 = vector.load %arg2[%c6, %c0_43, %c0_44] : memref<9x8x128xbf16, #tpu.memory_space<vmem>>, vector<1x8x128xbf16>
    %47 = vector.shape_cast %46 : vector<1x8x128xbf16> to vector<8x128xbf16>
    %cst_45 = arith.constant dense<0.000000e+00> : vector<64x128xf32>
    %48 = tpu.matmul %45, %47, %cst_45 {dimension_numbers = #tpu.dot_dimension_numbers<[1], [0], [0], [1], [0, 0, 1, 1], [], []>} : vector<64x8xbf16>, vector<8x128xbf16>, vector<64x128xf32> -> vector<64x128xf32>
    %49 = arith.addf %42, %48 : vector<64x128xf32>
    %c0_46 = arith.constant 0 : index
    %c10 = arith.constant 10 : index
    %c0_47 = arith.constant 0 : index
    %c0_48 = arith.constant 0 : index
    %50 = vector.load %arg1[%c0_46, %c10, %c0_47, %c0_48] : memref<1x36x9x8xbf16, #tpu.memory_space<vmem>>, vector<1x8x8x8xbf16>
    %51 = vector.shape_cast %50 : vector<1x8x8x8xbf16> to vector<8x8x8xbf16>
    %52 = vector.shape_cast %51 : vector<8x8x8xbf16> to vector<64x8xbf16>
    %c7 = arith.constant 7 : index
    %c0_49 = arith.constant 0 : index
    %c0_50 = arith.constant 0 : index
    %53 = vector.load %arg2[%c7, %c0_49, %c0_50] : memref<9x8x128xbf16, #tpu.memory_space<vmem>>, vector<1x8x128xbf16>
    %54 = vector.shape_cast %53 : vector<1x8x128xbf16> to vector<8x128xbf16>
    %cst_51 = arith.constant dense<0.000000e+00> : vector<64x128xf32>
    %55 = tpu.matmul %52, %54, %cst_51 {dimension_numbers = #tpu.dot_dimension_numbers<[1], [0], [0], [1], [0, 0, 1, 1], [], []>} : vector<64x8xbf16>, vector<8x128xbf16>, vector<64x128xf32> -> vector<64x128xf32>
    %56 = arith.addf %49, %55 : vector<64x128xf32>
    %c0_52 = arith.constant 0 : index
    %c1_53 = arith.constant 1 : index
    %c1_54 = arith.constant 1 : index
    %c0_55 = arith.constant 0 : index
    %57 = vector.load %arg1[%c0_52, %c1_53, %c1_54, %c0_55] : memref<1x36x9x8xbf16, #tpu.memory_space<vmem>>, vector<1x8x8x8xbf16>
    %58 = vector.shape_cast %57 : vector<1x8x8x8xbf16> to vector<8x8x8xbf16>
    %59 = vector.shape_cast %58 : vector<8x8x8xbf16> to vector<64x8xbf16>
    %c8 = arith.constant 8 : index
    %c0_56 = arith.constant 0 : index
    %c0_57 = arith.constant 0 : index
    %60 = vector.load %arg2[%c8, %c0_56, %c0_57] : memref<9x8x128xbf16, #tpu.memory_space<vmem>>, vector<1x8x128xbf16>
    %61 = vector.shape_cast %60 : vector<1x8x128xbf16> to vector<8x128xbf16>
    %cst_58 = arith.constant dense<0.000000e+00> : vector<64x128xf32>
    %62 = tpu.matmul %59, %61, %cst_58 {dimension_numbers = #tpu.dot_dimension_numbers<[1], [0], [0], [1], [0, 0, 1, 1], [], []>} : vector<64x8xbf16>, vector<8x128xbf16>, vector<64x128xf32> -> vector<64x128xf32>
    %63 = arith.addf %56, %62 : vector<64x128xf32>
    %c0_59 = arith.constant 0 : index
    %c0_60 = arith.constant 0 : index
    %64 = vector.load %arg3[%c0_59, %c0_60] : memref<1x128xf32, #tpu.memory_space<vmem>>, vector<1x128xf32>
    %c0_61 = arith.constant 0 : index
    %c0_62 = arith.constant 0 : index
    %65 = vector.load %arg4[%c0_61, %c0_62] : memref<1x128xf32, #tpu.memory_space<vmem>>, vector<1x128xf32>
    %cst_63 = arith.constant dense<0.000000e+00> : vector<128xf32>
    %66 = vector.multi_reduction <add>, %63, %cst_63 [0] : vector<64x128xf32> to vector<128xf32>
    %67 = vector.shape_cast %66 : vector<128xf32> to vector<1x128xf32>
    %68 = arith.mulf %63, %63 : vector<64x128xf32>
    %cst_64 = arith.constant dense<0.000000e+00> : vector<128xf32>
    %69 = vector.multi_reduction <add>, %68, %cst_64 [0] : vector<64x128xf32> to vector<128xf32>
    %70 = vector.shape_cast %69 : vector<128xf32> to vector<1x128xf32>
    %cst_65 = arith.constant 1.562500e-02 : f32
    %71 = vector.broadcast %cst_65 : f32 to vector<1x128xf32>
    %72 = arith.mulf %67, %71 : vector<1x128xf32>
    %cst_66 = arith.constant 1.562500e-02 : f32
    %73 = vector.broadcast %cst_66 : f32 to vector<1x128xf32>
    %74 = arith.mulf %70, %73 : vector<1x128xf32>
    %75 = arith.mulf %72, %72 : vector<1x128xf32>
    %76 = arith.subf %74, %75 : vector<1x128xf32>
    %cst_67 = arith.constant 0.000000e+00 : f32
    %77 = vector.broadcast %cst_67 : f32 to vector<1x128xf32>
    %78 = arith.maximumf %76, %77 : vector<1x128xf32>
    %cst_68 = arith.constant 9.99999974E-6 : f32
    %79 = vector.broadcast %cst_68 : f32 to vector<1x128xf32>
    %80 = arith.addf %78, %79 : vector<1x128xf32>
    %81 = math.rsqrt %80 : vector<1x128xf32>
    %82 = arith.mulf %81, %64 : vector<1x128xf32>
    %83 = vector.broadcast %82 : vector<1x128xf32> to vector<64x128xf32>
    %84 = arith.mulf %63, %83 : vector<64x128xf32>
    %85 = arith.mulf %72, %82 : vector<1x128xf32>
    %86 = arith.subf %65, %85 : vector<1x128xf32>
    %87 = vector.broadcast %86 : vector<1x128xf32> to vector<64x128xf32>
    %88 = arith.addf %84, %87 : vector<64x128xf32>
    %cst_69 = arith.constant 0.000000e+00 : f32
    %89 = vector.broadcast %cst_69 : f32 to vector<64x128xf32>
    %90 = arith.maximumf %88, %89 : vector<64x128xf32>
    %cst_70 = arith.constant 0.000000e+00 : bf16
    %91 = vector.broadcast %cst_70 : bf16 to vector<10x10x128xbf16>
    %c0_71 = arith.constant 0 : index
    %c0_72 = arith.constant 0 : index
    %c0_73 = arith.constant 0 : index
    %92 = vector.load %arg12[%c0_71, %c0_72, %c0_73] : memref<10x10x128xbf16, #tpu.memory_space<vmem>>, vector<10x10x128xbf16>
    tpu.vector_store %arg12[%c0_71, %c0_72, %c0_73], %91 {strides = array<i32>} : memref<10x10x128xbf16, #tpu.memory_space<vmem>>, vector<10x10x128xbf16>,
    %93 = vector.shape_cast %90 : vector<64x128xf32> to vector<8x8x128xf32>
    %94 = arith.truncf %93 : vector<8x8x128xf32> to vector<8x8x128xbf16>
    %c1_74 = arith.constant 1 : index
    %c1_75 = arith.constant 1 : index
    %c0_76 = arith.constant 0 : index
    %95 = vector.load %arg12[%c1_74, %c1_75, %c0_76] : memref<10x10x128xbf16, #tpu.memory_space<vmem>>, vector<8x8x128xbf16>
    tpu.vector_store %arg12[%c1_74, %c1_75, %c0_76], %94 {strides = array<i32>} : memref<10x10x128xbf16, #tpu.memory_space<vmem>>, vector<8x8x128xbf16>,
    %cst_77 = arith.constant 0.000000e+00 : f32
    %96 = vector.broadcast %cst_77 : f32 to vector<64x128xf32>
    %c0_78 = arith.constant 0 : index
    %c0_79 = arith.constant 0 : index
    %c0_80 = arith.constant 0 : index
    %97 = vector.load %arg12[%c0_78, %c0_79, %c0_80] : memref<10x10x128xbf16, #tpu.memory_space<vmem>>, vector<8x8x128xbf16>
    %98 = vector.shape_cast %97 : vector<8x8x128xbf16> to vector<64x128xbf16>
    %c0_81 = arith.constant 0 : index
    %c0_82 = arith.constant 0 : index
    %c0_83 = arith.constant 0 : index
    %99 = vector.load %arg5[%c0_81, %c0_82, %c0_83] : memref<9x128x128xbf16, #tpu.memory_space<vmem>>, vector<1x128x128xbf16>
    %100 = vector.shape_cast %99 : vector<1x128x128xbf16> to vector<128x128xbf16>
    %cst_84 = arith.constant dense<0.000000e+00> : vector<64x128xf32>
    %101 = tpu.matmul %98, %100, %cst_84 {dimension_numbers = #tpu.dot_dimension_numbers<[1], [0], [0], [1], [0, 0, 1, 1], [], []>} : vector<64x128xbf16>, vector<128x128xbf16>, vector<64x128xf32> -> vector<64x128xf32>
    %102 = arith.addf %96, %101 : vector<64x128xf32>
    %c0_85 = arith.constant 0 : index
    %c1_86 = arith.constant 1 : index
    %c0_87 = arith.constant 0 : index
    %103 = vector.load %arg12[%c0_85, %c1_86, %c0_87] : memref<10x10x128xbf16, #tpu.memory_space<vmem>>, vector<8x8x128xbf16>
    %104 = vector.shape_cast %103 : vector<8x8x128xbf16> to vector<64x128xbf16>
    %c1_88 = arith.constant 1 : index
    %c0_89 = arith.constant 0 : index
    %c0_90 = arith.constant 0 : index
    %105 = vector.load %arg5[%c1_88, %c0_89, %c0_90] : memref<9x128x128xbf16, #tpu.memory_space<vmem>>, vector<1x128x128xbf16>
    %106 = vector.shape_cast %105 : vector<1x128x128xbf16> to vector<128x128xbf16>
    %cst_91 = arith.constant dense<0.000000e+00> : vector<64x128xf32>
    %107 = tpu.matmul %104, %106, %cst_91 {dimension_numbers = #tpu.dot_dimension_numbers<[1], [0], [0], [1], [0, 0, 1, 1], [], []>} : vector<64x128xbf16>, vector<128x128xbf16>, vector<64x128xf32> -> vector<64x128xf32>
    %108 = arith.addf %102, %107 : vector<64x128xf32>
    %c0_92 = arith.constant 0 : index
    %c2_93 = arith.constant 2 : index
    %c0_94 = arith.constant 0 : index
    %109 = vector.load %arg12[%c0_92, %c2_93, %c0_94] : memref<10x10x128xbf16, #tpu.memory_space<vmem>>, vector<8x8x128xbf16>
    %110 = vector.shape_cast %109 : vector<8x8x128xbf16> to vector<64x128xbf16>
    %c2_95 = arith.constant 2 : index
    %c0_96 = arith.constant 0 : index
    %c0_97 = arith.constant 0 : index
    %111 = vector.load %arg5[%c2_95, %c0_96, %c0_97] : memref<9x128x128xbf16, #tpu.memory_space<vmem>>, vector<1x128x128xbf16>
    %112 = vector.shape_cast %111 : vector<1x128x128xbf16> to vector<128x128xbf16>
    %cst_98 = arith.constant dense<0.000000e+00> : vector<64x128xf32>
    %113 = tpu.matmul %110, %112, %cst_98 {dimension_numbers = #tpu.dot_dimension_numbers<[1], [0], [0], [1], [0, 0, 1, 1], [], []>} : vector<64x128xbf16>, vector<128x128xbf16>, vector<64x128xf32> -> vector<64x128xf32>
    %114 = arith.addf %108, %113 : vector<64x128xf32>
    %c1_99 = arith.constant 1 : index
    %c0_100 = arith.constant 0 : index
    %c0_101 = arith.constant 0 : index
    %115 = vector.load %arg12[%c1_99, %c0_100, %c0_101] : memref<10x10x128xbf16, #tpu.memory_space<vmem>>, vector<8x8x128xbf16>
    %116 = vector.shape_cast %115 : vector<8x8x128xbf16> to vector<64x128xbf16>
    %c3_102 = arith.constant 3 : index
    %c0_103 = arith.constant 0 : index
    %c0_104 = arith.constant 0 : index
    %117 = vector.load %arg5[%c3_102, %c0_103, %c0_104] : memref<9x128x128xbf16, #tpu.memory_space<vmem>>, vector<1x128x128xbf16>
    %118 = vector.shape_cast %117 : vector<1x128x128xbf16> to vector<128x128xbf16>
    %cst_105 = arith.constant dense<0.000000e+00> : vector<64x128xf32>
    %119 = tpu.matmul %116, %118, %cst_105 {dimension_numbers = #tpu.dot_dimension_numbers<[1], [0], [0], [1], [0, 0, 1, 1], [], []>} : vector<64x128xbf16>, vector<128x128xbf16>, vector<64x128xf32> -> vector<64x128xf32>
    %120 = arith.addf %114, %119 : vector<64x128xf32>
    %c1_106 = arith.constant 1 : index
    %c1_107 = arith.constant 1 : index
    %c0_108 = arith.constant 0 : index
    %121 = vector.load %arg12[%c1_106, %c1_107, %c0_108] : memref<10x10x128xbf16, #tpu.memory_space<vmem>>, vector<8x8x128xbf16>
    %122 = vector.shape_cast %121 : vector<8x8x128xbf16> to vector<64x128xbf16>
    %c4_109 = arith.constant 4 : index
    %c0_110 = arith.constant 0 : index
    %c0_111 = arith.constant 0 : index
    %123 = vector.load %arg5[%c4_109, %c0_110, %c0_111] : memref<9x128x128xbf16, #tpu.memory_space<vmem>>, vector<1x128x128xbf16>
    %124 = vector.shape_cast %123 : vector<1x128x128xbf16> to vector<128x128xbf16>
    %cst_112 = arith.constant dense<0.000000e+00> : vector<64x128xf32>
    %125 = tpu.matmul %122, %124, %cst_112 {dimension_numbers = #tpu.dot_dimension_numbers<[1], [0], [0], [1], [0, 0, 1, 1], [], []>} : vector<64x128xbf16>, vector<128x128xbf16>, vector<64x128xf32> -> vector<64x128xf32>
    %126 = arith.addf %120, %125 : vector<64x128xf32>
    %c1_113 = arith.constant 1 : index
    %c2_114 = arith.constant 2 : index
    %c0_115 = arith.constant 0 : index
    %127 = vector.load %arg12[%c1_113, %c2_114, %c0_115] : memref<10x10x128xbf16, #tpu.memory_space<vmem>>, vector<8x8x128xbf16>
    %128 = vector.shape_cast %127 : vector<8x8x128xbf16> to vector<64x128xbf16>
    %c5_116 = arith.constant 5 : index
    %c0_117 = arith.constant 0 : index
    %c0_118 = arith.constant 0 : index
    %129 = vector.load %arg5[%c5_116, %c0_117, %c0_118] : memref<9x128x128xbf16, #tpu.memory_space<vmem>>, vector<1x128x128xbf16>
    %130 = vector.shape_cast %129 : vector<1x128x128xbf16> to vector<128x128xbf16>
    %cst_119 = arith.constant dense<0.000000e+00> : vector<64x128xf32>
    %131 = tpu.matmul %128, %130, %cst_119 {dimension_numbers = #tpu.dot_dimension_numbers<[1], [0], [0], [1], [0, 0, 1, 1], [], []>} : vector<64x128xbf16>, vector<128x128xbf16>, vector<64x128xf32> -> vector<64x128xf32>
    %132 = arith.addf %126, %131 : vector<64x128xf32>
    %c2_120 = arith.constant 2 : index
    %c0_121 = arith.constant 0 : index
    %c0_122 = arith.constant 0 : index
    %133 = vector.load %arg12[%c2_120, %c0_121, %c0_122] : memref<10x10x128xbf16, #tpu.memory_space<vmem>>, vector<8x8x128xbf16>
    %134 = vector.shape_cast %133 : vector<8x8x128xbf16> to vector<64x128xbf16>
    %c6_123 = arith.constant 6 : index
    %c0_124 = arith.constant 0 : index
    %c0_125 = arith.constant 0 : index
    %135 = vector.load %arg5[%c6_123, %c0_124, %c0_125] : memref<9x128x128xbf16, #tpu.memory_space<vmem>>, vector<1x128x128xbf16>
    %136 = vector.shape_cast %135 : vector<1x128x128xbf16> to vector<128x128xbf16>
    %cst_126 = arith.constant dense<0.000000e+00> : vector<64x128xf32>
    %137 = tpu.matmul %134, %136, %cst_126 {dimension_numbers = #tpu.dot_dimension_numbers<[1], [0], [0], [1], [0, 0, 1, 1], [], []>} : vector<64x128xbf16>, vector<128x128xbf16>, vector<64x128xf32> -> vector<64x128xf32>
    %138 = arith.addf %132, %137 : vector<64x128xf32>
    %c2_127 = arith.constant 2 : index
    %c1_128 = arith.constant 1 : index
    %c0_129 = arith.constant 0 : index
    %139 = vector.load %arg12[%c2_127, %c1_128, %c0_129] : memref<10x10x128xbf16, #tpu.memory_space<vmem>>, vector<8x8x128xbf16>
    %140 = vector.shape_cast %139 : vector<8x8x128xbf16> to vector<64x128xbf16>
    %c7_130 = arith.constant 7 : index
    %c0_131 = arith.constant 0 : index
    %c0_132 = arith.constant 0 : index
    %141 = vector.load %arg5[%c7_130, %c0_131, %c0_132] : memref<9x128x128xbf16, #tpu.memory_space<vmem>>, vector<1x128x128xbf16>
    %142 = vector.shape_cast %141 : vector<1x128x128xbf16> to vector<128x128xbf16>
    %cst_133 = arith.constant dense<0.000000e+00> : vector<64x128xf32>
    %143 = tpu.matmul %140, %142, %cst_133 {dimension_numbers = #tpu.dot_dimension_numbers<[1], [0], [0], [1], [0, 0, 1, 1], [], []>} : vector<64x128xbf16>, vector<128x128xbf16>, vector<64x128xf32> -> vector<64x128xf32>
    %144 = arith.addf %138, %143 : vector<64x128xf32>
    %c2_134 = arith.constant 2 : index
    %c2_135 = arith.constant 2 : index
    %c0_136 = arith.constant 0 : index
    %145 = vector.load %arg12[%c2_134, %c2_135, %c0_136] : memref<10x10x128xbf16, #tpu.memory_space<vmem>>, vector<8x8x128xbf16>
    %146 = vector.shape_cast %145 : vector<8x8x128xbf16> to vector<64x128xbf16>
    %c8_137 = arith.constant 8 : index
    %c0_138 = arith.constant 0 : index
    %c0_139 = arith.constant 0 : index
    %147 = vector.load %arg5[%c8_137, %c0_138, %c0_139] : memref<9x128x128xbf16, #tpu.memory_space<vmem>>, vector<1x128x128xbf16>
    %148 = vector.shape_cast %147 : vector<1x128x128xbf16> to vector<128x128xbf16>
    %cst_140 = arith.constant dense<0.000000e+00> : vector<64x128xf32>
    %149 = tpu.matmul %146, %148, %cst_140 {dimension_numbers = #tpu.dot_dimension_numbers<[1], [0], [0], [1], [0, 0, 1, 1], [], []>} : vector<64x128xbf16>, vector<128x128xbf16>, vector<64x128xf32> -> vector<64x128xf32>
    %150 = arith.addf %144, %149 : vector<64x128xf32>
    %c0_141 = arith.constant 0 : index
    %c0_142 = arith.constant 0 : index
    %151 = vector.load %arg6[%c0_141, %c0_142] : memref<1x128xf32, #tpu.memory_space<vmem>>, vector<1x128xf32>
    %c0_143 = arith.constant 0 : index
    %c0_144 = arith.constant 0 : index
    %152 = vector.load %arg7[%c0_143, %c0_144] : memref<1x128xf32, #tpu.memory_space<vmem>>, vector<1x128xf32>
    %cst_145 = arith.constant dense<0.000000e+00> : vector<128xf32>
    %153 = vector.multi_reduction <add>, %150, %cst_145 [0] : vector<64x128xf32> to vector<128xf32>
    %154 = vector.shape_cast %153 : vector<128xf32> to vector<1x128xf32>
    %155 = arith.mulf %150, %150 : vector<64x128xf32>
    %cst_146 = arith.constant dense<0.000000e+00> : vector<128xf32>
    %156 = vector.multi_reduction <add>, %155, %cst_146 [0] : vector<64x128xf32> to vector<128xf32>
    %157 = vector.shape_cast %156 : vector<128xf32> to vector<1x128xf32>
    %cst_147 = arith.constant 1.562500e-02 : f32
    %158 = vector.broadcast %cst_147 : f32 to vector<1x128xf32>
    %159 = arith.mulf %154, %158 : vector<1x128xf32>
    %cst_148 = arith.constant 1.562500e-02 : f32
    %160 = vector.broadcast %cst_148 : f32 to vector<1x128xf32>
    %161 = arith.mulf %157, %160 : vector<1x128xf32>
    %162 = arith.mulf %159, %159 : vector<1x128xf32>
    %163 = arith.subf %161, %162 : vector<1x128xf32>
    %cst_149 = arith.constant 0.000000e+00 : f32
    %164 = vector.broadcast %cst_149 : f32 to vector<1x128xf32>
    %165 = arith.maximumf %163, %164 : vector<1x128xf32>
    %cst_150 = arith.constant 9.99999974E-6 : f32
    %166 = vector.broadcast %cst_150 : f32 to vector<1x128xf32>
    %167 = arith.addf %165, %166 : vector<1x128xf32>
    %168 = math.rsqrt %167 : vector<1x128xf32>
    %169 = arith.mulf %168, %151 : vector<1x128xf32>
    %170 = vector.broadcast %169 : vector<1x128xf32> to vector<64x128xf32>
    %171 = arith.mulf %150, %170 : vector<64x128xf32>
    %172 = arith.mulf %159, %169 : vector<1x128xf32>
    %173 = arith.subf %152, %172 : vector<1x128xf32>
    %174 = vector.broadcast %173 : vector<1x128xf32> to vector<64x128xf32>
    %175 = arith.addf %171, %174 : vector<64x128xf32>
    %c0_151 = arith.constant 0 : index
    %c27_152 = arith.constant 27 : index
    %c0_153 = arith.constant 0 : index
    %c0_154 = arith.constant 0 : index
    %176 = vector.load %arg1[%c0_151, %c27_152, %c0_153, %c0_154] : memref<1x36x9x8xbf16, #tpu.memory_space<vmem>>, vector<1x8x8x8xbf16>
    %177 = vector.shape_cast %176 : vector<1x8x8x8xbf16> to vector<8x8x8xbf16>
    %178 = vector.shape_cast %177 : vector<8x8x8xbf16> to vector<64x8xbf16>
    %c0_155 = arith.constant 0 : index
    %c0_156 = arith.constant 0 : index
    %179 = vector.load %arg8[%c0_155, %c0_156] : memref<8x128xbf16, #tpu.memory_space<vmem>>, vector<8x128xbf16>
    %cst_157 = arith.constant dense<0.000000e+00> : vector<64x128xf32>
    %180 = tpu.matmul %178, %179, %cst_157 {dimension_numbers = #tpu.dot_dimension_numbers<[1], [0], [0], [1], [0, 0, 1, 1], [], []>} : vector<64x8xbf16>, vector<8x128xbf16>, vector<64x128xf32> -> vector<64x128xf32>
    %c0_158 = arith.constant 0 : index
    %c0_159 = arith.constant 0 : index
    %181 = vector.load %arg9[%c0_158, %c0_159] : memref<1x128xf32, #tpu.memory_space<vmem>>, vector<1x128xf32>
    %c0_160 = arith.constant 0 : index
    %c0_161 = arith.constant 0 : index
    %182 = vector.load %arg10[%c0_160, %c0_161] : memref<1x128xf32, #tpu.memory_space<vmem>>, vector<1x128xf32>
    %cst_162 = arith.constant dense<0.000000e+00> : vector<128xf32>
    %183 = vector.multi_reduction <add>, %180, %cst_162 [0] : vector<64x128xf32> to vector<128xf32>
    %184 = vector.shape_cast %183 : vector<128xf32> to vector<1x128xf32>
    %185 = arith.mulf %180, %180 : vector<64x128xf32>
    %cst_163 = arith.constant dense<0.000000e+00> : vector<128xf32>
    %186 = vector.multi_reduction <add>, %185, %cst_163 [0] : vector<64x128xf32> to vector<128xf32>
    %187 = vector.shape_cast %186 : vector<128xf32> to vector<1x128xf32>
    %cst_164 = arith.constant 1.562500e-02 : f32
    %188 = vector.broadcast %cst_164 : f32 to vector<1x128xf32>
    %189 = arith.mulf %184, %188 : vector<1x128xf32>
    %cst_165 = arith.constant 1.562500e-02 : f32
    %190 = vector.broadcast %cst_165 : f32 to vector<1x128xf32>
    %191 = arith.mulf %187, %190 : vector<1x128xf32>
    %192 = arith.mulf %189, %189 : vector<1x128xf32>
    %193 = arith.subf %191, %192 : vector<1x128xf32>
    %cst_166 = arith.constant 0.000000e+00 : f32
    %194 = vector.broadcast %cst_166 : f32 to vector<1x128xf32>
    %195 = arith.maximumf %193, %194 : vector<1x128xf32>
    %cst_167 = arith.constant 9.99999974E-6 : f32
    %196 = vector.broadcast %cst_167 : f32 to vector<1x128xf32>
    %197 = arith.addf %195, %196 : vector<1x128xf32>
    %198 = math.rsqrt %197 : vector<1x128xf32>
    %199 = arith.mulf %198, %181 : vector<1x128xf32>
    %200 = vector.broadcast %199 : vector<1x128xf32> to vector<64x128xf32>
    %201 = arith.mulf %180, %200 : vector<64x128xf32>
    %202 = arith.mulf %189, %199 : vector<1x128xf32>
    %203 = arith.subf %182, %202 : vector<1x128xf32>
    %204 = vector.broadcast %203 : vector<1x128xf32> to vector<64x128xf32>
    %205 = arith.addf %201, %204 : vector<64x128xf32>
    %206 = arith.addf %175, %205 : vector<64x128xf32>
    %cst_168 = arith.constant 0.000000e+00 : f32
    %207 = vector.broadcast %cst_168 : f32 to vector<64x128xf32>
    %208 = arith.maximumf %206, %207 : vector<64x128xf32>
    %c0_169 = arith.constant 0 : index
    %c0_170 = arith.constant 0 : index
    %c0_171 = arith.constant 0 : index
    %209 = vector.load %arg11[%c0_169, %c0_170, %c0_171] : memref<1x64x128xf32, #tpu.memory_space<vmem>>, vector<1x64x128xf32>
    %210 = vector.shape_cast %209 : vector<1x64x128xf32> to vector<64x128xf32>
    %211 = vector.shape_cast %208 : vector<64x128xf32> to vector<1x64x128xf32>
    tpu.vector_store %arg11[%c0_169, %c0_170, %c0_171], %211 {strides = array<i32>} : memref<1x64x128xf32, #tpu.memory_space<vmem>>, vector<1x64x128xf32>,
    return
  }
  func.func @transform_0(%arg0: i32) -> (i32, i32, i32, i32) {
    %c0_i32 = arith.constant 0 : i32
    %c0_i32_0 = arith.constant 0 : i32
    %c0_i32_1 = arith.constant 0 : i32
    %c0_i32_2 = arith.constant 0 : i32
    return %arg0, %c0_i32, %c0_i32_0, %c0_i32_1 : i32, i32, i32, i32
  }
  func.func @transform_1(%arg0: i32) -> (i32, i32, i32) {
    %c0_i32 = arith.constant 0 : i32
    %c0_i32_0 = arith.constant 0 : i32
    %c0_i32_1 = arith.constant 0 : i32
    %c0_i32_2 = arith.constant 0 : i32
    return %c0_i32, %c0_i32_0, %c0_i32_1 : i32, i32, i32
  }
  func.func @transform_2(%arg0: i32) -> (i32, i32) {
    %c0_i32 = arith.constant 0 : i32
    %c0_i32_0 = arith.constant 0 : i32
    %c0_i32_1 = arith.constant 0 : i32
    return %c0_i32, %c0_i32_0 : i32, i32
  }
  func.func @transform_3(%arg0: i32) -> (i32, i32) {
    %c0_i32 = arith.constant 0 : i32
    %c0_i32_0 = arith.constant 0 : i32
    %c0_i32_1 = arith.constant 0 : i32
    return %c0_i32, %c0_i32_0 : i32, i32
  }
  func.func @transform_4(%arg0: i32) -> (i32, i32, i32) {
    %c0_i32 = arith.constant 0 : i32
    %c0_i32_0 = arith.constant 0 : i32
    %c0_i32_1 = arith.constant 0 : i32
    %c0_i32_2 = arith.constant 0 : i32
    return %c0_i32, %c0_i32_0, %c0_i32_1 : i32, i32, i32
  }
  func.func @transform_5(%arg0: i32) -> (i32, i32) {
    %c0_i32 = arith.constant 0 : i32
    %c0_i32_0 = arith.constant 0 : i32
    %c0_i32_1 = arith.constant 0 : i32
    return %c0_i32, %c0_i32_0 : i32, i32
  }
  func.func @transform_6(%arg0: i32) -> (i32, i32) {
    %c0_i32 = arith.constant 0 : i32
    %c0_i32_0 = arith.constant 0 : i32
    %c0_i32_1 = arith.constant 0 : i32
    return %c0_i32, %c0_i32_0 : i32, i32
  }
  func.func @transform_7(%arg0: i32) -> (i32, i32) {
    %c0_i32 = arith.constant 0 : i32
    %c0_i32_0 = arith.constant 0 : i32
    %c0_i32_1 = arith.constant 0 : i32
    return %c0_i32, %c0_i32_0 : i32, i32
  }
  func.func @transform_8(%arg0: i32) -> (i32, i32) {
    %c0_i32 = arith.constant 0 : i32
    %c0_i32_0 = arith.constant 0 : i32
    %c0_i32_1 = arith.constant 0 : i32
    return %c0_i32, %c0_i32_0 : i32, i32
  }
  func.func @transform_9(%arg0: i32) -> (i32, i32) {
    %c0_i32 = arith.constant 0 : i32
    %c0_i32_0 = arith.constant 0 : i32
    %c0_i32_1 = arith.constant 0 : i32
    return %c0_i32, %c0_i32_0 : i32, i32
  }
  func.func @transform_10(%arg0: i32) -> (i32, i32, i32) {
    %c0_i32 = arith.constant 0 : i32
    %c0_i32_0 = arith.constant 0 : i32
    %c0_i32_1 = arith.constant 0 : i32
    return %arg0, %c0_i32, %c0_i32_0 : i32, i32, i32
  }
}

</mosaic_0001>

<bundles_post_ra>
// kernel: basic_block_forward.1
= control target key start
LH: loop header
LB: loop body
LE: loop exit
PB: predicated region body
PF: predicated region fallthrough
CT: control target
= control target key end

     0   :  { %s4551_s13 = smov 0   ;;  %s5596_s0 = inlined_call_operand.vmem [shape: bf16[2,36,9,8], index: 0, kind: input, shape index: {}]   ;;  %s5597_s1 = inlined_call_operand.vmem [shape: bf16[9,8,128], index: 1, kind: input, shape index: {}]   ;;  %s5598_s2 = inlined_call_operand.vmem [shape: f32[1,128], index: 2, kind: input, shape index: {}]   ;;  %s5599_s3 = inlined_call_operand.vmem [shape: f32[1,128], index: 3, kind: input, shape index: {}]   ;;  %s5600_s4 = inlined_call_operand.vmem [shape: bf16[9,128,128], index: 4, kind: input, shape index: {}]   ;;  %s5601_s5 = inlined_call_operand.vmem [shape: f32[1,128], index: 5, kind: input, shape index: {}]   ;;  %s5602_s6 = inlined_call_operand.vmem [shape: f32[1,128], index: 6, kind: input, shape index: {}]   ;;  %s5603_s7 = inlined_call_operand.vmem [shape: bf16[8,128], index: 7, kind: input, shape index: {}]   ;;  %s5604_s8 = inlined_call_operand.vmem [shape: f32[1,128], index: 8, kind: input, shape index: {}]   ;;  %s5605_s9 = inlined_call_operand.vmem [shape: f32[1,128], index: 9, kind: input, shape index: {}]   ;;  %s5606_s10 = inlined_call_operand.vmem [shape: f32[2,64,128], index: 10, kind: output, shape index: {}]  }
   0x1 LB: > { %s3617_s14 = sadd.s32 4294967295, %s4493_s13   ;;  %p3621_p0 = scmp.ge.s32.totalorder %s4493_s13, 1  ;;  %s4493_s13 = sphi %s4551_s13, %s20_s13  }
   0x2   : > { %p312_p1 = scmp.lt.s32.totalorder %s4493_s13, 3 }
   0x4   : > { %p313_p2 = pnand %p3621_p0, %p312_p1 }
   0x5   : > { %p350_p3 = scmp.lt.s32.totalorder (!%p313_p2), %s3617_s14, 1 }
   0x6   : > { %316 = sbr.rel (%p313_p2) target bundleno = 805 (0x325), region = 60 }
   0xb   : > { %v3633_v0 = vld [vmem:[%s5597_s1 + $0x4] sm:$0xf]  ;;  %vm414_vm0 = vcmask 1043456   ;;  %v3674_v2 = vld [vmem:[%s5597_s1 + $0x8] sm:$0xf]  ;;  %s5616_s14 = smov (!%p350_p3, %s3617_s14), 1 }
   0xc   : > { %v416_v1 = vsel %vm414_vm0, %v3633_v0, 0  ;;  %v369_v3 = vld [vmem:[%s5597_s1] sm:$0xf]  ;;  %v669_v4 = vsel %vm414_vm0, %v3674_v2, 0  ;;  %v3687_v6 = vld [vmem:[%s5597_s1 + $0xc] sm:$0xf] }
   0xd   : > { %425 = vmatpush.bf16.msra.mxu0 %v416_v1  ;;  %v480_v5 = vsel %vm414_vm0, %v369_v3, 0  ;;  %678 = vmatpush.bf16.msra.mxu2 %v669_v4  ;;  %s4471_s23 = smul.u32 288, %s5616_s14  ;;  %v752_v7 = vsel %vm414_vm0, %v3687_v6, 0  ;;  %vm401_vm1 = vcmask 64512   ;;  %vm527_vm2 = vsmask.f32 3328 }
   0xe   : > { %4469 = vmatpush.bf16.msra.mxu3 %v669_v4  ;;  %4468 = vmatpush.bf16.msra.mxu1 %v480_v5  ;;  %vm528_vm3 = vsmask.f32 7440  ;;  %vm1621_vm8 = vsmask.f32 7938  ;;  %vm1626_vm9 = vcmask 1040384   ;;  %vm2053_vm13 = vcmask 1042432  }
   0xf   : > { %s4581_s26 = scalar_lea.vmem %s5596_s0, %s4471_s23  ;;  %vm4596_vm4 = vmor %vm527_vm2, %vm528_vm3  ;;  %vm1627_vm10 = vsmask.f32 256  ;;  %vm2054_vm14 = vcmask 1046532   ;;  %s4355_s23 = sshll.u32 %s5616_s14, 6 }
  0x10   : > { %v3636_v8 = vld [vmem:[%s4581_s26 + $0x48] sm:$0xf]  ;;  %v4360_v9 = vld [vmem:[%s4581_s26 + $0x4c] sm:$0xf0]  ;;  %v511_v10 = vld [vmem:[%s4581_s26] sm:$0xf]  ;;  %s359_s27 = scalar_lea.vmem %s5606_s10, %s4355_s23 }
  0x11   : > { %489 = vmatpush.bf16.msrb.mxu0 %v480_v5  ;;  %v3637_v11 = vor.u32 %v4360_v9, %v3636_v8  ;;  %v512_v12 = vld [vmem:[%s4581_s26 + $0x4] sm:$0x1]  ;;  %v513_v13 = vld [vmem:[%s4581_s26 + $0x8] sm:$0xf]  ;;  %v514_v14 = vld [vmem:[%s4581_s26 + $0xc] sm:$0x1] }
  0x12   : > { %761 = vmatpush.bf16.msrb.mxu3 %v752_v7  ;;  %v531_v15 = vshrl.u32 %v511_v10, 16  ;;  %v534_v16 = vshll.u32 %v511_v10, 16  ;;  %v540_v17 = vshll.u32 %v512_v12, 16  ;;  %v545_v18 = vshrl.u32 %v513_v13, 16  ;;  %v523_v19 = vld [vmem:[%s4581_s26 + $0x30] sm:$0xf]  ;;  %vm5044_vm11 = vmand %vm1626_vm9, %vm1627_vm10 }
  0x13   : > { %3650 = vmatmul.msk.bf16.vlgmr.msra.gmra.mxu0 %vm401_vm1, %v3637_v11  ;;  %v548_v20 = vshll.u32 %v513_v13, 16  ;;  %v554_v21 = vshll.u32 %v514_v14, 16  ;;  %v524_v22 = vld [vmem:[%s4581_s26 + $0x34] sm:$0x1]  ;;  %v525_v23 = vld [vmem:[%s4581_s26 + $0x38] sm:$0xf]  ;;  %vm5051_vm12 = vmand %vm414_vm0, %vm1621_vm8 }
  0x14   : > { %v533_v24 = vrot.slane %v531_v15, 4  ;;  %v536_v25 = vrot.slane %v534_v16, 5  ;;  %v542_v26 = vrot.slane %v540_v17, 5  ;;  %v547_v27 = vrot.slane %v545_v18, 4  ;;  %v526_v28 = vld [vmem:[%s4581_s26 + $0x3c] sm:$0x1]  ;;  %vm5089_vm15 = vmor %vm2053_vm13, %vm2054_vm14 }
  0x15   : > { %v550_v29 = vrot.slane %v548_v20, 5  ;;  %v556_v30 = vrot.slane %v554_v21, 5  ;;  %v615_v31 = vshrl.u32 %v523_v19, 16  ;;  %v618_v32 = vshll.u32 %v523_v19, 16  ;;  %v3660_v42 = vld [vmem:[%s4581_s26 + $0x10] sm:$0xf] }
  0x16   : > { %v537_v33 = vor.u32 %v536_v25, %v533_v24  ;;  %v624_v34 = vshll.u32 %v524_v22, 16  ;;  %v629_v35 = vshrl.u32 %v525_v23, 16  ;;  %v632_v36 = vshll.u32 %v525_v23, 16  ;;  %v4357_v47 = vld [vmem:[%s4581_s26 + $0x14] sm:$0xf0] }
  0x17   : > { %v551_v38 = vor.u32 %v550_v29, %v547_v27  ;;  %v617_v39 = vrot.slane %v615_v31, 4  ;;  %v620_v40 = vrot.slane %v618_v32, 5  ;;  %v638_v41 = vshll.u32 %v526_v28, 16  ;;  %v515_v51 = vld [vmem:[%s4581_s26 + $0x10] sm:$0xf] }
  0x18   : > { %v538_v43 = vrot.slane %v537_v33, 4  ;;  %v626_v44 = vrot.slane %v624_v34, 5  ;;  %v631_v45 = vrot.slane %v629_v35, 4  ;;  %v634_v46 = vrot.slane %v632_v36, 5  ;;  %v516_v52 = vld [vmem:[%s4581_s26 + $0x14] sm:$0x1] }
  0x19   : > { %v552_v48 = vrot.slane %v551_v38, 4  ;;  %v621_v49 = vor.u32 %v620_v40, %v617_v39  ;;  %v640_v50 = vrot.slane %v638_v41, 5  ;;  %v3661_v55 = vor.u32 %v4357_v47, %v3660_v42  ;;  %v517_v56 = vld [vmem:[%s4581_s26 + $0x18] sm:$0xf]  ;;  %v4361_v62 = vld [vmem:[%s4581_s26 + $0x5c] sm:$0xf0] }
  0x1a   : > { %v543_v53 = vsel %vm4596_vm4, %v538_v43, %v542_v26  ;;  %v635_v54 = vor.u32 %v634_v46, %v631_v45  ;;  %v559_v57 = vshrl.u32 %v515_v51, 16  ;;  %v3640_v61 = vld [vmem:[%s4581_s26 + $0x58] sm:$0xf]  ;;  %v562_v63 = vshll.u32 %v515_v51, 16  ;;  %v518_v5 = vld [vmem:[%s4581_s26 + $0x1c] sm:$0x1] }
  0x1b   : > { %v557_v58 = vsel %vm4596_vm4, %v552_v48, %v556_v30  ;;  %v644_v59 = vunpack.c.l.b16 %v543_v53  ;;  %v622_v60 = vrot.slane %v621_v49, 4  ;;  %3671 = vmatmul.msk.bf16.vlgmr.msra.gmra.mxu1 %vm401_vm1, %v3661_v55  ;;  %v568_v3 = vshll.u32 %v516_v52, 16  ;;  %v3795_v13 = vld [vmem:[%s5597_s1 + $0x1c] sm:$0xf]  ;;  %v519_v24 = vld [vmem:[%s4581_s26 + $0x20] sm:$0xf] }
  0x1c   : > { %v645_v0 = vunpack.c.l.b16 %v557_v58  ;;  %v636_v1 = vrot.slane %v635_v54, 4  ;;  %v561_v2 = vrot.slane %v559_v57, 4  ;;  %v564_v6 = vrot.slane %v562_v63, 5  ;;  %v521_v26 = vld [vmem:[%s4581_s26 + $0x28] sm:$0xf] }
  0x1d   : > { %v627_v4 = vsel %vm4596_vm4, %v622_v60, %v626_v44  ;;  %v573_v7 = vshrl.u32 %v517_v56, 16  ;;  %v576_v8 = vshll.u32 %v517_v56, 16  ;;  %v3641_v12 = vor.u32 %v4361_v62, %v3640_v61  ;;  %v3664_v32 = vld [vmem:[%s4581_s26 + $0x20] sm:$0xf]  ;;  %v4358_v33 = vld [vmem:[%s4581_s26 + $0x24] sm:$0xf0] }
  0x1e   : > { %v652_v9 = vpack.c.b16 %v645_v0, %v644_v59  ;;  %v641_v10 = vsel %vm4596_vm4, %v636_v1, %v640_v50  ;;  %v650_v11 = vunpack.c.l.b16 %v627_v4  ;;  %v565_v15 = vor.u32 %v564_v6, %v561_v2  ;;  %v520_v44 = vld [vmem:[%s4581_s26 + $0x24] sm:$0x1]  ;;  %v522_v45 = vld [vmem:[%s4581_s26 + $0x2c] sm:$0x1]  ;;  %v3690_v46 = vld [vmem:[%s4581_s26 + $0x90] sm:$0xf] }
  0x1f   : > { %v651_v14 = vunpack.c.l.b16 %v641_v10  ;;  %v575_v16 = vrot.slane %v573_v7, 4  ;;  %v578_v17 = vrot.slane %v576_v8, 5  ;;  %v570_v18 = vrot.slane %v568_v3, 5  ;;  %v4364_v48 = vld [vmem:[%s4581_s26 + $0x94] sm:$0xf0] }
  0x20   : > { %3675 = vmatmul.msk.bf16.vlgmr.msra.gmra.mxu2 %vm401_vm1, %v652_v9  ;;  %v582_v19 = vshll.u32 %v518_v5, 16  ;;  %v566_v21 = vrot.slane %v565_v15, 4  ;;  %v1195_v23 = vsel %vm414_vm0, %v3795_v13, 0  ;;  %v587_v28 = vshrl.u32 %v519_v24, 16  ;;  %v3644_v49 = vld [vmem:[%s4581_s26 + $0x68] sm:$0xf] }
  0x21   : > { %v655_v20 = vpack.c.b16 %v651_v14, %v650_v11  ;;  %v579_v22 = vor.u32 %v578_v17, %v575_v16  ;;  %v590_v29 = vshll.u32 %v519_v24, 16  ;;  %v601_v34 = vshrl.u32 %v521_v26, 16  ;;  %v4362_v50 = vld [vmem:[%s4581_s26 + $0x6c] sm:$0xf0]  ;;  %v3766_v61 = vld [vmem:[%s5597_s1 + $0x18] sm:$0xf] }
  0x22   : > { %v584_v25 = vrot.slane %v582_v19, 5  ;;  %v571_v30 = vsel %vm4596_vm4, %v566_v21, %v570_v18  ;;  %v604_v35 = vshll.u32 %v521_v26, 16  ;;  %v3665_v39 = vor.u32 %v4358_v33, %v3664_v32  ;;  %v3716_v63 = vld [vmem:[%s5597_s1 + $0x10] sm:$0xf]  ;;  %v4359_v3 = vld [vmem:[%s4581_s26 + $0x34] sm:$0xf0] }
  0x23   : > { %3678 = vmatmul.msk.bf16.vlgmr.msra.gmra.mxu3 %vm401_vm1, %v655_v20  ;;  %3651 = vmatmul.msk.bf16.gmra.mxu0 %vm401_vm1, %v3641_v12  ;;  %v580_v27 = vrot.slane %v579_v22, 4  ;;  %v646_v36 = vunpack.c.l.b16 %v571_v30  ;;  %v589_v40 = vrot.slane %v587_v28, 4  ;;  %v592_v41 = vrot.slane %v590_v29, 5  ;;  %v3668_v2 = vld [vmem:[%s4581_s26 + $0x30] sm:$0xf] }
  0x24   : > { %1204 = vmatpush.bf16.msra.mxu3 %v1195_v23  ;;  %v603_v42 = vrot.slane %v601_v34, 4  ;;  %v606_v43 = vrot.slane %v604_v35, 5  ;;  %v596_v52 = vshll.u32 %v520_v44, 16  ;;  %v610_v54 = vshll.u32 %v522_v45, 16  ;;  %v3694_v8 = vld [vmem:[%s4581_s26 + $0xa0] sm:$0xf] }
  0x25   : > { %v585_v31 = vsel %vm4596_vm4, %v580_v27, %v584_v25  ;;  %v593_v51 = vor.u32 %v592_v41, %v589_v40  ;;  %v3691_v55 = vor.u32 %v4364_v48, %v3690_v46  ;;  %v3645_v56 = vor.u32 %v4362_v50, %v3644_v49  ;;  %v4365_v9 = vld [vmem:[%s4581_s26 + $0xa4] sm:$0xf0]  ;;  %v3648_v10 = vld [vmem:[%s4581_s26 + $0x78] sm:$0xf]  ;;  %v4363_v11 = vld [vmem:[%s4581_s26 + $0x7c] sm:$0xf0] }
  0x26   : > { %v647_v38 = vunpack.c.l.b16 %v585_v31  ;;  %v607_v53 = vor.u32 %v606_v43, %v603_v42  ;;  %v598_v58 = vrot.slane %v596_v52, 5  ;;  %v612_v60 = vrot.slane %v610_v54, 5  ;;  %v3737_v13 = vld [vmem:[%s4581_s26 + $0x90] sm:$0xf]  ;;  %v3739_v14 = vld [vmem:[%s4581_s26 + $0x98] sm:$0xf] }
  0x27   : > { %v594_v57 = vrot.slane %v593_v51, 4  ;;  %v1112_v62 = vsel %vm414_vm0, %v3766_v61, 0  ;;  %v835_v4 = vsel %vm414_vm0, %v3716_v63, 0  ;;  %v3669_v7 = vor.u32 %v4359_v3, %v3668_v2  ;;  %v3738_v25 = vld [vmem:[%s4581_s26 + $0x94] sm:$0x1] }
  0x28   : > { %v653_v47 = vpack.c.b16 %v647_v38, %v646_v36  ;;  %v608_v59 = vrot.slane %v607_v53, 4  ;;  %1121 = vmatpush.bf16.msrb.mxu2 %v1112_v62  ;;  %844 = vmatpush.bf16.msra.mxu0 %v835_v4  ;;  %v891_v15 = vshrl.u32 %v3737_v13, 16  ;;  %v894_v16 = vshll.u32 %v3737_v13, 16  ;;  %v3740_v26 = vld [vmem:[%s4581_s26 + $0x9c] sm:$0x1] }
  0x29   : > { %v599_v0 = vsel %vm4596_vm4, %v594_v57, %v598_v58  ;;  %v905_v17 = vshrl.u32 %v3739_v14, 16  ;;  %v908_v18 = vshll.u32 %v3739_v14, 16  ;;  %v3695_v19 = vor.u32 %v4365_v9, %v3694_v8  ;;  %v3753_v31 = vld [vmem:[%s5597_s1 + $0x14] sm:$0xf]  ;;  %v3832_v38 = vld [vmem:[%s5597_s1 + $0x20] sm:$0xf] }
  0x2a   : > { %v613_v1 = vsel %vm4596_vm4, %v608_v59, %v612_v60  ;;  %v648_v5 = vunpack.c.l.b16 %v599_v0  ;;  %v3649_v20 = vor.u32 %v4363_v11, %v3648_v10  ;;  %v893_v21 = vrot.slane %v891_v15, 4  ;;  %v3769_v44 = vld [vmem:[%s4581_s26 + $0x8] sm:$0xf]  ;;  %v4372_v45 = vld [vmem:[%s4581_s26 + $0xc] sm:$0xf0] }
  0x2b   : > { %3672 = vmatmul.msk.bf16.gmra.mxu1 %vm401_vm1, %v3665_v39  ;;  %v649_v6 = vunpack.c.l.b16 %v613_v1  ;;  %v896_v22 = vrot.slane %v894_v16, 5  ;;  %v907_v23 = vrot.slane %v905_v17, 4  ;;  %v910_v24 = vrot.slane %v908_v18, 5  ;;  %v3698_v46 = vld [vmem:[%s4581_s26 + $0xb0] sm:$0xf] }
  0x2c   : > { %v900_v28 = vshll.u32 %v3738_v25, 16  ;;  %v914_v30 = vshll.u32 %v3740_v26, 16  ;;  %v1029_v32 = vsel %vm414_vm0, %v3753_v31, 0  ;;  %v1389_v39 = vsel %vm414_vm0, %v3832_v38, 0  ;;  %v4366_v48 = vld [vmem:[%s4581_s26 + $0xb4] sm:$0xf0] }
  0x2d   : > { %v654_v12 = vpack.c.b16 %v649_v6, %v648_v5  ;;  %v897_v27 = vor.u32 %v896_v22, %v893_v21  ;;  %v911_v29 = vor.u32 %v910_v24, %v907_v23  ;;  %1038 = vmatpush.bf16.msrb.mxu1 %v1029_v32  ;;  %v3656_v49 = vld [vmem:[%s4581_s26] sm:$0xf]  ;;  %v4356_v50 = vld [vmem:[%s4581_s26 + $0x4] sm:$0xf0]  ;;  %v3770_v51 = vor.u32 %v4372_v45, %v3769_v44  ;;  %v3742_v0 = vld [vmem:[%s4581_s26 + $0xa4] sm:$0x1] }
  0x2e   : > { %v902_v34 = vrot.slane %v900_v28, 5  ;;  %v916_v36 = vrot.slane %v914_v30, 5  ;;  %v3741_v52 = vld [vmem:[%s4581_s26 + $0xa0] sm:$0xf]  ;;  %v3743_v53 = vld [vmem:[%s4581_s26 + $0xa8] sm:$0xf]  ;;  %v3699_v58 = vor.u32 %v4366_v48, %v3698_v46  ;;  %v3657_v59 = vor.u32 %v4356_v50, %v3656_v49 }
  0x2f   : > { %v898_v33 = vrot.slane %v897_v27, 4  ;;  %v912_v35 = vrot.slane %v911_v29, 4  ;;  %v919_v54 = vshrl.u32 %v3741_v52, 16  ;;  %v936_v57 = vshll.u32 %v3743_v53, 16  ;;  %v3744_v1 = vld [vmem:[%s4581_s26 + $0xac] sm:$0x1] }
  0x30   : > { %3676 = vmatmul.msk.bf16.gmra.mxu2 %vm401_vm1, %v653_v47  ;;  %v928_v3 = vshll.u32 %v3742_v0, 16  ;;  %v942_v5 = vshll.u32 %v3744_v1, 16  ;;  %v3773_v14 = vld [vmem:[%s4581_s26 + $0x18] sm:$0xf]  ;;  %v4373_v15 = vld [vmem:[%s4581_s26 + $0x1c] sm:$0xf0] }
  0x31   : > { %v903_v40 = vsel %vm4596_vm4, %v898_v33, %v902_v34  ;;  %v917_v41 = vsel %vm4596_vm4, %v912_v35, %v916_v36  ;;  %v921_v60 = vrot.slane %v919_v54, 4  ;;  %v938_v63 = vrot.slane %v936_v57, 5  ;;  %v3702_v16 = vld [vmem:[%s4581_s26 + $0xc0] sm:$0xf]  ;;  %v4367_v18 = vld [vmem:[%s4581_s26 + $0xc4] sm:$0xf0] }
  0x32   : > { %v1004_v42 = vunpack.c.l.b16 %v903_v40  ;;  %v1005_v43 = vunpack.c.l.b16 %v917_v41  ;;  %v944_v9 = vrot.slane %v942_v5, 5  ;;  %v3774_v21 = vor.u32 %v4373_v15, %v3773_v14  ;;  %v3745_v22 = vld [vmem:[%s4581_s26 + $0xb0] sm:$0xf]  ;;  %v3747_v23 = vld [vmem:[%s4581_s26 + $0xb8] sm:$0xf] }
  0x33   : > { %3704 = vmatmul.msk.bf16.vlgmr.msrb.gmra.mxu3 %vm401_vm1, %v3691_v55  ;;  %3652 = vmatmul.msk.bf16.gmra.mxu0 %vm401_vm1, %v3645_v56  ;;  %v922_v55 = vshll.u32 %v3741_v52, 16  ;;  %v933_v56 = vshrl.u32 %v3743_v53, 16  ;;  %v947_v24 = vshrl.u32 %v3745_v22, 16  ;;  %v950_v25 = vshll.u32 %v3745_v22, 16  ;;  %v3746_v34 = vld [vmem:[%s4581_s26 + $0xb4] sm:$0x1] }
  0x34   : > { %4470 = vmatpush.bf16.msrb.mxu3 %v1389_v39  ;;  %v1012_v47 = vpack.c.b16 %v1005_v43, %v1004_v42  ;;  %v961_v26 = vshrl.u32 %v3747_v23, 16  ;;  %v964_v27 = vshll.u32 %v3747_v23, 16  ;;  %v3703_v28 = vor.u32 %v4367_v18, %v3702_v16  ;;  %v3748_v35 = vld [vmem:[%s4581_s26 + $0xbc] sm:$0x1]  ;;  %v3777_v49 = vld [vmem:[%s4581_s26 + $0x28] sm:$0xf] }
  0x35   : > { %v924_v61 = vrot.slane %v922_v55, 5  ;;  %v935_v62 = vrot.slane %v933_v56, 4  ;;  %v949_v30 = vrot.slane %v947_v24, 4  ;;  %v952_v31 = vrot.slane %v950_v25, 5  ;;  %v4374_v50 = vld [vmem:[%s4581_s26 + $0x2c] sm:$0xf0] }
  0x36   : > { %v963_v32 = vrot.slane %v961_v26, 4  ;;  %v966_v33 = vrot.slane %v964_v27, 5  ;;  %v956_v38 = vshll.u32 %v3746_v34, 16  ;;  %v970_v40 = vshll.u32 %v3748_v35, 16  ;;  %v4376_v53 = vld [vmem:[%s4581_s26 + $0x54] sm:$0xf0] }
  0x37   : > { %v925_v2 = vor.u32 %v924_v61, %v921_v60  ;;  %v939_v4 = vor.u32 %v938_v63, %v935_v62  ;;  %v953_v36 = vor.u32 %v952_v31, %v949_v30  ;;  %v3723_v54 = vld [vmem:[%s4581_s26 + $0xe8] sm:$0xf]  ;;  %v4369_v55 = vld [vmem:[%s4581_s26 + $0xec] sm:$0xf0]  ;;  %v3778_v56 = vor.u32 %v4374_v50, %v3777_v49  ;;  %v3749_v57 = vld [vmem:[%s4581_s26 + $0xc0] sm:$0xf] }
  0x38   : > { %v958_v42 = vrot.slane %v956_v38, 5  ;;  %v972_v44 = vrot.slane %v970_v40, 5  ;;  %v978_v60 = vshll.u32 %v3749_v57, 16  ;;  %v3724_v0 = vor.u32 %v4369_v55, %v3723_v54  ;;  %v3750_v5 = vld [vmem:[%s4581_s26 + $0xc4] sm:$0x1] }
  0x39   : > { %v926_v6 = vrot.slane %v925_v2, 4  ;;  %v940_v8 = vrot.slane %v939_v4, 4  ;;  %v954_v41 = vrot.slane %v953_v36, 4  ;;  %v3802_v22 = vld [vmem:[%s4581_s26 + $0x60] sm:$0xf] }
  0x3a   : > { %v980_v2 = vrot.slane %v978_v60, 5  ;;  %v4377_v23 = vld [vmem:[%s4581_s26 + $0x64] sm:$0xf0]  ;;  %v3727_v24 = vld [vmem:[%s4581_s26 + $0xf8] sm:$0xf] }
  0x3b   : > { %3673 = vmatmul.msk.bf16.gmra.mxu1 %vm401_vm1, %v3669_v7  ;;  %v930_v7 = vrot.slane %v928_v3, 5  ;;  %v945_v11 = vsel %vm4596_vm4, %v940_v8, %v944_v9  ;;  %v959_v45 = vsel %vm4596_vm4, %v954_v41, %v958_v42  ;;  %v984_v8 = vshll.u32 %v3750_v5, 16  ;;  %v4370_v25 = vld [vmem:[%s4581_s26 + $0xfc] sm:$0xf0]  ;;  %v3818_v30 = vld [vmem:[%s4581_s26 + $0x10] sm:$0xf] }
  0x3c   : > { %v1007_v13 = vunpack.c.l.b16 %v945_v11  ;;  %v3803_v27 = vor.u32 %v4377_v23, %v3802_v22  ;;  %v1268_v34 = vshll.u32 %v3818_v30, 16  ;;  %v3806_v40 = vld [vmem:[%s4581_s26 + $0x70] sm:$0xf]  ;;  %v3817_v41 = vld [vmem:[%s4581_s26 + $0xc] sm:$0x1] }
  0x3d   : > { %v931_v10 = vsel %vm4596_vm4, %v926_v6, %v930_v7  ;;  %v3752_v6 = vld [vmem:[%s4581_s26 + $0xcc] sm:$0x1]  ;;  %v3819_v42 = vld [vmem:[%s4581_s26 + $0x14] sm:$0x1]  ;;  %v3822_v60 = vld [vmem:[%s4581_s26 + $0x20] sm:$0xf] }
  0x3e   : > { %v1274_v49 = vshll.u32 %v3819_v42, 16  ;;  %v3821_v23 = vld [vmem:[%s4581_s26 + $0x1c] sm:$0x1] }
  0x40   : > { %3677 = vmatmul.msk.bf16.gmra.mxu2 %vm401_vm1, %v654_v12  ;;  %v1006_v12 = vunpack.c.l.b16 %v931_v10  ;;  %v998_v10 = vshll.u32 %v3752_v6, 16  ;;  %v1293_v6 = vshrl.u32 %v3822_v60, 16 }
  0x42   : > { %v1013_v17 = vpack.c.b16 %v1007_v13, %v1006_v12  ;;  %v986_v12 = vrot.slane %v984_v8, 5  ;;  %v1000_v14 = vrot.slane %v998_v10, 5  ;;  %v4379_v10 = vld [vmem:[%s4581_s26 + $0x84] sm:$0xf0] }
  0x43   : > { %3705 = vmatmul.msk.bf16.gmra.mxu3 %vm401_vm1, %v3695_v19  ;;  %3653 = vmatmul.msk.bf16.gmra.mxu0 %vm401_vm1, %v3649_v20  ;;  %v3719_v19 = vld [vmem:[%s4581_s26 + $0xd8] sm:$0xf]  ;;  %v4368_v20 = vld [vmem:[%s4581_s26 + $0xdc] sm:$0xf0] }
  0x44   : > { %v3720_v29 = vor.u32 %v4368_v20, %v3719_v19  ;;  %v3781_v19 = vld [vmem:[%s4581_s26 + $0x38] sm:$0xf]  ;;  %v4375_v20 = vld [vmem:[%s4581_s26 + $0x3c] sm:$0xf0] }
  0x45   : > { %v3782_v26 = vor.u32 %v4375_v20, %v3781_v19 }
  0x4b   : > { %3754 = vmatmul.msk.bf16.vlgmr.msrb.gmra.mxu1 %vm401_vm1, %v1012_v47  ;;  %v1008_v47 = vunpack.c.l.b16 %v959_v45  ;;  %v4371_v45 = vld [vmem:[%s4581_s26 + $0x10c] sm:$0xf0] }
  0x50   : > { %3783 = vmatmul.msk.bf16.vlgmr.msrb.gmra.mxu2 %vm401_vm1, %v3770_v51  ;;  %v3798_v51 = vld [vmem:[%s4581_s26 + $0x50] sm:$0xf] }
  0x51   : > { %v3799_v63 = vor.u32 %v4376_v53, %v3798_v51 }
  0x53   : > { %3706 = vmatmul.msk.bf16.gmra.mxu3 %vm401_vm1, %v3699_v58  ;;  %3670 = vmatmul.msk.bf16.vlgmr.msrb.gmra.mxu0 %vm401_vm1, %v3657_v59  ;;  %v3751_v58 = vld [vmem:[%s4581_s26 + $0xc8] sm:$0xf]  ;;  %v975_v59 = vshrl.u32 %v3749_v57, 16 }
  0x54   : > { %1398 = vmatpush.bf16.msrb.mxu0 %v1389_v39  ;;  %v967_v39 = vor.u32 %v966_v33, %v963_v32  ;;  %v989_v61 = vshrl.u32 %v3751_v58, 16  ;;  %v992_v62 = vshll.u32 %v3751_v58, 16  ;;  %v1265_v33 = vshrl.u32 %v3818_v30, 16  ;;  %v3824_v57 = vld [vmem:[%s4581_s26 + $0x28] sm:$0xf] }
  0x55   : > { %v977_v1 = vrot.slane %v975_v59, 4  ;;  %v3826_v58 = vld [vmem:[%s4581_s26 + $0x30] sm:$0xf]  ;;  %v3820_v59 = vld [vmem:[%s4581_s26 + $0x18] sm:$0xf] }
  0x56   : > { %v968_v43 = vrot.slane %v967_v39, 4  ;;  %v991_v3 = vrot.slane %v989_v61, 4  ;;  %v994_v4 = vrot.slane %v992_v62, 5  ;;  %v1267_v38 = vrot.slane %v1265_v33, 4 }
  0x57   : > { %v981_v7 = vor.u32 %v980_v2, %v977_v1  ;;  %v1270_v39 = vrot.slane %v1268_v34, 5  ;;  %v1321_v1 = vshrl.u32 %v3826_v58, 16  ;;  %v1324_v2 = vshll.u32 %v3826_v58, 16 }
  0x58   : > { %v973_v46 = vsel %vm4596_vm4, %v968_v43, %v972_v44  ;;  %v995_v9 = vor.u32 %v994_v4, %v991_v3  ;;  %v4378_v43 = vld [vmem:[%s4581_s26 + $0x74] sm:$0xf0]  ;;  %v3731_v44 = vld [vmem:[%s4581_s26 + $0x108] sm:$0xf]  ;;  %v1279_v4 = vshrl.u32 %v3820_v59, 16  ;;  %v1282_v5 = vshll.u32 %v3820_v59, 16 }
  0x59   : > { %v1009_v48 = vunpack.c.l.b16 %v973_v46  ;;  %v982_v11 = vrot.slane %v981_v7, 4  ;;  %v3807_v50 = vor.u32 %v4378_v43, %v3806_v40  ;;  %v3732_v51 = vor.u32 %v4371_v45, %v3731_v44 }
  0x5a   : > { %v996_v13 = vrot.slane %v995_v9, 4  ;;  %v1296_v7 = vshll.u32 %v3822_v60, 16  ;;  %v3810_v9 = vld [vmem:[%s4581_s26 + $0x80] sm:$0xf]  ;;  %v1281_v19 = vrot.slane %v1279_v4, 4  ;;  %v1284_v20 = vrot.slane %v1282_v5, 5 }
  0x5b   : > { %3755 = vmatmul.msk.bf16.gmra.mxu1 %vm401_vm1, %v1013_v17  ;;  %v1014_v52 = vpack.c.b16 %v1009_v48, %v1008_v47  ;;  %v987_v15 = vsel %vm4596_vm4, %v982_v11, %v986_v12  ;;  %v1260_v47 = vshll.u32 %v3817_v41, 16  ;;  %v1271_v48 = vor.u32 %v1270_v39, %v1267_v38 }
  0x5c   : > { %v1001_v16 = vsel %vm4596_vm4, %v996_v13, %v1000_v14  ;;  %v1010_v17 = vunpack.c.l.b16 %v987_v15  ;;  %v3825_v13 = vld [vmem:[%s4581_s26 + $0x2c] sm:$0x1]  ;;  %v1298_v22 = vrot.slane %v1296_v7, 5  ;;  %v1288_v33 = vshll.u32 %v3821_v23, 16 }
  0x5d   : > { %v1011_v18 = vunpack.c.l.b16 %v1001_v16  ;;  %v1262_v54 = vrot.slane %v1260_v47, 5  ;;  %v1272_v55 = vrot.slane %v1271_v48, 4  ;;  %v1323_v16 = vrot.slane %v1321_v1, 4  ;;  %v3828_v48 = vld [vmem:[%s4581_s26 + $0x38] sm:$0xf] }
  0x5e   : > { %v1290_v45 = vrot.slane %v1288_v33, 5 }
  0x60   : > { %3784 = vmatmul.msk.bf16.gmra.mxu2 %vm401_vm1, %v3774_v21  ;;  %v1015_v21 = vpack.c.b16 %v1011_v18, %v1010_v17  ;;  %v1326_v17 = vrot.slane %v1324_v2, 5  ;;  %v3827_v18 = vld [vmem:[%s4581_s26 + $0x34] sm:$0x1] }
  0x61   : > { %v1330_v30 = vshll.u32 %v3827_v18, 16 }
  0x63   : > { %3707 = vmatmul.msk.bf16.gmra.mxu3 %vm401_vm1, %v3703_v28  ;;  %3733 = vmatmul.msk.bf16.vlgmr.msra.gmra.mxu0 %vm401_vm1, %v3720_v29  ;;  %v3728_v28 = vor.u32 %v4370_v25, %v3727_v24  ;;  %v3816_v29 = vld [vmem:[%s4581_s26 + $0x8] sm:$0xf]  ;;  %v3823_v24 = vld [vmem:[%s4581_s26 + $0x24] sm:$0x1]  ;;  %v3811_v25 = vor.u32 %v4379_v10, %v3810_v9  ;;  %v1332_v43 = vrot.slane %v1330_v30, 5 }
  0x64   : > { %v1251_v31 = vshrl.u32 %v3816_v29, 16  ;;  %v1254_v32 = vshll.u32 %v3816_v29, 16  ;;  %v1327_v29 = vor.u32 %v1326_v17, %v1323_v16  ;;  %v3831_v9 = vld [vmem:[%s4581_s26 + $0x44] sm:$0x1] }
  0x65   : > { %v1358_v17 = vshll.u32 %v3831_v9, 16 }
  0x66   : > { %v1253_v35 = vrot.slane %v1251_v31, 4  ;;  %v1256_v36 = vrot.slane %v1254_v32, 5  ;;  %v1285_v32 = vor.u32 %v1284_v20, %v1281_v19  ;;  %v1328_v42 = vrot.slane %v1327_v29, 4 }
  0x68   : > { %v1257_v46 = vor.u32 %v1256_v36, %v1253_v35  ;;  %v1302_v35 = vshll.u32 %v3823_v24, 16  ;;  %v1286_v44 = vrot.slane %v1285_v32, 4 }
  0x6a   : > { %v1258_v53 = vrot.slane %v1257_v46, 4  ;;  %v1304_v47 = vrot.slane %v1302_v35, 5 }
  0x6b   : > { %3756 = vmatmul.msk.bf16.gmra.mxu1 %vm401_vm1, %v1014_v52 }
  0x6c   : > { %v1263_v61 = vsel %vm4596_vm4, %v1258_v53, %v1262_v54  ;;  %v1333_v53 = vsel %vm4596_vm4, %v1328_v42, %v1332_v43  ;;  %v1335_v54 = vshrl.u32 %v3828_v48, 16 }
  0x6d   : > { %v1364_v11 = vunpack.c.l.b16 %v1263_v61 }
  0x6e   : > { %v1337_v4 = vrot.slane %v1335_v54, 4 }
  0x70   : > { %3785 = vmatmul.msk.bf16.gmra.mxu2 %vm401_vm1, %v3778_v56  ;;  %v1276_v56 = vrot.slane %v1274_v49, 5  ;;  %v3830_v49 = vld [vmem:[%s4581_s26 + $0x40] sm:$0xf] }
  0x71   : > { %v1349_v59 = vshrl.u32 %v3830_v49, 16  ;;  %v1352_v60 = vshll.u32 %v3830_v49, 16 }
  0x72   : > { %v1277_v62 = vsel %vm4596_vm4, %v1272_v55, %v1276_v56  ;;  %v1338_v55 = vshll.u32 %v3828_v48, 16 }
  0x73   : > { %3812 = vmatmul.msk.bf16.vlgmr.msra.gmra.mxu3 %vm401_vm1, %v3799_v63  ;;  %3734 = vmatmul.msk.bf16.gmra.mxu0 %vm401_vm1, %v3724_v0  ;;  %v1307_v63 = vshrl.u32 %v3824_v57, 16  ;;  %v1310_v0 = vshll.u32 %v3824_v57, 16  ;;  %v1365_v12 = vunpack.c.l.b16 %v1277_v62  ;;  %v1291_v57 = vsel %vm4596_vm4, %v1286_v44, %v1290_v45 }
  0x74   : > { %v1369_v62 = vunpack.c.l.b16 %v1333_v53  ;;  %v1366_v1 = vunpack.c.l.b16 %v1291_v57  ;;  %v1340_v5 = vrot.slane %v1338_v55, 5  ;;  %v1354_v7 = vrot.slane %v1352_v60, 5 }
  0x75   : > { %v1309_v14 = vrot.slane %v1307_v63, 4  ;;  %v1312_v15 = vrot.slane %v1310_v0, 5 }
  0x7b   : > { %3757 = vmatmul.msk.bf16.gmra.mxu1 %vm401_vm1, %v1015_v21  ;;  %v1295_v21 = vrot.slane %v1293_v6, 4  ;;  %v1351_v6 = vrot.slane %v1349_v59, 4 }
  0x7d   : > { %v1299_v34 = vor.u32 %v1298_v22, %v1295_v21  ;;  %v1355_v16 = vor.u32 %v1354_v7, %v1351_v6 }
  0x7f   : > { %v1300_v46 = vrot.slane %v1299_v34, 4  ;;  %v1356_v24 = vrot.slane %v1355_v16, 4 }
  0x80   : > { %3786 = vmatmul.msk.bf16.gmra.mxu2 %vm401_vm1, %v3782_v26  ;;  %v1372_v26 = vpack.c.b16 %v1365_v12, %v1364_v11 }
  0x81   : > { %v1305_v58 = vsel %vm4596_vm4, %v1300_v46, %v1304_v47 }
  0x82   : > { %v1367_v2 = vunpack.c.l.b16 %v1305_v58 }
  0x83   : > { %3813 = vmatmul.msk.bf16.gmra.mxu3 %vm401_vm1, %v3803_v27  ;;  %3735 = vmatmul.msk.bf16.gmra.mxu0 %vm401_vm1, %v3728_v28  ;;  %v1313_v27 = vor.u32 %v1312_v15, %v1309_v14  ;;  %v1316_v28 = vshll.u32 %v3825_v13, 16  ;;  %v1341_v13 = vor.u32 %v1340_v5, %v1337_v4 }
  0x84   : > { %v1373_v12 = vpack.c.b16 %v1367_v2, %v1366_v1 }
  0x85   : > { %v1314_v40 = vrot.slane %v1313_v27, 4  ;;  %v1318_v41 = vrot.slane %v1316_v28, 5  ;;  %v1342_v20 = vrot.slane %v1341_v13, 4 }
  0x90   : > { %v4752_v52 = vpop.f32.mrf.mxu0 }
  0x93   : > { %3814 = vmatmul.msk.bf16.gmra.mxu3 %vm401_vm1, %v3807_v50  ;;  %3736 = vmatmul.msk.bf16.gmra.mxu0 %vm401_vm1, %v3732_v51  ;;  %v1319_v51 = vsel %vm4596_vm4, %v1314_v40, %v1318_v41 }
  0x94   : > { %v1368_v61 = vunpack.c.l.b16 %v1319_v51 }
  0x96   : > { %v1374_v11 = vpack.c.b16 %v1369_v62, %v1368_v61 }
  0x98   : > { %v4764_v3 = vpop.f32.mrf.mxu0  ;;  %v496_v8 = vpop.f32.mrf.mxu1 }
  0xa0   : > { %v432_v31 = vpop.f32.mrf.mxu0  ;;  %v4772_v38 = vpop.f32.mrf.mxu1 }
  0xa1   : > { %v497_v36 = vadd.f32 %v496_v8, %v432_v31  ;;  %v3829_v8 = vld [vmem:[%s4581_s26 + $0x3c] sm:$0x1] }
  0xa2   : > { %v1344_v15 = vshll.u32 %v3829_v8, 16 }
  0xa3   : > { %3815 = vmatmul.msk.bf16.gmra.mxu3 %vm401_vm1, %v3811_v25  ;;  %v4775_v39 = vpop.f32.mrf.mxu2  ;;  %3833 = vmatmul.msk.bf16.vlgmr.msrb.gmra.mxu0 %vm401_vm1, %v1372_v26  ;;  %v1360_v25 = vrot.slane %v1358_v17, 5 }
  0xa4   : > { %v1346_v23 = vrot.slane %v1344_v15, 5 }
  0xa5   : > { %v1361_v29 = vsel %vm4596_vm4, %v1356_v24, %v1360_v25 }
  0xa6   : > { %v695_v50 = vpop.f32.mrf.mxu3  ;;  %v1347_v28 = vsel %vm4596_vm4, %v1342_v20, %v1346_v23  ;;  %v1371_v31 = vunpack.c.l.b16 %v1361_v29 }
  0xa7   : > { %v1370_v30 = vunpack.c.l.b16 %v1347_v28 }
  0xa8   : > { %v4784_v56 = vpop.f32.mrf.mxu0  ;;  %v501_v63 = vpop.f32.mrf.mxu1 }
  0xa9   : > { %v1375_v34 = vpack.c.b16 %v1371_v31, %v1370_v30 }
  0xab   : > { %v4790_v0 = vpop.f32.mrf.mxu2 }
  0xae   : > { %v4794_v10 = vpop.f32.mrf.mxu3 }
  0xb0   : > { %v437_v14 = vpop.f32.mrf.mxu0  ;;  %v4798_v22 = vpop.f32.mrf.mxu1 }
  0xb1   : > { %v502_v18 = vadd.f32 %v501_v63, %v437_v14 }
  0xb3   : > { %3835 = vmatmul.msk.bf16.vlgmr.msrb.gmra.mxu3 %vm401_vm1, %v1374_v11  ;;  %v685_v19 = vpop.f32.mrf.mxu2  ;;  %3834 = vmatmul.msk.bf16.gmra.mxu0 %vm401_vm1, %v1373_v12 }
  0xb4   : > { %v702_v21 = vadd.f32 %v685_v19, %v497_v36 }
  0xb6   : > { %v763_v26 = vpop.f32.mrf.mxu3 }
  0xb8   : > { %v4800_v27 = vpop.f32.mrf.mxu0  ;;  %v506_v33 = vpop.f32.mrf.mxu1 }
  0xbb   : > { %v687_v43 = vpop.f32.mrf.mxu2 }
  0xbe   : > { %v765_v32 = vpop.f32.mrf.mxu3 }
  0xc0   : > { %v442_v35 = vpop.f32.mrf.mxu0  ;;  %v4813_v60 = vpop.f32.mrf.mxu1 }
  0xc1   : > { %v507_v36 = vadd.f32 %v506_v33, %v442_v35 }
  0xc3   : > { %3836 = vmatmul.msk.bf16.gmra.mxu3 %vm401_vm1, %v1375_v34  ;;  %v706_v40 = vadd.f32 %v695_v50, %v507_v36  ;;  %v690_v48 = vpop.f32.mrf.mxu2  ;;  %v499_v36 = vadd.f32 %v4772_v38, %v4784_v56  ;;  %v504_v56 = vadd.f32 %v4798_v22, %v4800_v27 }
  0xc4   : > { %v704_v51 = vadd.f32 %v690_v48, %v502_v18 }
  0xc6   : > { %v768_v41 = vpop.f32.mrf.mxu3 }
  0xc7   : > { %v785_v42 = vadd.f32 %v768_v41, %v702_v21 }
  0xc8   : > { %v4807_v44 = vpop.f32.mrf.mxu0 }
  0xcb   : > { %v692_v1 = vpop.f32.mrf.mxu2 }
  0xce   : > { %v770_v45 = vpop.f32.mrf.mxu3 }
  0xd0   : > { %v491_v46 = vpop.f32.mrf.mxu0 }
  0xd1   : > { %v492_v47 = vadd.f32 %v491_v46, %v4752_v52  ;;  %v1040_v52 = vpop.f32.mrf.mxu1  ;;  %v703_v46 = vadd.f32 %v687_v43, %v499_v36 }
  0xd3   : > { %v700_v49 = vadd.f32 %v4775_v39, %v492_v47  ;;  %v1123_v5 = vpop.f32.mrf.mxu2 }
  0xd5   : > { %v783_v53 = vadd.f32 %v763_v26, %v700_v49 }
  0xd6   : > { %v773_v54 = vpop.f32.mrf.mxu3 }
  0xd7   : > { %v787_v55 = vadd.f32 %v773_v54, %v704_v51 }
  0xd8   : > { %v493_v57 = vpop.f32.mrf.mxu0 }
  0xd9   : > { %v1042_v14 = vpop.f32.mrf.mxu1  ;;  %v494_v20 = vadd.f32 %v493_v57, %v4764_v3 }
  0xdb   : > { %v1125_v16 = vpop.f32.mrf.mxu2  ;;  %v701_v25 = vadd.f32 %v4790_v0, %v494_v20  ;;  %v786_v0 = vadd.f32 %v770_v45, %v703_v46 }
  0xdd   : > { %v784_v28 = vadd.f32 %v765_v32, %v701_v25 }
  0xde   : > { %v4811_v58 = vpop.f32.mrf.mxu3 }
  0xe0   : > { %v846_v50 = vpop.f32.mrf.mxu0 }
  0xe1   : > { %v866_v59 = vadd.f32 %v846_v50, %v783_v53  ;;  %v1045_v19 = vpop.f32.mrf.mxu1 }
  0xe3   : > { %v1060_v4 = vadd.f32 %v1040_v52, %v866_v59  ;;  %v1128_v21 = vpop.f32.mrf.mxu2 }
  0xe5   : > { %v1143_v6 = vadd.f32 %v1123_v5, %v1060_v4  ;;  %v705_v4 = vadd.f32 %v692_v1, %v504_v56 }
  0xe6   : > { %v778_v61 = vpop.f32.mrf.mxu3 }
  0xe7   : > { %v4815_v62 = vadd.f32 %v778_v61, %v706_v40  ;;  %v788_v27 = vadd.f32 %v4811_v58, %v705_v4 }
  0xe8   : > { %v848_v63 = vpop.f32.mrf.mxu0 }
  0xe9   : > { %v1047_v26 = vpop.f32.mrf.mxu1  ;;  %v867_v30 = vadd.f32 %v848_v63, %v784_v28 }
  0xeb   : > { %v1130_v31 = vpop.f32.mrf.mxu2  ;;  %v1061_v34 = vadd.f32 %v1042_v14, %v867_v30 }
  0xed   : > { %v1144_v41 = vadd.f32 %v1125_v16, %v1061_v34 }
  0xee   : > { %v4817_v2 = vpop.f32.mrf.mxu3 }
  0xf0   : > { %v851_v39 = vpop.f32.mrf.mxu0 }
  0xf1   : > { %v868_v35 = vadd.f32 %v851_v39, %v785_v42  ;;  %v1050_v40 = vpop.f32.mrf.mxu1 }
  0xf3   : > { %v1062_v48 = vadd.f32 %v1045_v19, %v868_v35  ;;  %v1133_v51 = vpop.f32.mrf.mxu2 }
  0xf5   : > { %v1145_v54 = vadd.f32 %v1128_v21, %v1062_v48  ;;  %v509_v21 = vadd.f32 %v4813_v60, %v4807_v44 }
  0xf6   : > { %v1206_v7 = vpop.f32.mrf.mxu3 }
  0xf7   : > { %v1226_v8 = vadd.f32 %v1206_v7, %v1143_v6  ;;  %v707_v34 = vadd.f32 %v4794_v10, %v509_v21  ;;  %v4407_v21 = vld [vmem:[%s5600_s4 + $0xb8] sm:$0xff] }
  0xf8   : > { %v853_v9 = vpop.f32.mrf.mxu0  ;;  %2169 = vmatpush.bf16.msra.mxu3 %v4407_v21 }
  0xf9   : > { %v869_v53 = vadd.f32 %v853_v9, %v786_v0  ;;  %v1052_v61 = vpop.f32.mrf.mxu1 }
  0xfb   : > { %v1063_v43 = vadd.f32 %v1047_v26, %v869_v53  ;;  %v1135_v22 = vpop.f32.mrf.mxu2 }
  0xfe   : > { %v1208_v11 = vpop.f32.mrf.mxu3 }
  0xff   : > { %v1227_v49 = vadd.f32 %v1208_v11, %v1144_v41 }
 0x100   : > { %v856_v12 = vpop.f32.mrf.mxu0 }
 0x101   : > { %v870_v57 = vadd.f32 %v856_v12, %v787_v55  ;;  %v1055_v25 = vpop.f32.mrf.mxu1 }
 0x103   : > { %v1064_v45 = vadd.f32 %v1050_v40, %v870_v57 }
 0x105   : > { %v1147_v9 = vadd.f32 %v1133_v51, %v1064_v45 }
 0x106   : > { %v1211_v13 = vpop.f32.mrf.mxu3 }
 0x107   : > { %v1228_v59 = vadd.f32 %v1211_v13, %v1145_v54 }
 0x108   : > { %v858_v15 = vpop.f32.mrf.mxu0 }
 0x109   : > { %v871_v13 = vadd.f32 %v858_v15, %v788_v27  ;;  %v1057_v46 = vpop.f32.mrf.mxu1  ;;  %v4419_v27 = vld [vmem:[%s5600_s4 + $0xf8] sm:$0xff] }
 0x10a   : > { %2303 = vmatpush.bf16.msra.mxu0 %v4419_v27 }
 0x10b   : > { %v1065_v26 = vadd.f32 %v1052_v61, %v871_v13  ;;  %v4390_v13 = vld [vmem:[%s5600_s4 + $0x30] sm:$0xff] }
 0x10d   : > { %v1148_v44 = vadd.f32 %v1135_v22, %v1065_v26  ;;  %v4389_v26 = vld [vmem:[%s5600_s4 + $0x28] sm:$0xff] }
 0x10e   : > { %v1213_v17 = vpop.f32.mrf.mxu3 }
 0x110   : > { %v861_v18 = vpop.f32.mrf.mxu0 }
 0x111   : > { %v872_v28 = vadd.f32 %v861_v18, %v4815_v62  ;;  %v790_v62 = vadd.f32 %v4817_v2, %v707_v34  ;;  %v4405_v34 = vld [vmem:[%s5600_s4 + $0xa8] sm:$0xff] }
 0x113   : > { %v1066_v60 = vadd.f32 %v1055_v25, %v872_v28  ;;  %v4417_v28 = vld [vmem:[%s5600_s4 + $0xe8] sm:$0xff] }
 0x116   : > { %v1216_v23 = vpop.f32.mrf.mxu3 }
 0x117   : > { %v1230_v16 = vadd.f32 %v1216_v23, %v1147_v9 }
 0x118   : > { %v4820_v24 = vpop.f32.mrf.mxu0 }
 0x119   : > { %v873_v40 = vadd.f32 %v4820_v24, %v790_v62  ;;  %v4404_v62 = vld [vmem:[%s5600_s4 + $0xa0] sm:$0xff] }
 0x11e   : > { %v4823_v29 = vpop.f32.mrf.mxu3 }
 0x11f   : > { %v1231_v18 = vadd.f32 %v4823_v29, %v1148_v44  ;;  %v4398_v44 = vld [vmem:[%s5600_s4 + $0x70] sm:$0xff] }
 0x120   : > { %v1400_v33 = vpop.f32.mrf.mxu0 }
 0x121   : > { %v4829_v50 = vadd.f32 %v1400_v33, %v1226_v8  ;;  %v1146_v8 = vadd.f32 %v1130_v31, %v1063_v43  ;;  %v1138_v31 = vpop.f32.mrf.mxu2 }
 0x122   : > { %v1149_v36 = vadd.f32 %v1138_v31, %v1066_v60  ;;  %v4388_v31 = vld [vmem:[%s5600_s4 + $0x20] sm:$0xff]  ;;  %v4387_v60 = vld [vmem:[%s5600_s4 + $0x18] sm:$0xff] }
 0x123   : > { %v1443_v52 = vmul.f32 %v4829_v50, %v4829_v50  ;;  %v1229_v14 = vadd.f32 %v1213_v17, %v1146_v8 }
 0x126   : > { %v1221_v3 = vpop.f32.mrf.mxu3 }
 0x128   : > { %v1402_v47 = vpop.f32.mrf.mxu0 }
 0x129   : > { %v4827_v32 = vadd.f32 %v1402_v47, %v1227_v49  ;;  %v1232_v47 = vadd.f32 %v1221_v3, %v1149_v36  ;;  %v1067_v49 = vadd.f32 %v1057_v46, %v873_v40  ;;  %v1140_v53 = vpop.f32.mrf.mxu2  ;;  %v4397_v36 = vld [vmem:[%s5600_s4 + $0x68] sm:$0xff]  ;;  %v4386_v46 = vld [vmem:[%s5600_s4 + $0x10] sm:$0xff] }
 0x12b   : > { %v1444_v38 = vmul.f32 %v4827_v32, %v4827_v32  ;;  %v1430_v55 = vadd.f32 %v4827_v32, %v4829_v50  ;;  %v1150_v54 = vadd.f32 %v1140_v53, %v1067_v49  ;;  %v4403_v49 = vld [vmem:[%s5600_s4 + $0x98] sm:$0xff]  ;;  %v4385_v53 = vld [vmem:[%s5600_s4 + $0x8] sm:$0xff] }
 0x12d   : > { %v1451_v5 = vadd.f32 %v1444_v38, %v1443_v52 }
 0x12e   : > { %v1223_v42 = vpop.f32.mrf.mxu3 }
 0x130   : > { %v1405_v63 = vpop.f32.mrf.mxu0 }
 0x131   : > { %v4839_v39 = vadd.f32 %v1405_v63, %v1228_v59  ;;  %v1233_v59 = vadd.f32 %v1223_v42, %v1150_v54  ;;  %v4391_v42 = vld [vmem:[%s5600_s4 + $0x38] sm:$0xff] }
 0x132   : > { %2000 = vmatpush.bf16.msra.mxu2 %v4391_v42  ;;  %v4400_v42 = vld [vmem:[%s5600_s4 + $0x80] sm:$0xff] }
 0x133   : > { %v1431_v6 = vadd.f32 %v1430_v55, %v4839_v39  ;;  %v1445_v7 = vmul.f32 %v4839_v39, %v4839_v39 }
 0x135   : > { %v1452_v11 = vadd.f32 %v1451_v5, %v1445_v7 }
 0x136   : > { %v1410_v12 = vpop.f32.mrf.mxu3  ;;  %2001 = vmatpush.bf16.msra.mxu2 %v4390_v13  ;;  %v4435_v13 = vld [vmem:[%s5600_s4 + $0x178] sm:$0xff] }
 0x137   : > { %v4845_v20 = vadd.f32 %v1410_v12, %v1230_v16 }
 0x138   : > { %v1407_v19 = vpop.f32.mrf.mxu0 }
 0x139   : > { %v4847_v1 = vadd.f32 %v1407_v19, %v1229_v14  ;;  %v1447_v15 = vmul.f32 %v4845_v20, %v4845_v20  ;;  %v4418_v14 = vld [vmem:[%s5600_s4 + $0xf0] sm:$0xff] }
 0x13a   : > { %2304 = vmatpush.bf16.msra.mxu0 %v4418_v14  ;;  %2002 = vmatpush.bf16.msra.mxu2 %v4389_v26 }
 0x13b   : > { %v1432_v58 = vadd.f32 %v1431_v6, %v4847_v1  ;;  %v1446_v30 = vmul.f32 %v4847_v1, %v4847_v1 }
 0x13d   : > { %v1453_v17 = vadd.f32 %v1452_v11, %v1446_v30  ;;  %v1433_v23 = vadd.f32 %v1432_v58, %v4845_v20  ;;  %v4406_v30 = vld [vmem:[%s5600_s4 + $0xb0] sm:$0xff] }
 0x13e   : > { %v1412_v33 = vpop.f32.mrf.mxu3  ;;  %2305 = vmatpush.bf16.msra.mxu0 %v4417_v28  ;;  %2170 = vmatpush.bf16.msra.mxu3 %v4406_v30 }
 0x13f   : > { %v1454_v35 = vadd.f32 %v1453_v17, %v1447_v15  ;;  %v4862_v41 = vadd.f32 %v1412_v33, %v1231_v18  ;;  %v4399_v17 = vld [vmem:[%s5600_s4 + $0x78] sm:$0xff]  ;;  %v4416_v33 = vld [vmem:[%s5600_s4 + $0xe0] sm:$0xff]  ;;  %2003 = vmatpush.bf16.msra.mxu2 %v4388_v31 }
 0x140   : > { %1899 = vmatpush.bf16.msra.mxu1 %v4399_v17 }
 0x141   : > { %v1434_v0 = vadd.f32 %v1433_v23, %v4862_v41  ;;  %v1448_v10 = vmul.f32 %v4862_v41, %v4862_v41  ;;  %v4495_v23 = vmov 0  }
 0x142   : > { %1514 = vst [vmem:[#allocation2 + $0xc] sm:$0x1] %v4495_v23  ;;  %2306 = vmatpush.bf16.msra.mxu0 %v4416_v33  ;;  %2171 = vmatpush.bf16.msra.mxu3 %v4405_v34 }
 0x143   : > { %v1455_v2 = vadd.f32 %v1454_v35, %v1448_v10  ;;  %1527 = vst [vmem:[#allocation2 + $0x40] sm:$0xf] %v4495_v23  ;;  %v4415_v35 = vld [vmem:[%s5600_s4 + $0xd8] sm:$0xff]  ;;  %2004 = vmatpush.bf16.msra.mxu2 %v4387_v60 }
 0x144   : > { %1528 = vst [vmem:[#allocation2 + $0x44] sm:$0x1] %v4495_v23  ;;  %1900 = vmatpush.bf16.msra.mxu1 %v4398_v44 }
 0x145   : > { %1511 = vst [vmem:[#allocation2] sm:$0xf] %v4495_v23 }
 0x146   : > { %v1415_v48 = vpop.f32.mrf.mxu3  ;;  %1512 = vst [vmem:[#allocation2 + $0x4] sm:$0x1] %v4495_v23  ;;  %2307 = vmatpush.bf16.msra.mxu0 %v4415_v35  ;;  %2172 = vmatpush.bf16.msra.mxu3 %v4404_v62 }
 0x147   : > { %v4867_v51 = vadd.f32 %v1415_v48, %v1232_v47  ;;  %1513 = vst [vmem:[#allocation2 + $0x8] sm:$0xf] %v4495_v23  ;;  %v4414_v48 = vld [vmem:[%s5600_s4 + $0xd0] sm:$0xff]  ;;  %2005 = vmatpush.bf16.msra.mxu2 %v4386_v46 }
 0x148   : > { %1515 = vst [vmem:[#allocation2 + $0x10] sm:$0xf] %v4495_v23  ;;  %1901 = vmatpush.bf16.msra.mxu1 %v4397_v36  ;;  %v4427_v36 = vld [vmem:[%s5600_s4 + $0x138] sm:$0xff] }
 0x149   : > { %v1435_v29 = vadd.f32 %v1434_v0, %v4867_v51  ;;  %v1449_v24 = vmul.f32 %v4867_v51, %v4867_v51  ;;  %1516 = vst [vmem:[#allocation2 + $0x14] sm:$0x1] %v4495_v23  ;;  %v4396_v0 = vld [vmem:[%s5600_s4 + $0x60] sm:$0xff] }
 0x14a   : > { %1517 = vst [vmem:[#allocation2 + $0x18] sm:$0xf] %v4495_v23  ;;  %2308 = vmatpush.bf16.msra.mxu0 %v4414_v48  ;;  %2173 = vmatpush.bf16.msra.mxu3 %v4403_v49  ;;  %v1629_v49 = vld [vmem:[#allocation2 + $0xc] sm:$0x1] }
 0x14b   : > { %v1456_v57 = vadd.f32 %v1455_v2, %v1449_v24  ;;  %1518 = vst [vmem:[#allocation2 + $0x1c] sm:$0x1] %v4495_v23  ;;  %v4413_v2 = vld [vmem:[%s5600_s4 + $0xc8] sm:$0xff]  ;;  %v4395_v24 = vld [vmem:[%s5600_s4 + $0x58] sm:$0xff]  ;;  %2006 = vmatpush.bf16.msra.mxu2 %v4385_v53 }
 0x14c   : > { %1519 = vst [vmem:[#allocation2 + $0x20] sm:$0xf] %v4495_v23  ;;  %1902 = vmatpush.bf16.msra.mxu1 %v4396_v0 }
 0x14d   : > { %1520 = vst [vmem:[#allocation2 + $0x24] sm:$0x1] %v4495_v23 }
 0x14e   : > { %v1417_v3 = vpop.f32.mrf.mxu3  ;;  %1521 = vst [vmem:[#allocation2 + $0x28] sm:$0xf] %v4495_v23  ;;  %2309 = vmatpush.bf16.msra.mxu0 %v4413_v2  ;;  %v1668_v2 = vld [vmem:[#allocation2 + $0x40] sm:$0xf] }
 0x14f   : > { %v4872_v38 = vadd.f32 %v1417_v3, %v1233_v59  ;;  %1522 = vst [vmem:[#allocation2 + $0x2c] sm:$0x1] %v4495_v23  ;;  %v1428_v59 = vld [vmem:[%s5598_s2] sm:$0x1] }
 0x150   : > { %1523 = vst [vmem:[#allocation2 + $0x30] sm:$0xf] %v4495_v23  ;;  %1903 = vmatpush.bf16.msra.mxu1 %v4395_v24 }
 0x151   : > { %v1436_v56 = vadd.f32 %v1435_v29, %v4872_v38  ;;  %v1450_v43 = vmul.f32 %v4872_v38, %v4872_v38  ;;  %v4402_v29 = vld [vmem:[%s5600_s4 + $0x90] sm:$0xff]  ;;  %1524 = vst [vmem:[#allocation2 + $0x34] sm:$0x1] %v4495_v23 }
 0x152   : > { %2174 = vmatpush.bf16.msra.mxu3 %v4402_v29  ;;  %1525 = vst [vmem:[#allocation2 + $0x38] sm:$0xf] %v4495_v23 }
 0x153   : > { %v1437_v61 = vrot.slane %v1436_v56, 4  ;;  %v1457_v63 = vadd.f32 %v1456_v57, %v1450_v43  ;;  %v4384_v57 = vld [vmem:[%s5600_s4] sm:$0xff]  ;;  %v4401_v43 = vld [vmem:[%s5600_s4 + $0x88] sm:$0xff]  ;;  %1526 = vst [vmem:[#allocation2 + $0x3c] sm:$0x1] %v4495_v23 }
 0x154   : > { %1529 = vst [vmem:[#allocation2 + $0x48] sm:$0xf] %v4495_v23  ;;  %2007 = vmatpush.bf16.msra.mxu2 %v4384_v57 }
 0x155   : > { %v1438_v45 = vadd.f32 %v1437_v61, %v1436_v56  ;;  %v1458_v52 = vrot.slane %v1457_v63, 4  ;;  %v4412_v56 = vld [vmem:[%s5600_s4 + $0xc0] sm:$0xff]  ;;  %v4394_v61 = vld [vmem:[%s5600_s4 + $0x50] sm:$0xff]  ;;  %1530 = vst [vmem:[#allocation2 + $0x4c] sm:$0x1] %v4495_v23 }
 0x156   : > { %2310 = vmatpush.bf16.msra.mxu0 %v4412_v56  ;;  %2175 = vmatpush.bf16.msra.mxu3 %v4401_v43 }
 0x157   : > { %v1439_v55 = vrot.slane %v1438_v45, 2  ;;  %v1459_v4 = vadd.f32 %v1458_v52, %v1457_v63  ;;  %v1429_v52 = vld [vmem:[%s5599_s3] sm:$0x1]  ;;  %1904 = vmatpush.bf16.msra.mxu1 %v4394_v61 }
 0x158   : > { %2723 = vmatpush.bf16.msrb.mxu2 %v4435_v13  ;;  %v1644_v13 = vld [vmem:[#allocation2 + $0x20] sm:$0xf] }
 0x159   : > { %v1440_v5 = vadd.f32 %v1439_v55, %v1438_v45  ;;  %v1460_v6 = vrot.slane %v1459_v4, 2 }
 0x15a   : > { %2176 = vmatpush.bf16.msra.mxu3 %v4400_v42 }
 0x15b   : > { %v1441_v7 = vrot.slane %v1440_v5, 1  ;;  %v1461_v22 = vadd.f32 %v1460_v6, %v1459_v4 }
 0x15d   : > { %v1442_v8 = vadd.f32 %v1441_v7, %v1440_v5  ;;  %v1462_v9 = vrot.slane %v1461_v22, 1  ;;  %v4393_v5 = vld [vmem:[%s5600_s4 + $0x48] sm:$0xff] }
 0x15e   : > { %1905 = vmatpush.bf16.msra.mxu1 %v4393_v5  ;;  %v1632_v5 = vld [vmem:[#allocation2 + $0x10] sm:$0xf] }
 0x15f   : > { %v1463_v11 = vadd.f32 %v1462_v9, %v1461_v22  ;;  %v4883_v12 = vmul.f32 0.015625, %v1442_v8  ;;  %v4392_v8 = vld [vmem:[%s5600_s4 + $0x40] sm:$0xff] }
 0x161   : > { %v1465_v16 = vmul.f32 0.015625, %v1463_v11  ;;  %v1466_v19 = vmul.f32 %v4883_v12, %v4883_v12 }
 0x162   : > { %1906 = vmatpush.bf16.msra.mxu1 %v4392_v8  ;;  %v1638_v8 = vld [vmem:[#allocation2 + $0x18] sm:$0xf] }
 0x163   : > { %v1467_v25 = vsub.f32 %v1465_v16, %v1466_v19 }
 0x165   : > { %v1468_v58 = vmax.f32 %v1467_v25, 0.0 }
 0x166   : > { %2549 = vmatpush.bf16.msrb.mxu1 %v4427_v36 }
 0x167   : > { %v4905_v15 = vadd.f32 1e-05, %v1468_v58 }
 0x169   : > { %4481 = vrsqrt.f32 %v4905_v15  ;;  %vm1476_vm6 = vweird.f32 %v4905_v15 }
 0x16f   : > { %v4482_v18 = vpop.eup %4481 }
 0x170   : > { %v1471_v40 = vmul.f32 %v4482_v18, %v4905_v15  ;;  %vm1477_vm5 = vweird.f32 %v4482_v18 }
 0x171   : > { %vm1478_vm7 = vmor %vm1476_vm6, %vm1477_vm5 }
 0x172   : > { %v1472_v47 = vmul.f32 %v4482_v18, %v1471_v40  ;;  %v4434_v40 = vld [vmem:[%s5600_s4 + $0x170] sm:$0xff] }
 0x173   : > { %2724 = vmatpush.bf16.msrb.mxu2 %v4434_v40 }
 0x174   : > { %v1473_v10 = vmul.f32 0.5, %v1472_v47 }
 0x176   : > { %v1474_v54 = vsub.f32 1.5, %v1473_v10 }
 0x178   : > { %v1475_v3 = vmul.f32 %v4482_v18, %v1474_v54 }
 0x17a   : > { %v1479_v63 = vsel %vm1478_vm7, %v4482_v18, %v1475_v3  ;;  %v1671_v3 = vld [vmem:[#allocation2 + $0x44] sm:$0x1] }
 0x17b   : > { %v1480_v45 = vmul.f32 %v1479_v63, %v1428_v59 }
 0x17d   : > { %v1481_v55 = vperm.slane %v1480_v45, 0  ;;  %v1490_v4 = vmul.f32 %v1480_v45, %v4883_v12 }
 0x17f   : > { %v1482_v6 = vmul.f32 %v1481_v55, %v4829_v50  ;;  %v1483_v7 = vmul.f32 %v1481_v55, %v4827_v32  ;;  %v1487_v22 = vmul.f32 %v1481_v55, %v4862_v41  ;;  %v1491_v27 = vsub.f32 %v1429_v52, %v1490_v4 }
 0x180   : > { %v1484_v9 = vmul.f32 %v1481_v55, %v4839_v39  ;;  %v1485_v11 = vmul.f32 %v1481_v55, %v4847_v1  ;;  %v1486_v32 = vmul.f32 %v1481_v55, %v4845_v20  ;;  %v5018_v41 = vmul.f32 %v1481_v55, %v4867_v51  ;;  %v1674_v51 = vld [vmem:[#allocation2] sm:$0xf] }
 0x181   : > { %v5014_v50 = vperm.slane %v1491_v27, 0  ;;  %v1489_v12 = vmul.f32 %v1481_v55, %v4872_v38  ;;  %v1707_v23 = vshrl.u32 %v1674_v51, 16  ;;  %v1710_v34 = vshll.u32 %v1674_v51, 16  ;;  %v1623_v55 = vld [vmem:[#allocation2 + $0x8] sm:$0xf] }
 0x182   : > { %v1698_v51 = vld [vmem:[#allocation2 + $0x4] sm:$0x1] }
 0x183   : > { %v1495_v14 = vadd.f32 %v5014_v50, %v1482_v6  ;;  %v1496_v16 = vadd.f32 %v5014_v50, %v1483_v7  ;;  %v1498_v39 = vadd.f32 %v5014_v50, %v1485_v11  ;;  %v5028_v1 = vadd.f32 %v5014_v50, %v1487_v22 }
 0x184   : > { %v1502_v20 = vadd.f32 %v5014_v50, %v1489_v12  ;;  %v1497_v38 = vadd.f32 %v5014_v50, %v1484_v9  ;;  %v1499_v19 = vadd.f32 %v5014_v50, %v1486_v32  ;;  %v1709_v42 = vrot.slane %v1707_v23, 4  ;;  %v4426_v9 = vld [vmem:[%s5600_s4 + $0x130] sm:$0xff] }
 0x185   : > { %v1503_v21 = vmax.f32 %v1495_v14, 0.0  ;;  %v1504_v25 = vmax.f32 %v1496_v16, 0.0  ;;  %v1506_v26 = vmax.f32 %v1498_v39, 0.0  ;;  %v1508_v46 = vmax.f32 %v5028_v1, 0.0  ;;  %v1635_v14 = vld [vmem:[#allocation2 + $0x14] sm:$0x1]  ;;  %2550 = vmatpush.bf16.msrb.mxu1 %v4426_v9 }
 0x186   : > { %v1510_v28 = vmax.f32 %v1502_v20, 0.0  ;;  %v1505_v58 = vmax.f32 %v1497_v38, 0.0  ;;  %v1507_v30 = vmax.f32 %v1499_v19, 0.0  ;;  %v1712_v32 = vrot.slane %v1710_v34, 5  ;;  %v1641_v38 = vld [vmem:[#allocation2 + $0x1c] sm:$0x1] }
 0x187   : > { %v1531_v15 = vpack.c.bf16 %v1503_v21, %v1503_v21  ;;  %v1532_v17 = vpack.c.bf16 %v1504_v25, %v1504_v25  ;;  %v1534_v31 = vpack.c.bf16 %v1506_v26, %v1506_v26  ;;  %v1536_v16 = vpack.c.bf16 %v1508_v46, %v1508_v46 }
 0x188   : > { %v1538_v33 = vpack.c.bf16 %v1510_v28, %v1510_v28  ;;  %v1533_v44 = vpack.c.bf16 %v1505_v58, %v1505_v58  ;;  %v5033_v60 = vpack.c.bf16 %v1507_v30, %v1507_v30  ;;  %v2029_v58 = vld [vmem:[#allocation2] sm:$0xe] }
 0x189   : > { %v1540_v35 = vshrl.u32 %v1531_v15, 16  ;;  %v1543_v62 = vshll.u32 %v1531_v15, 16  ;;  %v1548_v18 = vshrl.u32 %v1532_v17, 16  ;;  %v1551_v0 = vshll.u32 %v1532_v17, 16  ;;  %v4433_v15 = vld [vmem:[%s5600_s4 + $0x168] sm:$0xff] }
 0x18a   : > { %v1596_v47 = vshrl.u32 %v1538_v33, 16  ;;  %v1599_v48 = vshll.u32 %v1538_v33, 16  ;;  %v1556_v10 = vshrl.u32 %v1533_v44, 16  ;;  %v1559_v24 = vshll.u32 %v1533_v44, 16  ;;  %v1650_v33 = vld [vmem:[#allocation2 + $0x28] sm:$0xf]  ;;  %2725 = vmatpush.bf16.msrb.mxu2 %v4433_v15 }
 0x18b   : > { %v1542_v53 = vrot.slane %v1540_v35, 7  ;;  %v1550_v29 = vrot.slane %v1548_v18, 7  ;;  %v1564_v54 = vshrl.u32 %v1534_v31, 16  ;;  %v1567_v43 = vshll.u32 %v1534_v31, 16  ;;  %v4455_v15 = vld [vmem:[%s5600_s4 + $0x1f8] sm:$0xff] }
 0x18c   : > { %v1598_v57 = vrot.slane %v1596_v47, 7  ;;  %v1558_v56 = vrot.slane %v1556_v10, 7  ;;  %v1572_v61 = vshrl.u32 %v5033_v60, 16  ;;  %v1575_v19 = vshll.u32 %v5033_v60, 16  ;;  %3104 = vmatpush.bf16.msrb.mxu0 %v4455_v15  ;;  %v4422_v15 = vld [vmem:[%s5600_s4 + $0x110] sm:$0xff] }
 0x18d   : > { %v1546_v63 = vrot.slane %v1542_v53, 4  ;;  %v1545_v52 = vor.u32 %v1543_v62, %v1542_v53  ;;  %v1553_v4 = vor.u32 %v1551_v0, %v1550_v29  ;;  %v5055_v6 = vrot.slane %v1564_v54, 7 }
 0x18e   : > { %v1601_v7 = vor.u32 %v1599_v48, %v1598_v57  ;;  %v1602_v22 = vrot.slane %v1598_v57, 4  ;;  %v1561_v27 = vor.u32 %v1559_v24, %v1558_v56  ;;  %v1562_v25 = vrot.slane %v1558_v56, 4  ;;  %v3887_v48 = vld [vmem:[#allocation2] sm:$0xf] }
 0x18f   : > { %v1630_v11 = vsel %vm5044_vm11, %v1546_v63, %v1629_v49  ;;  %v1569_v12 = vor.u32 %v1567_v43, %v5055_v6  ;;  %v1624_v20 = vsel %vm5051_vm12, %v1545_v52, %v1623_v55  ;;  %v1633_v21 = vsel %vm5051_vm12, %v1553_v4, %v1632_v5 }
 0x190   : > { %v1669_v39 = vsel %vm5051_vm12, %v1601_v7, %v1668_v2  ;;  %v1672_v1 = vsel %vm5044_vm11, %v1602_v22, %v1671_v3  ;;  %1631 = vst [vmem:[#allocation2 + $0xc] sm:$0x1] %v1630_v11  ;;  %v1554_v26 = vrot.slane %v1550_v29, 4  ;;  %v5072_v28 = vrot.slane %v1572_v61, 7  ;;  %v4425_v2 = vld [vmem:[%s5600_s4 + $0x128] sm:$0xff]  ;;  %v4432_v29 = vld [vmem:[%s5600_s4 + $0x160] sm:$0xff] }
 0x191   : > { %1670 = vst [vmem:[#allocation2 + $0x40] sm:$0xf] %v1669_v39  ;;  %v1639_v30 = vsel %vm5051_vm12, %v1561_v27, %v1638_v8  ;;  %v1501_v17 = vadd.f32 %v5014_v50, %v5018_v41  ;;  %v1645_v23 = vsel %vm5051_vm12, %v1569_v12, %v1644_v13  ;;  %v1580_v34 = vshrl.u32 %v1536_v16, 16  ;;  %2551 = vmatpush.bf16.msrb.mxu1 %v4425_v2  ;;  %v4454_v2 = vld [vmem:[%s5600_s4 + $0x1f0] sm:$0xff] }
 0x192   : > { %1673 = vst [vmem:[#allocation2 + $0x44] sm:$0x1] %v1672_v1  ;;  %v1577_v31 = vor.u32 %v1575_v19, %v5072_v28  ;;  %v1713_v44 = vor.u32 %v1712_v32, %v1709_v42  ;;  %v1716_v60 = vshll.u32 %v1698_v51, 16  ;;  %v1636_v35 = vsel %vm5044_vm11, %v1554_v26, %v1635_v14  ;;  %2726 = vmatpush.bf16.msrb.mxu2 %v4432_v29  ;;  %v1656_v42 = vld [vmem:[#allocation2 + $0x30] sm:$0xf]  ;;  %v4447_v29 = vld [vmem:[%s5600_s4 + $0x1b8] sm:$0xff] }
 0x193   : > { %1625 = vst [vmem:[#allocation2 + $0x8] sm:$0xf] %v1624_v20  ;;  %v3933_v62 = vrot.slane %v2029_v58, 9  ;;  %v2058_v18 = vrot.slane %v1698_v51, 5  ;;  %v1642_v50 = vsel %vm5044_vm11, %v1562_v25, %v1641_v38  ;;  %v5095_v46 = vrot.slane %v1580_v34, 7  ;;  %3105 = vmatpush.bf16.msrb.mxu0 %v4454_v2  ;;  %2858 = vmatpush.bf16.msrb.mxu3 %v4447_v29 }
 0x194   : > { %1634 = vst [vmem:[#allocation2 + $0x10] sm:$0xf] %v1633_v21  ;;  %v1651_v36 = vsel %vm5051_vm12, %v1577_v31, %v1650_v33  ;;  %v1509_v47 = vmax.f32 %v1501_v17, 0.0  ;;  %v1714_v49 = vrot.slane %v1713_v44, 4  ;;  %v1718_v0 = vrot.slane %v1716_v60, 5 }
 0x195   : > { %1640 = vst [vmem:[#allocation2 + $0x18] sm:$0xf] %v1639_v30  ;;  %v2059_v10 = vsel %vm5089_vm15, %v3933_v62, %v2058_v18  ;;  %v1583_v24 = vshll.u32 %v1536_v16, 16  ;;  %v1570_v9 = vrot.slane %v5055_v6, 4  ;;  %v1578_v13 = vrot.slane %v5072_v28, 4 }
 0x196   : > { %1646 = vst [vmem:[#allocation2 + $0x20] sm:$0xf] %v1645_v23  ;;  %v5106_v55 = vpack.c.bf16 %v1509_v47, %v1509_v47  ;;  %v2105_v5 = vunpack.c.l.b16 %v2059_v10  ;;  %v1647_v14 = vld [vmem:[#allocation2 + $0x24] sm:$0x1]  ;;  %v1719_v16 = vsel %vm4596_vm4, %v1714_v49, %v1718_v0  ;;  %v1653_v20 = vld [vmem:[#allocation2 + $0x2c] sm:$0x1] }
 0x197   : > { %v1699_v40 = vld [vmem:[#allocation2 + $0xc] sm:$0x1]  ;;  %1637 = vst [vmem:[#allocation2 + $0x14] sm:$0x1] %v1636_v35  ;;  %v1585_v52 = vor.u32 %v1583_v24, %v5095_v46  ;;  %v1648_v17 = vsel %vm5044_vm11, %v1570_v9, %v1647_v14  ;;  %v1835_v31 = vunpack.c.l.b16 %v1719_v16  ;;  %v1654_v44 = vsel %vm5044_vm11, %v1578_v13, %v1653_v20  ;;  %v4431_v24 = vld [vmem:[%s5600_s4 + $0x158] sm:$0xff]  ;;  %v4430_v13 = vld [vmem:[%s5600_s4 + $0x150] sm:$0xff] }
 0x198   : > { %1643 = vst [vmem:[#allocation2 + $0x1c] sm:$0x1] %v1642_v50  ;;  %v2062_v53 = vrot.slane %v1699_v40, 5  ;;  %v1730_v8 = vshll.u32 %v1699_v40, 16  ;;  %v1588_v51 = vshrl.u32 %v5106_v55, 16  ;;  %v1586_v18 = vrot.slane %v5095_v46, 4  ;;  %2727 = vmatpush.bf16.msrb.mxu2 %v4431_v24 }
 0x199   : > { %1652 = vst [vmem:[#allocation2 + $0x28] sm:$0xf] %v1651_v36  ;;  %v1657_v1 = vsel %vm5051_vm12, %v1585_v52, %v1656_v42  ;;  %v4424_v50 = vld [vmem:[%s5600_s4 + $0x120] sm:$0xff]  ;;  %v1659_v36 = vld [vmem:[#allocation2 + $0x34] sm:$0x1]  ;;  %v4423_v9 = vld [vmem:[%s5600_s4 + $0x118] sm:$0xff] }
 0x19a   : > { %v4380_v54 = vld [vmem:[#allocation2 + $0x4] sm:$0xf0]  ;;  %v1732_v26 = vrot.slane %v1730_v8, 5  ;;  %1658 = vst [vmem:[#allocation2 + $0x30] sm:$0xf] %v1657_v1  ;;  %2552 = vmatpush.bf16.msrb.mxu1 %v4424_v50  ;;  %v4452_v20 = vld [vmem:[%s5600_s4 + $0x1e0] sm:$0xff] }
 0x19b   : > { %v4007_v57 = vld [vmem:[#allocation2 + $0x8] sm:$0xf]  ;;  %v3888_v56 = vor.u32 %v4380_v54, %v3887_v48  ;;  %v4408_v43 = vld [vmem:[#allocation2 + $0xc] sm:$0xf0]  ;;  %1649 = vst [vmem:[#allocation2 + $0x24] sm:$0x1] %v1648_v17 }
 0x19c   : > { %v2030_v3 = vld [vmem:[#allocation2 + $0x8] sm:$0xe]  ;;  %v4008_v4 = vor.u32 %v4408_v43, %v4007_v57  ;;  %v5114_v39 = vld [vmem:[#allocation2 + $0x10] sm:$0xe]  ;;  %v1677_v25 = vld [vmem:[#allocation2 + $0x18] sm:$0xf]  ;;  %2728 = vmatpush.bf16.msrb.mxu2 %v4430_v13 }
 0x19d   : > { %v3934_v61 = vrot.slane %v2030_v3, 9  ;;  %v1675_v63 = vld [vmem:[#allocation2 + $0x8] sm:$0xf]  ;;  %2008 = vmatmul.bf16.vlgmr.msra.gmra.mxu2 %v3888_v56  ;;  %v1676_v21 = vld [vmem:[#allocation2 + $0x10] sm:$0xf]  ;;  %v1749_v34 = vshrl.u32 %v1677_v25, 16 }
 0x19e   : > { %v1721_v7 = vshrl.u32 %v1675_v63, 16  ;;  %v1724_v22 = vshll.u32 %v1675_v63, 16  ;;  %2311 = vmatmul.bf16.vlgmr.msra.gmra.mxu0 %v4008_v4  ;;  %v5119_v19 = vld [vmem:[#allocation2 + $0x14] sm:$0x1]  ;;  %v2032_v28 = vld [vmem:[#allocation2 + $0x18] sm:$0xe]  ;;  %2553 = vmatpush.bf16.msrb.mxu1 %v4423_v9 }
 0x19f   : > { %v2063_v27 = vsel %vm5089_vm15, %v3934_v61, %v2062_v53  ;;  %v1735_v58 = vshrl.u32 %v1676_v21, 16  ;;  %v1738_v30 = vshll.u32 %v1676_v21, 16  ;;  %v5126_v33 = vld [vmem:[#allocation2 + $0x1c] sm:$0x1]  ;;  %v1752_v62 = vshll.u32 %v1677_v25, 16  ;;  %v4453_v56 = vld [vmem:[%s5600_s4 + $0x1e8] sm:$0xff] }
 0x1a0   : > { %v2106_v11 = vunpack.c.l.b16 %v2063_v27  ;;  %v1723_v32 = vrot.slane %v1721_v7, 4  ;;  %v1726_v12 = vrot.slane %v1724_v22, 5  ;;  %v3935_v47 = vrot.slane %v5114_v39, 9  ;;  %1655 = vst [vmem:[#allocation2 + $0x2c] sm:$0x1] %v1654_v44  ;;  %v4446_v7 = vld [vmem:[%s5600_s4 + $0x1b0] sm:$0xff]  ;;  %3106 = vmatpush.bf16.msrb.mxu0 %v4453_v56 }
 0x1a1   : > { %v1737_v60 = vrot.slane %v1735_v58, 4  ;;  %v1740_v35 = vrot.slane %v1738_v30, 5  ;;  %v2066_v48 = vrot.slane %v5119_v19, 5  ;;  %v1751_v49 = vrot.slane %v1749_v34, 4  ;;  %v1662_v61 = vld [vmem:[#allocation2 + $0x38] sm:$0xf]  ;;  %2859 = vmatpush.bf16.msrb.mxu3 %v4446_v7 }
 0x1a2   : > { %v2113_v38 = vpack.c.b16 %v2106_v11, %v2105_v5  ;;  %v1727_v6 = vor.u32 %v1726_v12, %v1723_v32  ;;  %v3936_v10 = vrot.slane %v2032_v28, 9  ;;  %v2070_v53 = vrot.slane %v5126_v33, 5  ;;  %v3891_v63 = vld [vmem:[#allocation2 + $0x10] sm:$0xf]  ;;  %v4381_v52 = vld [vmem:[#allocation2 + $0x14] sm:$0xf0]  ;;  %2554 = vmatpush.bf16.msrb.mxu1 %v4422_v15 }
 0x1a3   : > { %v1754_v46 = vrot.slane %v1752_v62, 5  ;;  %v1590_v54 = vrot.slane %v1588_v51, 7  ;;  %v1741_v3 = vor.u32 %v1740_v35, %v1737_v60  ;;  %v1591_v43 = vshll.u32 %v5106_v55, 16  ;;  %v4011_v42 = vld [vmem:[#allocation2 + $0x18] sm:$0xf]  ;;  %v4444_v60 = vld [vmem:[%s5600_s4 + $0x1a0] sm:$0xff] }
 0x1a4   : > { %2177 = vmatmul.bf16.vlgmr.msra.gmra.mxu3 %v2113_v38  ;;  %v1728_v23 = vrot.slane %v1727_v6, 4  ;;  %v1744_v4 = vshll.u32 %v5119_v19, 16  ;;  %v1660_v22 = vsel %vm5044_vm11, %v1586_v18, %v1659_v36  ;;  %v4409_v27 = vld [vmem:[#allocation2 + $0x1c] sm:$0xf0]  ;;  %v2067_v55 = vsel %vm5089_vm15, %v3935_v47, %v2066_v48  ;;  %v1665_v14 = vld [vmem:[#allocation2 + $0x3c] sm:$0x1]  ;;  %3107 = vmatpush.bf16.msrb.mxu0 %v4452_v20 }
 0x1a5   : > { %v1755_v5 = vor.u32 %v1754_v46, %v1751_v49  ;;  %v2071_v8 = vsel %vm5089_vm15, %v3936_v10, %v2070_v53  ;;  %v1593_v11 = vor.u32 %v1591_v43, %v1590_v54  ;;  %v1594_v32 = vrot.slane %v1590_v54, 4  ;;  %v1678_v1 = vld [vmem:[#allocation2 + $0x20] sm:$0xf]  ;;  %1661 = vst [vmem:[#allocation2 + $0x34] sm:$0x1] %v1660_v22  ;;  %v4451_v34 = vld [vmem:[%s5600_s4 + $0x1d8] sm:$0xff] }
 0x1a6   : > { %v1733_v40 = vsel %vm4596_vm4, %v1728_v23, %v1732_v26  ;;  %v1758_v12 = vshll.u32 %v5126_v33, 16  ;;  %v3892_v16 = vor.u32 %v4381_v52, %v3891_v63  ;;  %v1742_v39 = vrot.slane %v1741_v3, 4  ;;  %v1679_v25 = vld [vmem:[#allocation2 + $0x28] sm:$0xf]  ;;  %v2033_v35 = vld [vmem:[#allocation2 + $0x20] sm:$0xe] }
 0x1a7   : > { %v1836_v0 = vunpack.c.l.b16 %v1733_v40  ;;  %v1663_v51 = vsel %vm5051_vm12, %v1593_v11, %v1662_v61  ;;  %v4012_v38 = vor.u32 %v4409_v27, %v4011_v42  ;;  %v2107_v6 = vunpack.c.l.b16 %v2067_v55  ;;  %v4445_v26 = vld [vmem:[%s5600_s4 + $0x1a8] sm:$0xff]  ;;  %v1702_v50 = vld [vmem:[#allocation2 + $0x24] sm:$0x1]  ;;  %v4450_v10 = vld [vmem:[%s5600_s4 + $0x1d0] sm:$0xff] }
 0x1a8   : > { %v2108_v19 = vunpack.c.l.b16 %v2071_v8  ;;  %v1756_v21 = vrot.slane %v1755_v5, 4  ;;  %1664 = vst [vmem:[#allocation2 + $0x38] sm:$0xf] %v1663_v51  ;;  %v1746_v28 = vrot.slane %v1744_v4, 5  ;;  %v1666_v58 = vsel %vm5044_vm11, %v1594_v32, %v1665_v14  ;;  %2860 = vmatpush.bf16.msrb.mxu3 %v4445_v26  ;;  %v2034_v62 = vld [vmem:[#allocation2 + $0x28] sm:$0xe]  ;;  %3108 = vmatpush.bf16.msrb.mxu0 %v4451_v34 }
 0x1a9   : > { %v1843_v57 = vpack.c.b16 %v1836_v0, %v1835_v31  ;;  %v1760_v45 = vrot.slane %v1758_v12, 5  ;;  %v1763_v30 = vshrl.u32 %v1678_v1, 16  ;;  %v1766_v23 = vshll.u32 %v1678_v1, 16  ;;  %1667 = vst [vmem:[#allocation2 + $0x3c] sm:$0x1] %v1666_v58  ;;  %v4443_v53 = vld [vmem:[%s5600_s4 + $0x198] sm:$0xff] }
 0x1aa   : > { %v1747_v17 = vsel %vm4596_vm4, %v1742_v39, %v1746_v28  ;;  %v1777_v31 = vshrl.u32 %v1679_v25, 16  ;;  %v1780_v33 = vshll.u32 %v1679_v25, 16  ;;  %v2114_v59 = vpack.c.b16 %v2108_v19, %v2107_v6  ;;  %v1703_v36 = vld [vmem:[#allocation2 + $0x2c] sm:$0x1]  ;;  %v3895_v3 = vld [vmem:[#allocation2 + $0x20] sm:$0xf] }
 0x1ab   : > { %1907 = vmatmul.bf16.vlgmr.msra.gmra.mxu1 %v1843_v57  ;;  %v1761_v44 = vsel %vm4596_vm4, %v1756_v21, %v1760_v45  ;;  %v1837_v18 = vunpack.c.l.b16 %v1747_v17  ;;  %v1765_v40 = vrot.slane %v1763_v30, 4  ;;  %v1768_v48 = vrot.slane %v1766_v23, 5  ;;  %v4429_v46 = vld [vmem:[%s5600_s4 + $0x148] sm:$0xff]  ;;  %v4410_v4 = vld [vmem:[#allocation2 + $0x2c] sm:$0xf0]  ;;  %v4428_v9 = vld [vmem:[%s5600_s4 + $0x140] sm:$0xff] }
 0x1ac   : > { %v1838_v47 = vunpack.c.l.b16 %v1761_v44  ;;  %v1779_v49 = vrot.slane %v1777_v31, 4  ;;  %v1782_v0 = vrot.slane %v1780_v33, 5  ;;  %2861 = vmatpush.bf16.msrb.mxu3 %v4444_v60  ;;  %v3937_v2 = vrot.slane %v2033_v35, 9  ;;  %2729 = vmatpush.bf16.msrb.mxu2 %v4429_v46  ;;  %v4382_v56 = vld [vmem:[#allocation2 + $0x24] sm:$0xf0]  ;;  %v4442_v5 = vld [vmem:[%s5600_s4 + $0x190] sm:$0xff] }
 0x1ad   : > { %2013 = vmatmul.bf16.gmra.mxu2 %v3892_v16  ;;  %v2074_v29 = vrot.slane %v1702_v50, 5  ;;  %v3938_v24 = vrot.slane %v2034_v62, 9  ;;  %v2078_v54 = vrot.slane %v1703_v36, 5  ;;  %v1769_v43 = vor.u32 %v1768_v48, %v1765_v40  ;;  %3109 = vmatpush.bf16.msrb.mxu0 %v4450_v10  ;;  %v4449_v63 = vld [vmem:[%s5600_s4 + $0x1c8] sm:$0xff]  ;;  %v1680_v55 = vld [vmem:[#allocation2 + $0x30] sm:$0xf] }
 0x1ae   : > { %2316 = vmatmul.bf16.gmra.mxu0 %v4012_v38  ;;  %v1844_v57 = vpack.c.b16 %v1838_v47, %v1837_v18  ;;  %v1783_v61 = vor.u32 %v1782_v0, %v1779_v49  ;;  %v4015_v52 = vld [vmem:[#allocation2 + $0x28] sm:$0xf]  ;;  %v1772_v42 = vshll.u32 %v1702_v50, 16  ;;  %v1786_v27 = vshll.u32 %v1703_v36, 16  ;;  %v5217_v11 = vld [vmem:[#allocation2 + $0xc] sm:$0x1] }
 0x1af   : > { %v2075_v7 = vsel %vm5089_vm15, %v3937_v2, %v2074_v29  ;;  %v2079_v22 = vsel %vm5089_vm15, %v3938_v24, %v2078_v54  ;;  %v4421_v8 = vld [vmem:[%s5600_s4 + $0x108] sm:$0xff]  ;;  %v3896_v32 = vor.u32 %v4382_v56, %v3895_v3  ;;  %v4016_v12 = vor.u32 %v4410_v4, %v4015_v52  ;;  %v1681_v16 = vld [vmem:[#allocation2 + $0x38] sm:$0xf]  ;;  %v4448_v39 = vld [vmem:[%s5600_s4 + $0x1c0] sm:$0xff] }
 0x1b0   : > { %2862 = vmatpush.bf16.msrb.mxu3 %v4443_v53  ;;  %v1770_v13 = vrot.slane %v1769_v43, 4  ;;  %v1784_v14 = vrot.slane %v1783_v61, 4  ;;  %2555 = vmatpush.bf16.msrb.mxu1 %v4421_v8  ;;  %v2109_v1 = vunpack.c.l.b16 %v2075_v7  ;;  %v2110_v20 = vunpack.c.l.b16 %v2079_v22  ;;  %v2035_v51 = vld [vmem:[#allocation2 + $0x30] sm:$0xe]  ;;  %v4441_v19 = vld [vmem:[%s5600_s4 + $0x188] sm:$0xff]  ;;  %v4420_v45 = vld [vmem:[%s5600_s4 + $0x100] sm:$0xff] }
 0x1b1   : > { %3110 = vmatpush.bf16.msrb.mxu0 %v4449_v63  ;;  %v1791_v38 = vshrl.u32 %v1680_v55, 16  ;;  %v1794_v6 = vshll.u32 %v1680_v55, 16  ;;  %2730 = vmatpush.bf16.msrb.mxu2 %v4428_v9  ;;  %v1774_v21 = vrot.slane %v1772_v42, 5  ;;  %v1788_v25 = vrot.slane %v1786_v27, 5  ;;  %v2586_v26 = vld [vmem:[#allocation2 + $0x8] sm:$0xe] }
 0x1b2   : > { %v1805_v28 = vshrl.u32 %v1681_v16, 16  ;;  %v1808_v58 = vshll.u32 %v1681_v16, 16  ;;  %v3939_v17 = vrot.slane %v2035_v51, 9  ;;  %v2612_v23 = vrot.slane %v5217_v11, 5  ;;  %v1704_v33 = vld [vmem:[#allocation2 + $0x34] sm:$0x1] }
 0x1b3   : > { %v1775_v30 = vsel %vm4596_vm4, %v1770_v13, %v1774_v21  ;;  %v1789_v15 = vsel %vm4596_vm4, %v1784_v14, %v1788_v25  ;;  %v2115_v31 = vpack.c.b16 %v2110_v20, %v2109_v1  ;;  %v1793_v34 = vrot.slane %v1791_v38, 4  ;;  %v4440_v60 = vld [vmem:[%s5600_s4 + $0x180] sm:$0xff]  ;;  %v1705_v35 = vld [vmem:[#allocation2 + $0x3c] sm:$0x1]  ;;  %v2036_v62 = vld [vmem:[#allocation2 + $0x38] sm:$0xe] }
 0x1b4   : > { %2182 = vmatmul.bf16.gmra.mxu3 %v2114_v59  ;;  %v1796_v59 = vrot.slane %v1794_v6, 5  ;;  %v4101_v44 = vrot.slane %v2586_v26, 9  ;;  %2556 = vmatpush.bf16.msrb.mxu1 %v4420_v45  ;;  %v2895_v18 = vld [vmem:[#allocation2 + $0x10] sm:$0xf]  ;;  %v1807_v50 = vrot.slane %v1805_v28, 4  ;;  %v1810_v36 = vrot.slane %v1808_v58, 5 }
 0x1b5   : > { %2863 = vmatpush.bf16.msrb.mxu3 %v4442_v5  ;;  %3111 = vmatpush.bf16.msrb.mxu0 %v4448_v39  ;;  %v2897_v40 = vld [vmem:[#allocation2 + $0x18] sm:$0xf]  ;;  %v3398_v47 = vld [vmem:[%s5603_s7] sm:$0xf]  ;;  %v1839_v48 = vunpack.c.l.b16 %v1775_v30  ;;  %v1840_v49 = vunpack.c.l.b16 %v1789_v15  ;;  %v2082_v0 = vrot.slane %v1704_v33, 5  ;;  %v3940_v2 = vrot.slane %v2036_v62, 9 }
 0x1b6   : > { %v2587_v10 = vld [vmem:[#allocation2 + $0x10] sm:$0xe]  ;;  %v3432_v53 = vsel %vm414_vm0, %v3398_v47, 0  ;;  %v1797_v29 = vor.u32 %v1796_v59, %v1793_v34  ;;  %v5240_v24 = vld [vmem:[#allocation2 + $0x14] sm:$0x1]  ;;  %v2912_v54 = vshrl.u32 %v2895_v18, 16  ;;  %v1811_v52 = vor.u32 %v1810_v36, %v1807_v50 }
 0x1b7   : > { %v3899_v46 = vld [vmem:[#allocation2 + $0x30] sm:$0xf]  ;;  %3441 = vmatpush.bf16.msra.mxu2 %v3432_v53  ;;  %v2086_v3 = vrot.slane %v1705_v35, 5  ;;  %v2915_v56 = vshll.u32 %v2895_v18, 16  ;;  %v2926_v43 = vshrl.u32 %v2897_v40, 16  ;;  %v2929_v61 = vshll.u32 %v2897_v40, 16 }
 0x1b8   : > { %v4411_v63 = vld [vmem:[#allocation2 + $0x3c] sm:$0xf0]  ;;  %v5244_v4 = vsel %vm5089_vm15, %v4101_v44, %v2612_v23  ;;  %v4102_v5 = vrot.slane %v2587_v10, 9  ;;  %v1845_v7 = vpack.c.b16 %v1840_v49, %v1839_v48  ;;  %v4019_v22 = vld [vmem:[#allocation2 + $0x38] sm:$0xf]  ;;  %v2083_v42 = vsel %vm5089_vm15, %v3939_v17, %v2082_v0  ;;  %v4462_v62 = vld [vmem:[%s5600_s4 + $0x230] sm:$0xff] }
 0x1b9   : > { %2864 = vmatpush.bf16.msrb.mxu3 %v4441_v19  ;;  %v1800_v27 = vshll.u32 %v1704_v33, 16  ;;  %v2616_v55 = vrot.slane %v5240_v24, 5  ;;  %v5249_v8 = vld [vmem:[#allocation2 + $0x14] sm:$0x1]  ;;  %v2914_v13 = vrot.slane %v2912_v54, 4  ;;  %v2087_v16 = vsel %vm5089_vm15, %v3940_v2, %v2086_v3  ;;  %v4463_v38 = vld [vmem:[%s5600_s4 + $0x238] sm:$0xff] }
 0x1ba   : > { %v2340_v14 = vld [vmem:[#allocation2 + $0x8] sm:$0xf]  ;;  %v2917_v39 = vrot.slane %v2915_v56, 5  ;;  %v2928_v1 = vrot.slane %v2926_v43, 4  ;;  %v2931_v20 = vrot.slane %v2929_v61, 5  ;;  %v4020_v6 = vor.u32 %v4411_v63, %v4019_v22  ;;  %3278 = vmatpush.bf16.msra.mxu1 %v4463_v38 }
 0x1bb   : > { %1912 = vmatmul.bf16.gmra.mxu1 %v1844_v57  ;;  %v4383_v57 = vld [vmem:[#allocation2 + $0x34] sm:$0xf0]  ;;  %v2342_v51 = vld [vmem:[#allocation2 + $0x10] sm:$0xf]  ;;  %v2111_v19 = vunpack.c.l.b16 %v2083_v42  ;;  %v1812_v21 = vrot.slane %v1811_v52, 4  ;;  %v2921_v26 = vshll.u32 %v5249_v8, 16  ;;  %v2617_v58 = vsel %vm5089_vm15, %v4102_v5, %v2616_v55 }
 0x1bc   : > { %v3900_v9 = vor.u32 %v4383_v57, %v3899_v46  ;;  %v5256_v25 = vld [vmem:[#allocation2 + $0x1c] sm:$0x1]  ;;  %v1802_v28 = vrot.slane %v1800_v27, 5  ;;  %v2357_v45 = vshrl.u32 %v2340_v14, 16  ;;  %v2360_v30 = vshll.u32 %v2340_v14, 16 }
 0x1bd   : > { %2018 = vmatmul.bf16.gmra.mxu2 %v3896_v32  ;;  %2865 = vmatpush.bf16.msrb.mxu3 %v4440_v60  ;;  %v1798_v32 = vrot.slane %v1797_v29, 4  ;;  %v2112_v15 = vunpack.c.l.b16 %v2087_v16  ;;  %v2371_v23 = vshrl.u32 %v2342_v51, 16  ;;  %v2918_v34 = vor.u32 %v2917_v39, %v2914_v13  ;;  %v2899_v47 = vld [vmem:[#allocation2 + $0x20] sm:$0xf]  ;;  %v2901_v48 = vld [vmem:[#allocation2 + $0x28] sm:$0xf] }
 0x1be   : > { %2321 = vmatmul.bf16.gmra.mxu0 %v4016_v12  ;;  %v1814_v12 = vshll.u32 %v1705_v35, 16  ;;  %v2932_v59 = vor.u32 %v2931_v20, %v2928_v1  ;;  %v2935_v44 = vshll.u32 %v5256_v25, 16  ;;  %v2923_v35 = vrot.slane %v2921_v26, 5  ;;  %3279 = vmatpush.bf16.msra.mxu1 %v4462_v62  ;;  %v2344_v46 = vld [vmem:[#allocation2 + $0x18] sm:$0xf] }
 0x1bf   : > { %v1803_v33 = vsel %vm4596_vm4, %v1798_v32, %v1802_v28  ;;  %v2659_v18 = vunpack.c.l.b16 %v5244_v4  ;;  %v2660_v50 = vunpack.c.l.b16 %v2617_v58  ;;  %v2359_v36 = vrot.slane %v2357_v45, 4  ;;  %v2346_v2 = vld [vmem:[#allocation2 + $0x20] sm:$0xf]  ;;  %v5276_v14 = vld [vmem:[#allocation2 + $0x1c] sm:$0x1] }
 0x1c0   : > { %v1816_v17 = vrot.slane %v1814_v12, 5  ;;  %v2362_v40 = vrot.slane %v2360_v30, 5  ;;  %v2116_v49 = vpack.c.b16 %v2112_v15, %v2111_v19  ;;  %v1841_v0 = vunpack.c.l.b16 %v1803_v33  ;;  %v5278_v16 = vld [vmem:[#allocation2 + $0x24] sm:$0x1]  ;;  %v5280_v39 = vld [vmem:[#allocation2 + $0x10] sm:$0xf] }
 0x1c1   : > { %v2373_v10 = vrot.slane %v2371_v23, 4  ;;  %v2919_v54 = vrot.slane %v2918_v34, 4  ;;  %v2933_v57 = vrot.slane %v2932_v59, 4  ;;  %v2937_v3 = vrot.slane %v2935_v44, 5  ;;  %v5282_v1 = vld [vmem:[#allocation2 + $0x14] sm:$0xf0] }
 0x1c2   : > { %v1817_v60 = vsel %vm4596_vm4, %v1812_v21, %v1816_v17  ;;  %v2940_v56 = vshrl.u32 %v2899_v47, 16  ;;  %v2943_v43 = vshll.u32 %v2899_v47, 16  ;;  %v2954_v61 = vshrl.u32 %v2901_v48, 16  ;;  %v2588_v20 = vld [vmem:[#allocation2 + $0x18] sm:$0xe]  ;;  %v4461_v44 = vld [vmem:[%s5600_s4 + $0x228] sm:$0xff] }
 0x1c3   : > { %v1842_v29 = vunpack.c.l.b16 %v1817_v60  ;;  %v2957_v63 = vshll.u32 %v2901_v48, 16  ;;  %v2385_v52 = vshrl.u32 %v2344_v46, 16  ;;  %v2388_v4 = vshll.u32 %v2344_v46, 16  ;;  %v2589_v19 = vld [vmem:[#allocation2 + $0x20] sm:$0xe]  ;;  %3280 = vmatpush.bf16.msra.mxu1 %v4461_v44 }
 0x1c4   : > { %2187 = vmatmul.bf16.gmra.mxu3 %v2115_v31  ;;  %v2374_v31 = vshll.u32 %v2342_v51, 16  ;;  %v2399_v5 = vshrl.u32 %v2346_v2, 16  ;;  %v2667_v22 = vpack.c.b16 %v2660_v50, %v2659_v18  ;;  %v2363_v42 = vor.u32 %v2362_v40, %v2359_v36  ;;  %v5284_v17 = vld [vmem:[#allocation2 + $0x24] sm:$0x1]  ;;  %v5286_v23 = vld [vmem:[#allocation2 + $0x2c] sm:$0x1] }
 0x1c5   : > { %v2366_v27 = vshll.u32 %v5217_v11, 16  ;;  %v2924_v32 = vsel %vm4596_vm4, %v2919_v54, %v2923_v35  ;;  %v2938_v12 = vsel %vm4596_vm4, %v2933_v57, %v2937_v3  ;;  %v2380_v13 = vshll.u32 %v5240_v24, 16  ;;  %v2903_v50 = vld [vmem:[#allocation2 + $0x30] sm:$0xf]  ;;  %v2905_v54 = vld [vmem:[#allocation2 + $0x38] sm:$0xf] }
 0x1c6   : > { %v2376_v53 = vrot.slane %v2374_v31, 5  ;;  %v2942_v11 = vrot.slane %v2940_v56, 4  ;;  %v2945_v51 = vrot.slane %v2943_v43, 5  ;;  %v2956_v38 = vrot.slane %v2954_v61, 4 }
 0x1c7   : > { %v2387_v21 = vrot.slane %v2385_v52, 4  ;;  %v2390_v26 = vrot.slane %v2388_v4, 5  ;;  %v2401_v28 = vrot.slane %v2399_v5, 4  ;;  %v3040_v45 = vunpack.c.l.b16 %v2924_v32  ;;  %v5309_v52 = vld [vmem:[#allocation2 + $0x34] sm:$0x1]  ;;  %v4460_v4 = vld [vmem:[%s5600_s4 + $0x220] sm:$0xff] }
 0x1c8   : > { %v2377_v55 = vor.u32 %v2376_v53, %v2373_v10  ;;  %v3041_v24 = vunpack.c.l.b16 %v2938_v12  ;;  %v2364_v30 = vrot.slane %v2363_v42, 4  ;;  %v2368_v31 = vrot.slane %v2366_v27, 5  ;;  %v2590_v27 = vld [vmem:[#allocation2 + $0x28] sm:$0xe]  ;;  %v2591_v32 = vld [vmem:[#allocation2 + $0x30] sm:$0xe]  ;;  %3281 = vmatpush.bf16.msra.mxu1 %v4460_v4 }
 0x1c9   : > { %v2382_v33 = vrot.slane %v2380_v13, 5  ;;  %v4103_v34 = vrot.slane %v2588_v20, 9  ;;  %v2620_v59 = vrot.slane %v5276_v14, 5  ;;  %v4104_v60 = vrot.slane %v2589_v19, 9  ;;  %v3143_v4 = vld [vmem:[#allocation2 + $0x20] sm:$0xe] }
 0x1ca   : > { %v2378_v15 = vrot.slane %v2377_v55, 4  ;;  %v2624_v35 = vrot.slane %v5278_v16, 5  ;;  %v2946_v62 = vor.u32 %v2945_v51, %v2942_v11  ;;  %v4176_v36 = vor.u32 %v5282_v1, %v5280_v39 }
 0x1cb   : > { %1917 = vmatmul.bf16.gmra.mxu1 %v1845_v7  ;;  %v2402_v7 = vshll.u32 %v2346_v2, 16  ;;  %v2949_v40 = vshll.u32 %v5284_v17, 16  ;;  %v2391_v47 = vor.u32 %v2390_v26, %v2387_v21  ;;  %v2963_v53 = vshll.u32 %v5286_v23, 16 }
 0x1cc   : > { %v2383_v10 = vsel %vm4596_vm4, %v2378_v15, %v2382_v33  ;;  %v2394_v46 = vshll.u32 %v5276_v14, 16  ;;  %v2408_v2 = vshll.u32 %v5278_v16, 16  ;;  %v2968_v57 = vshrl.u32 %v2903_v50, 16  ;;  %v5326_v33 = vld [vmem:[#allocation2 + $0x20] sm:$0xf] }
 0x1cd   : > { %2023 = vmatmul.bf16.gmra.mxu2 %v3900_v9  ;;  %v1846_v9 = vpack.c.b16 %v1842_v29, %v1841_v0  ;;  %v2404_v58 = vrot.slane %v2402_v7, 5  ;;  %v2369_v0 = vsel %vm4596_vm4, %v2364_v30, %v2368_v31  ;;  %v5303_v29 = vld [vmem:[#allocation2 + $0x2c] sm:$0x1]  ;;  %v2971_v3 = vshll.u32 %v2903_v50, 16 }
 0x1ce   : > { %2326 = vmatmul.bf16.gmra.mxu0 %v4020_v6  ;;  %v2959_v6 = vrot.slane %v2957_v63, 5  ;;  %v2621_v56 = vsel %vm5089_vm15, %v4103_v34, %v2620_v59  ;;  %v2625_v43 = vsel %vm5089_vm15, %v4104_v60, %v2624_v35  ;;  %v2947_v61 = vrot.slane %v2946_v62, 4  ;;  %v5328_v34 = vld [vmem:[#allocation2 + $0x24] sm:$0xf0]  ;;  %v5334_v35 = vld [vmem:[#allocation2 + $0x3c] sm:$0x1] }
 0x1cf   : > { %v2405_v48 = vor.u32 %v2404_v58, %v2401_v28  ;;  %v2485_v5 = vunpack.c.l.b16 %v2369_v0  ;;  %v2951_v7 = vrot.slane %v2949_v40, 5  ;;  %v2486_v55 = vunpack.c.l.b16 %v2383_v10  ;;  %v5324_v28 = vld [vmem:[#allocation2 + $0x34] sm:$0x1]  ;;  %v2350_v0 = vld [vmem:[#allocation2 + $0x30] sm:$0xf] }
 0x1d0   : > { %v2960_v18 = vor.u32 %v2959_v6, %v2956_v38  ;;  %v2982_v12 = vshrl.u32 %v2905_v54, 16  ;;  %v2985_v13 = vshll.u32 %v2905_v54, 16  ;;  %v2396_v14 = vrot.slane %v2394_v46, 5  ;;  %v3141_v10 = vld [vmem:[#allocation2 + $0x10] sm:$0xe] }
 0x1d1   : > { %v2406_v42 = vrot.slane %v2405_v48, 4  ;;  %v2410_v16 = vrot.slane %v2408_v2, 5  ;;  %v2970_v39 = vrot.slane %v2968_v57, 4  ;;  %v2973_v1 = vrot.slane %v2971_v3, 5  ;;  %v4459_v57 = vld [vmem:[%s5600_s4 + $0x218] sm:$0xff] }
 0x1d2   : > { %v2961_v63 = vrot.slane %v2960_v18, 4  ;;  %v2952_v20 = vsel %vm4596_vm4, %v2947_v61, %v2951_v7  ;;  %v4105_v51 = vrot.slane %v2590_v27, 9  ;;  %v2628_v38 = vrot.slane %v5303_v29, 5  ;;  %v2348_v18 = vld [vmem:[#allocation2 + $0x28] sm:$0xf]  ;;  %3282 = vmatpush.bf16.msra.mxu1 %v4459_v57 }
 0x1d3   : > { %v2411_v19 = vsel %vm4596_vm4, %v2406_v42, %v2410_v16  ;;  %v4106_v21 = vrot.slane %v2591_v32, 9  ;;  %v2632_v26 = vrot.slane %v5309_v52, 5  ;;  %v2661_v58 = vunpack.c.l.b16 %v2621_v56  ;;  %v3142_v3 = vld [vmem:[#allocation2 + $0x18] sm:$0xe]  ;;  %v3144_v27 = vld [vmem:[#allocation2 + $0x28] sm:$0xe] }
 0x1d4   : > { %2192 = vmatmul.bf16.gmra.mxu3 %v2116_v49  ;;  %v3048_v49 = vpack.c.b16 %v3041_v24, %v3040_v45  ;;  %v2662_v45 = vunpack.c.l.b16 %v2625_v43  ;;  %v2984_v24 = vrot.slane %v2982_v12, 4  ;;  %v2987_v30 = vrot.slane %v2985_v13, 5 }
 0x1d5   : > { %v3042_v15 = vunpack.c.l.b16 %v2952_v20  ;;  %v2974_v59 = vor.u32 %v2973_v1, %v2970_v39  ;;  %v5332_v60 = vunpack.c.l.b16 %v2411_v19  ;;  %v2977_v62 = vshll.u32 %v5324_v28, 16  ;;  %v2907_v39 = vld [vmem:[#allocation2 + $0x40] sm:$0xf]  ;;  %v4458_v20 = vld [vmem:[%s5600_s4 + $0x210] sm:$0xff] }
 0x1d6   : > { %v2493_v50 = vpack.c.b16 %v2486_v55, %v2485_v5  ;;  %v5343_v40 = vsel %vm5089_vm15, %v4106_v21, %v2632_v26  ;;  %v4180_v48 = vor.u32 %v5328_v34, %v5326_v33  ;;  %v2991_v2 = vshll.u32 %v5334_v35, 16  ;;  %v5375_v26 = vld [vmem:[#allocation2 + $0x44] sm:$0x1]  ;;  %3283 = vmatpush.bf16.msra.mxu1 %v4458_v20  ;;  %v3147_v33 = vld [vmem:[#allocation2 + $0x40] sm:$0xe] }
 0x1d7   : > { %v5347_v46 = vrot.slane %v2974_v59, 4  ;;  %v2413_v54 = vshrl.u32 %v2348_v18, 16  ;;  %v2664_v61 = vunpack.c.l.b16 %v5343_v40  ;;  %v2416_v5 = vshll.u32 %v2348_v18, 16 }
 0x1d8   : > { %v2427_v7 = vshrl.u32 %v2350_v0, 16  ;;  %v4269_v42 = vrot.slane %v3141_v10, 9  ;;  %v4270_v32 = vrot.slane %v3142_v3, 9  ;;  %v3171_v12 = vrot.slane %v5256_v25, 5 }
 0x1d9   : > { %v5365_v16 = vrot.slane %v2413_v54, 4  ;;  %v4271_v1 = vrot.slane %v3143_v4, 9  ;;  %v2996_v34 = vshrl.u32 %v2907_v39, 16  ;;  %v3183_v18 = vrot.slane %v5324_v28, 5 }
 0x1da   : > { %v3172_v25 = vsel %vm5089_vm15, %v4270_v32, %v3171_v12  ;;  %v2429_v19 = vrot.slane %v2427_v7, 4  ;;  %v4275_v54 = vrot.slane %v3147_v33, 9  ;;  %v2354_v33 = vld [vmem:[#allocation2 + $0x40] sm:$0xf] }
 0x1db   : > { %1922 = vmatmul.bf16.gmra.mxu1 %v1846_v9  ;;  %v2965_v9 = vrot.slane %v2963_v53, 5 }
 0x1dd   : > { %2731 = vmatmul.bf16.vlgmr.msrb.gmra.mxu2 %v2667_v22  ;;  %v2392_v22 = vrot.slane %v2391_v47, 4  ;;  %v2966_v11 = vsel %vm4596_vm4, %v2961_v63, %v2965_v9  ;;  %v2668_v47 = vpack.c.b16 %v2662_v45, %v2661_v58  ;;  %v5357_v63 = vrot.slane %v2977_v62, 5  ;;  %v3146_v45 = vld [vmem:[#allocation2 + $0x38] sm:$0xe] }
 0x1de   : > { %3112 = vmatmul.bf16.vlgmr.msrb.gmra.mxu0 %v3048_v49  ;;  %v3043_v31 = vunpack.c.l.b16 %v2966_v11  ;;  %v2988_v49 = vor.u32 %v2987_v30, %v2984_v24  ;;  %v3167_v9 = vrot.slane %v5249_v8, 5  ;;  %v3175_v11 = vrot.slane %v5284_v17, 5  ;;  %v2909_v30 = vld [vmem:[#allocation2 + $0x48] sm:$0xf] }
 0x1df   : > { %v2397_v6 = vsel %vm4596_vm4, %v2392_v22, %v2396_v14  ;;  %v2430_v22 = vshll.u32 %v2350_v0, 16  ;;  %v2980_v13 = vsel %vm4596_vm4, %v5347_v46, %v5357_v63  ;;  %v2993_v14 = vrot.slane %v2991_v2, 5 }
 0x1e0   : > { %v5330_v44 = vunpack.c.l.b16 %v2397_v6  ;;  %v3049_v53 = vpack.c.b16 %v3043_v31, %v3042_v15  ;;  %v2989_v55 = vrot.slane %v2988_v49, 4  ;;  %v3168_v8 = vsel %vm5089_vm15, %v4269_v42, %v3167_v9 }
 0x1e1   : > { %v2418_v6 = vrot.slane %v2416_v5, 5  ;;  %v2432_v21 = vrot.slane %v2430_v22, 5  ;;  %v3214_v58 = vunpack.c.l.b16 %v3168_v8  ;;  %v3215_v15 = vunpack.c.l.b16 %v3172_v25 }
 0x1e2   : > { %v2494_v56 = vpack.c.b16 %v5332_v60, %v5330_v44  ;;  %v2994_v24 = vsel %vm4596_vm4, %v2989_v55, %v2993_v14  ;;  %v3176_v31 = vsel %vm5089_vm15, %v4271_v1, %v3175_v11  ;;  %v3179_v17 = vrot.slane %v5286_v23, 5  ;;  %v4183_v11 = vld [vmem:[#allocation2 + $0x30] sm:$0xf] }
 0x1e3   : > { %v3216_v59 = vunpack.c.l.b16 %v3176_v31  ;;  %v2999_v49 = vshll.u32 %v2907_v39, 16  ;;  %v5385_v0 = vpack.c.b16 %v3215_v15, %v3214_v58  ;;  %v3187_v2 = vrot.slane %v5334_v35, 5 }
 0x1e4   : > { %2866 = vmatmul.bf16.vlgmr.msrb.gmra.mxu3 %v4176_v36  ;;  %v5339_v36 = vsel %vm5089_vm15, %v4105_v51, %v2628_v38  ;;  %v4272_v51 = vrot.slane %v3144_v27, 9  ;;  %v3145_v38 = vld [vmem:[#allocation2 + $0x30] sm:$0xe]  ;;  %v3010_v57 = vshrl.u32 %v2909_v30, 16  ;;  %v3013_v63 = vshll.u32 %v2909_v30, 16 }
 0x1e5   : > { %v2663_v43 = vunpack.c.l.b16 %v5339_v36  ;;  %v4273_v62 = vrot.slane %v3145_v38, 9  ;;  %v2422_v22 = vshll.u32 %v5303_v29, 16  ;;  %v2436_v42 = vshll.u32 %v5309_v52, 16  ;;  %v5413_v38 = vld [vmem:[#allocation2 + $0x3c] sm:$0x1] }
 0x1e6   : > { %v3180_v10 = vsel %vm5089_vm15, %v4272_v51, %v3179_v17  ;;  %v2419_v55 = vor.u32 %v2418_v6, %v5365_v16  ;;  %v2433_v9 = vor.u32 %v2432_v21, %v2429_v19  ;;  %v3044_v14 = vunpack.c.l.b16 %v2980_v13  ;;  %v4457_v16 = vld [vmem:[%s5600_s4 + $0x208] sm:$0xff]  ;;  %v4438_v51 = vld [vmem:[#allocation2 + $0x34] sm:$0xf0]  ;;  %v2593_v19 = vld [vmem:[#allocation2 + $0x40] sm:$0xe] }
 0x1e7   : > { %v3217_v46 = vunpack.c.l.b16 %v3180_v10  ;;  %v3184_v23 = vsel %vm5089_vm15, %v4273_v62, %v3183_v18  ;;  %v3045_v39 = vunpack.c.l.b16 %v2994_v24  ;;  %v2998_v29 = vrot.slane %v2996_v34, 4  ;;  %v2592_v6 = vld [vmem:[#allocation2 + $0x38] sm:$0xe]  ;;  %3284 = vmatpush.bf16.msra.mxu1 %v4457_v16  ;;  %v4439_v16 = vld [vmem:[#allocation2 + $0x44] sm:$0xf0] }
 0x1e8   : > { %v3218_v28 = vunpack.c.l.b16 %v3184_v23  ;;  %v3001_v52 = vrot.slane %v2999_v49, 5  ;;  %v3012_v8 = vrot.slane %v3010_v57, 4  ;;  %v3015_v25 = vrot.slane %v3013_v63, 5  ;;  %v2352_v17 = vld [vmem:[#allocation2 + $0x38] sm:$0xf] }
 0x1e9   : > { %v5393_v4 = vpack.c.b16 %v3217_v46, %v3216_v59  ;;  %v2669_v44 = vpack.c.b16 %v2664_v61, %v2663_v43  ;;  %v2420_v60 = vrot.slane %v2419_v55, 4  ;;  %v3050_v21 = vpack.c.b16 %v3045_v39, %v3044_v14 }
 0x1ea   : > { %v2424_v58 = vrot.slane %v2422_v22, 5  ;;  %v2438_v24 = vrot.slane %v2436_v42, 5  ;;  %v3002_v30 = vor.u32 %v3001_v52, %v2998_v29  ;;  %v3016_v15 = vor.u32 %v3015_v25, %v3012_v8  ;;  %v4187_v25 = vld [vmem:[#allocation2 + $0x40] sm:$0xf] }
 0x1eb   : > { %2557 = vmatmul.bf16.vlgmr.msrb.gmra.mxu1 %v2493_v50  ;;  %v3148_v50 = vld [vmem:[#allocation2 + $0x48] sm:$0xe]  ;;  %v4184_v36 = vor.u32 %v4438_v51, %v4183_v11  ;;  %v4107_v40 = vrot.slane %v2592_v6, 9  ;;  %v2636_v43 = vrot.slane %v5413_v38, 5  ;;  %v4108_v61 = vrot.slane %v2593_v19, 9 }
 0x1ec   : > { %v4276_v3 = vrot.slane %v3148_v50, 9  ;;  %v2425_v34 = vsel %vm4596_vm4, %v2420_v60, %v2424_v58  ;;  %v3005_v18 = vshll.u32 %v5375_v26, 16  ;;  %v2441_v50 = vshrl.u32 %v2352_v17, 16  ;;  %v4335_v19 = vld [vmem:[%s4581_s26 + $0xd8] sm:$0xf] }
 0x1ed   : > { %2736 = vmatmul.bf16.gmra.mxu2 %v2668_v47  ;;  %v5383_v47 = vld [vmem:[#allocation2 + $0x4c] sm:$0x1]  ;;  %v2444_v49 = vshll.u32 %v2352_v17, 16  ;;  %v2458_v10 = vshll.u32 %v2354_v33, 16  ;;  %v3003_v46 = vrot.slane %v3002_v30, 4  ;;  %v3017_v23 = vrot.slane %v3016_v15, 4 }
 0x1ee   : > { %3117 = vmatmul.bf16.gmra.mxu0 %v3049_v53  ;;  %v4274_v53 = vrot.slane %v3146_v45, 9  ;;  %v3195_v7 = vrot.slane %v5383_v47, 5  ;;  %v2355_v45 = vld [vmem:[#allocation2 + $0x44] sm:$0x1]  ;;  %v3019_v31 = vshll.u32 %v5383_v47, 16  ;;  %v2455_v47 = vshrl.u32 %v2354_v33, 16 }
 0x1ef   : > { %v2640_v62 = vrot.slane %v2355_v45, 5  ;;  %v2489_v57 = vunpack.c.l.b16 %v2425_v34  ;;  %v2446_v63 = vrot.slane %v2444_v49, 5  ;;  %v2450_v41 = vshll.u32 %v5413_v38, 16  ;;  %v4465_v17 = vld [vmem:[%s4581_s26 + $0xec] sm:$0xf0] }
 0x1f0   : > { %v3188_v5 = vsel %vm5089_vm15, %v4274_v53, %v3187_v2  ;;  %v3196_v32 = vsel %vm5089_vm15, %v4276_v3, %v3195_v7  ;;  %v4456_v53 = vld [vmem:[%s5600_s4 + $0x200] sm:$0xff]  ;;  %v3021_v2 = vrot.slane %v3019_v31, 5  ;;  %v2443_v3 = vrot.slane %v2441_v50, 4  ;;  %v4339_v31 = vld [vmem:[%s4581_s26 + $0xe8] sm:$0xf] }
 0x1f1   : > { %v3219_v27 = vunpack.c.l.b16 %v3188_v5  ;;  %v3221_v20 = vunpack.c.l.b16 %v3196_v32  ;;  %3285 = vmatpush.bf16.msra.mxu1 %v4456_v53  ;;  %v2457_v5 = vrot.slane %v2455_v47, 4  ;;  %v2460_v7 = vrot.slane %v2458_v10, 5  ;;  %v4343_v49 = vld [vmem:[%s4581_s26 + $0xf8] sm:$0xf]  ;;  %v4466_v47 = vld [vmem:[%s4581_s26 + $0xfc] sm:$0xf0] }
 0x1f2   : > { %v3022_v42 = vsel %vm4596_vm4, %v3017_v23, %v3021_v2  ;;  %v2464_v39 = vshll.u32 %v2355_v45, 16  ;;  %v2452_v11 = vrot.slane %v2450_v41, 5 }
 0x1f3   : > { %v5405_v1 = vpack.c.b16 %v3219_v27, %v3218_v28  ;;  %v3047_v32 = vunpack.c.l.b16 %v3022_v42  ;;  %v2461_v14 = vor.u32 %v2460_v7, %v2457_v5  ;;  %v4347_v7 = vld [vmem:[%s4581_s26 + $0x108] sm:$0xf] }
 0x1f4   : > { %2871 = vmatmul.bf16.gmra.mxu3 %v4180_v48  ;;  %v3191_v48 = vrot.slane %v5375_v26, 5  ;;  %v2641_v26 = vsel %vm5089_vm15, %v4108_v61, %v2640_v62  ;;  %v2466_v51 = vrot.slane %v2464_v39, 5 }
 0x1f5   : > { %v2666_v55 = vunpack.c.l.b16 %v2641_v26  ;;  %v2462_v8 = vrot.slane %v2461_v14, 4 }
 0x1f6   : > { %v3192_v35 = vsel %vm5089_vm15, %v4275_v54, %v3191_v48  ;;  %v2637_v54 = vsel %vm5089_vm15, %v4107_v40, %v2636_v43  ;;  %v3007_v48 = vrot.slane %v3005_v18, 5  ;;  %v4340_v40 = vor.u32 %v4465_v17, %v4339_v31 }
 0x1f7   : > { %v3220_v12 = vunpack.c.l.b16 %v3192_v35  ;;  %v2665_v35 = vunpack.c.l.b16 %v2637_v54  ;;  %v2467_v38 = vsel %vm4596_vm4, %v2462_v8, %v2466_v51 }
 0x1f8   : > { %v3008_v22 = vsel %vm4596_vm4, %v3003_v46, %v3007_v48  ;;  %v2492_v6 = vunpack.c.l.b16 %v2467_v38 }
 0x1f9   : > { %v5415_v13 = vpack.c.b16 %v3221_v20, %v3220_v12  ;;  %v2447_v12 = vor.u32 %v2446_v63, %v2443_v3  ;;  %v2670_v20 = vpack.c.b16 %v2666_v55, %v2665_v35 }
 0x1fb   : > { %2562 = vmatmul.bf16.gmra.mxu1 %v2494_v56  ;;  %v2434_v56 = vrot.slane %v2433_v9, 4  ;;  %v3046_v9 = vunpack.c.l.b16 %v3008_v22  ;;  %v2448_v52 = vrot.slane %v2447_v12, 4  ;;  %v4467_v22 = vld [vmem:[%s4581_s26 + $0x10c] sm:$0xf0] }
 0x1fd   : > { %2741 = vmatmul.bf16.gmra.mxu2 %v2669_v44  ;;  %v2439_v59 = vsel %vm4596_vm4, %v2434_v56, %v2438_v24  ;;  %v3051_v29 = vpack.c.b16 %v3047_v32, %v3046_v9  ;;  %v4188_v44 = vor.u32 %v4439_v16, %v4187_v25  ;;  %v2453_v60 = vsel %vm4596_vm4, %v2448_v52, %v2452_v11 }
 0x1fe   : > { %3122 = vmatmul.bf16.gmra.mxu0 %v3050_v21  ;;  %v2490_v28 = vunpack.c.l.b16 %v2439_v59  ;;  %v2491_v56 = vunpack.c.l.b16 %v2453_v60  ;;  %v4464_v21 = vld [vmem:[%s4581_s26 + $0xdc] sm:$0xf0] }
 0x1ff   : > { %v4336_v45 = vor.u32 %v4464_v21, %v4335_v19 }
 0x200   : > { %v2495_v27 = vpack.c.b16 %v2490_v28, %v2489_v57  ;;  %v2496_v58 = vpack.c.b16 %v2492_v6, %v2491_v56 }
 0x204   : > { %2876 = vmatmul.bf16.gmra.mxu3 %v4184_v36 }
 0x20b   : > { %2567 = vmatmul.bf16.gmra.mxu1 %v2495_v27 }
 0x20d   : > { %2746 = vmatmul.bf16.gmra.mxu2 %v2670_v20 }
 0x20e   : > { %3127 = vmatmul.bf16.gmra.mxu0 %v3051_v29 }
 0x214   : > { %2881 = vmatmul.bf16.gmra.mxu3 %v4188_v44 }
 0x21b   : > { %2572 = vmatmul.bf16.gmra.mxu1 %v2496_v58  ;;  %v2312_v53 = vpop.f32.mrf.mxu0 }
 0x21d   : > { %4349 = vmatmul.msk.bf16.vlgmr.msra.gmra.mxu2 %vm401_vm1, %v4336_v45 }
 0x220   : > { %v2009_v24 = vpop.f32.mrf.mxu2 }
 0x223   : > { %v2314_v48 = vpop.f32.mrf.mxu0 }
 0x227   : > { %v2178_v30 = vpop.f32.mrf.mxu3 }
 0x228   : > { %v1908_v15 = vpop.f32.mrf.mxu1  ;;  %v2011_v37 = vpop.f32.mrf.mxu2 }
 0x229   : > { %v2010_v33 = vadd.f32 %v2009_v24, %v1908_v15 }
 0x22b   : > { %v2198_v36 = vadd.f32 %v2178_v30, %v2010_v33  ;;  %3286 = vmatmul.bf16.vlgmr.msra.gmra.mxu1 %v5385_v0  ;;  %v4344_v0 = vor.u32 %v4466_v47, %v4343_v49  ;;  %v2317_v9 = vpop.f32.mrf.mxu0 }
 0x22d   : > { %4350 = vmatmul.msk.bf16.gmra.mxu2 %vm401_vm1, %v4340_v40  ;;  %v2332_v3 = vadd.f32 %v2312_v53, %v2198_v36 }
 0x22f   : > { %v2180_v43 = vpop.f32.mrf.mxu3 }
 0x230   : > { %v1910_v61 = vpop.f32.mrf.mxu1  ;;  %v2014_v59 = vpop.f32.mrf.mxu2 }
 0x231   : > { %v2012_v34 = vadd.f32 %v2011_v37, %v1910_v61 }
 0x233   : > { %v2199_v62 = vadd.f32 %v2180_v43, %v2012_v34  ;;  %v2319_v29 = vpop.f32.mrf.mxu0 }
 0x235   : > { %v2333_v55 = vadd.f32 %v2314_v48, %v2199_v62 }
 0x237   : > { %v2183_v18 = vpop.f32.mrf.mxu3 }
 0x238   : > { %v1913_v50 = vpop.f32.mrf.mxu1  ;;  %v2016_v46 = vpop.f32.mrf.mxu2 }
 0x239   : > { %v2015_v10 = vadd.f32 %v2014_v59, %v1913_v50 }
 0x23b   : > { %v2200_v23 = vadd.f32 %v2183_v18, %v2015_v10  ;;  %3291 = vmatmul.bf16.gmra.mxu1 %v5393_v4  ;;  %v4348_v4 = vor.u32 %v4467_v22, %v4347_v7  ;;  %v2322_v51 = vpop.f32.mrf.mxu0 }
 0x23d   : > { %4351 = vmatmul.msk.bf16.gmra.mxu2 %vm401_vm1, %v4344_v0  ;;  %v2334_v20 = vadd.f32 %v2317_v9, %v2200_v23 }
 0x23f   : > { %v2185_v2 = vpop.f32.mrf.mxu3 }
 0x240   : > { %v1915_v54 = vpop.f32.mrf.mxu1  ;;  %v2019_v28 = vpop.f32.mrf.mxu2 }
 0x241   : > { %v2017_v57 = vadd.f32 %v2016_v46, %v1915_v54 }
 0x243   : > { %v2201_v26 = vadd.f32 %v2185_v2, %v2017_v57  ;;  %v2324_v21 = vpop.f32.mrf.mxu0 }
 0x245   : > { %v2335_v16 = vadd.f32 %v2319_v29, %v2201_v26 }
 0x247   : > { %v2188_v5 = vpop.f32.mrf.mxu3 }
 0x248   : > { %v1918_v63 = vpop.f32.mrf.mxu1  ;;  %v2021_v27 = vpop.f32.mrf.mxu2 }
 0x249   : > { %v2020_v42 = vadd.f32 %v2019_v28, %v1918_v63 }
 0x24b   : > { %v2202_v35 = vadd.f32 %v2188_v5, %v2020_v42  ;;  %3296 = vmatmul.bf16.gmra.mxu1 %v5405_v1  ;;  %v2327_v34 = vpop.f32.mrf.mxu0 }
 0x24d   : > { %4352 = vmatmul.msk.bf16.gmra.mxu2 %vm401_vm1, %v4348_v4  ;;  %v2336_v60 = vadd.f32 %v2322_v51, %v2202_v35 }
 0x24f   : > { %v2190_v14 = vpop.f32.mrf.mxu3 }
 0x250   : > { %v1920_v32 = vpop.f32.mrf.mxu1  ;;  %v2024_v41 = vpop.f32.mrf.mxu2 }
 0x251   : > { %v2022_v12 = vadd.f32 %v2021_v27, %v1920_v32 }
 0x253   : > { %v2203_v39 = vadd.f32 %v2190_v14, %v2022_v12  ;;  %v5466_v47 = vpop.f32.mrf.mxu0 }
 0x255   : > { %v2337_v58 = vadd.f32 %v2324_v21, %v2203_v39 }
 0x257   : > { %v2193_v40 = vpop.f32.mrf.mxu3 }
 0x258   : > { %v1923_v52 = vpop.f32.mrf.mxu1  ;;  %v2026_v25 = vpop.f32.mrf.mxu2 }
 0x259   : > { %v5459_v8 = vadd.f32 %v2024_v41, %v1923_v52 }
 0x25b   : > { %3301 = vmatmul.bf16.gmra.mxu1 %v5415_v13  ;;  %v3113_v54 = vpop.f32.mrf.mxu0 }
 0x25f   : > { %v5464_v49 = vpop.f32.mrf.mxu3 }
 0x260   : > { %v1925_v1 = vpop.f32.mrf.mxu1  ;;  %v2732_v44 = vpop.f32.mrf.mxu2 }
 0x261   : > { %v5462_v11 = vadd.f32 %v2026_v25, %v1925_v1 }
 0x267   : > { %v2867_v0 = vpop.f32.mrf.mxu3 }
 0x268   : > { %v2558_v38 = vpop.f32.mrf.mxu1  ;;  %v2734_v6 = vpop.f32.mrf.mxu2 }
 0x269   : > { %v2578_v56 = vadd.f32 %v2558_v38, %v2332_v3  ;;  %v3115_v3 = vpop.f32.mrf.mxu0 }
 0x26b   : > { %v2752_v19 = vadd.f32 %v2732_v44, %v2578_v56 }
 0x26d   : > { %v2887_v5 = vadd.f32 %v2867_v0, %v2752_v19 }
 0x26f   : > { %v2869_v28 = vpop.f32.mrf.mxu3  ;;  %v3133_v27 = vadd.f32 %v3113_v54, %v2887_v5 }
 0x270   : > { %v2560_v45 = vpop.f32.mrf.mxu1  ;;  %v2737_v30 = vpop.f32.mrf.mxu2 }
 0x271   : > { %v2579_v24 = vadd.f32 %v2560_v45, %v2333_v55  ;;  %v3118_v35 = vpop.f32.mrf.mxu0 }
 0x273   : > { %v2753_v15 = vadd.f32 %v2734_v6, %v2579_v24 }
 0x275   : > { %v2888_v42 = vadd.f32 %v2869_v28, %v2753_v15 }
 0x277   : > { %v2872_v7 = vpop.f32.mrf.mxu3  ;;  %v3134_v55 = vadd.f32 %v3115_v3, %v2888_v42 }
 0x278   : > { %v2563_v31 = vpop.f32.mrf.mxu1  ;;  %v2739_v13 = vpop.f32.mrf.mxu2 }
 0x279   : > { %v2580_v17 = vadd.f32 %v2563_v31, %v2334_v20 }
 0x27b   : > { %v2754_v33 = vadd.f32 %v2737_v30, %v2580_v17 }
 0x27d   : > { %v2889_v14 = vadd.f32 %v2872_v7, %v2754_v33 }
 0x27f   : > { %v2874_v29 = vpop.f32.mrf.mxu3  ;;  %v3135_v25 = vadd.f32 %v3118_v35, %v2889_v14 }
 0x280   : > { %v2565_v37 = vpop.f32.mrf.mxu1  ;;  %v2742_v43 = vpop.f32.mrf.mxu2 }
 0x281   : > { %v2581_v36 = vadd.f32 %v2565_v37, %v2335_v16  ;;  %v3120_v16 = vpop.f32.mrf.mxu0 }
 0x283   : > { %v2755_v61 = vadd.f32 %v2739_v13, %v2581_v36  ;;  %v2204_v13 = vadd.f32 %v2193_v40, %v5459_v8 }
 0x287   : > { %v2877_v19 = vpop.f32.mrf.mxu3 }
 0x288   : > { %v2568_v59 = vpop.f32.mrf.mxu1  ;;  %v2744_v18 = vpop.f32.mrf.mxu2 }
 0x289   : > { %v2582_v62 = vadd.f32 %v2568_v59, %v2336_v60  ;;  %v2890_v60 = vadd.f32 %v2874_v29, %v2755_v61  ;;  %v3123_v24 = vpop.f32.mrf.mxu0  ;;  %v2338_v61 = vadd.f32 %v2327_v34, %v2204_v13 }
 0x28b   : > { %v2756_v50 = vadd.f32 %v2742_v43, %v2582_v62  ;;  %v3136_v21 = vadd.f32 %v3120_v16, %v2890_v60 }
 0x28d   : > { %v2891_v15 = vadd.f32 %v2877_v19, %v2756_v50 }
 0x28f   : > { %v3137_v37 = vadd.f32 %v3123_v24, %v2891_v15  ;;  %v2879_v36 = vpop.f32.mrf.mxu3 }
 0x290   : > { %v2570_v10 = vpop.f32.mrf.mxu1  ;;  %v5468_v46 = vpop.f32.mrf.mxu2 }
 0x291   : > { %v2583_v53 = vadd.f32 %v2570_v10, %v2337_v58  ;;  %v3125_v0 = vpop.f32.mrf.mxu0 }
 0x293   : > { %v2757_v23 = vadd.f32 %v2744_v18, %v2583_v53 }
 0x295   : > { %v2892_v18 = vadd.f32 %v2879_v36, %v2757_v23 }
 0x298   : > { %v2573_v2 = vpop.f32.mrf.mxu1  ;;  %v5470_v57 = vpop.f32.mrf.mxu2 }
 0x299   : > { %v2584_v10 = vadd.f32 %v2573_v2, %v2338_v61  ;;  %v3138_v2 = vadd.f32 %v3125_v0, %v2892_v18  ;;  %v3128_v16 = vpop.f32.mrf.mxu0 }
 0x29b   : > { %v2758_v28 = vadd.f32 %v5468_v46, %v2584_v10 }
 0x2a0   : > { %v5472_v26 = vpop.f32.mrf.mxu1  ;;  %v5474_v48 = vpop.f32.mrf.mxu2 }
 0x2a1   : > { %v3478_v8 = vmul.f32 %v5474_v48, %v5474_v48 }
 0x2a8   : > { %v3287_v63 = vpop.f32.mrf.mxu1  ;;  %v5476_v22 = vpop.f32.mrf.mxu2 }
 0x2a9   : > { %v5478_v4 = vadd.f32 %v3287_v63, %v3133_v27  ;;  %v3479_v40 = vmul.f32 %v5476_v22, %v5476_v22  ;;  %v3465_v23 = vadd.f32 %v5476_v22, %v5474_v48  ;;  %v2882_v27 = vpop.f32.mrf.mxu3 }
 0x2aa   : > { %v2893_v46 = vadd.f32 %v2882_v27, %v2758_v28 }
 0x2ab   : > { %v3330_v41 = vmul.f32 %v5478_v4, %v5478_v4  ;;  %v3486_v3 = vadd.f32 %v3479_v40, %v3478_v8 }
 0x2b0   : > { %v3289_v9 = vpop.f32.mrf.mxu1  ;;  %v5482_v12 = vpop.f32.mrf.mxu2 }
 0x2b1   : > { %v5480_v32 = vadd.f32 %v3289_v9, %v3134_v55  ;;  %v3480_v34 = vmul.f32 %v5482_v12, %v5482_v12  ;;  %v3466_v7 = vadd.f32 %v3465_v23, %v5482_v12 }
 0x2b3   : > { %v3317_v39 = vadd.f32 %v5480_v32, %v5478_v4  ;;  %v3331_v20 = vmul.f32 %v5480_v32, %v5480_v32  ;;  %v3487_v35 = vadd.f32 %v3486_v3, %v3480_v34 }
 0x2b5   : > { %v3338_v52 = vadd.f32 %v3331_v20, %v3330_v41 }
 0x2b8   : > { %v3292_v1 = vpop.f32.mrf.mxu1  ;;  %v5492_v44 = vpop.f32.mrf.mxu2 }
 0x2b9   : > { %v5490_v51 = vadd.f32 %v3292_v1, %v3135_v25  ;;  %v3481_v63 = vmul.f32 %v5492_v44, %v5492_v44  ;;  %v3467_v14 = vadd.f32 %v3466_v7, %v5492_v44 }
 0x2bb   : > { %v3318_v38 = vadd.f32 %v3317_v39, %v5490_v51  ;;  %v3332_v56 = vmul.f32 %v5490_v51, %v5490_v51  ;;  %v3488_v20 = vadd.f32 %v3487_v35, %v3481_v63  ;;  %v2884_v63 = vpop.f32.mrf.mxu3 }
 0x2bd   : > { %v3339_v6 = vadd.f32 %v3338_v52, %v3332_v56  ;;  %v3139_v56 = vadd.f32 %v3128_v16, %v2893_v46 }
 0x2c0   : > { %v3294_v58 = vpop.f32.mrf.mxu1  ;;  %v5499_v30 = vpop.f32.mrf.mxu2 }
 0x2c1   : > { %v5497_v45 = vadd.f32 %v3294_v58, %v3136_v21  ;;  %v3482_v55 = vmul.f32 %v5499_v30, %v5499_v30  ;;  %v3468_v52 = vadd.f32 %v3467_v14, %v5499_v30 }
 0x2c3   : > { %v3319_v31 = vadd.f32 %v3318_v38, %v5497_v45  ;;  %v3333_v17 = vmul.f32 %v5497_v45, %v5497_v45  ;;  %v3489_v1 = vadd.f32 %v3488_v20, %v3482_v55 }
 0x2c5   : > { %v3340_v33 = vadd.f32 %v3339_v6, %v3333_v17 }
 0x2c8   : > { %v3297_v43 = vpop.f32.mrf.mxu1  ;;  %v5507_v62 = vpop.f32.mrf.mxu2 }
 0x2c9   : > { %v5505_v59 = vadd.f32 %v3297_v43, %v3137_v37  ;;  %v3483_v29 = vmul.f32 %v5507_v62, %v5507_v62  ;;  %v3469_v38 = vadd.f32 %v3468_v52, %v5507_v62  ;;  %v2205_v37 = vadd.f32 %v5464_v49, %v5462_v11 }
 0x2cb   : > { %v3320_v50 = vadd.f32 %v3319_v31, %v5505_v59  ;;  %v3334_v53 = vmul.f32 %v5505_v59, %v5505_v59  ;;  %v3490_v6 = vadd.f32 %v3489_v1, %v3483_v29 }
 0x2cd   : > { %v3341_v54 = vadd.f32 %v3340_v33, %v3334_v53 }
 0x2d0   : > { %v3299_v5 = vpop.f32.mrf.mxu1  ;;  %v5528_v9 = vpop.f32.mrf.mxu2 }
 0x2d1   : > { %v5524_v42 = vadd.f32 %v3299_v5, %v3138_v2  ;;  %v3484_v60 = vmul.f32 %v5528_v9, %v5528_v9  ;;  %v3470_v21 = vadd.f32 %v3469_v38, %v5528_v9 }
 0x2d3   : > { %v3321_v41 = vadd.f32 %v3320_v50, %v5524_v42  ;;  %v3335_v39 = vmul.f32 %v5524_v42, %v5524_v42  ;;  %v3491_v24 = vadd.f32 %v3490_v6, %v3484_v60  ;;  %v2339_v50 = vadd.f32 %v5466_v47, %v2205_v37  ;;  %v3130_v47 = vpop.f32.mrf.mxu0 }
 0x2d5   : > { %v3342_v25 = vadd.f32 %v3341_v54, %v3335_v39  ;;  %v2585_v8 = vadd.f32 %v5472_v26, %v2339_v50 }
 0x2d7   : > { %v2759_v23 = vadd.f32 %v5470_v57, %v2585_v8  ;;  %v3463_v8 = vld [vmem:[%s5604_s8] sm:$0x1] }
 0x2d8   : > { %v3302_v19 = vpop.f32.mrf.mxu1  ;;  %v5543_v15 = vpop.f32.mrf.mxu2 }
 0x2d9   : > { %v5541_v58 = vadd.f32 %v3302_v19, %v3139_v56  ;;  %v3471_v13 = vadd.f32 %v3470_v21, %v5543_v15  ;;  %v3485_v33 = vmul.f32 %v5543_v15, %v5543_v15  ;;  %v2894_v5 = vadd.f32 %v2884_v63, %v2759_v23  ;;  %v3315_v63 = vld [vmem:[%s5601_s5] sm:$0x1] }
 0x2db   : > { %v3322_v31 = vadd.f32 %v3321_v41, %v5541_v58  ;;  %v3336_v17 = vmul.f32 %v5541_v58, %v5541_v58  ;;  %v3472_v43 = vrot.slane %v3471_v13, 4  ;;  %v3492_v61 = vadd.f32 %v3491_v24, %v3485_v33 }
 0x2dc   : > { %v3140_v46 = vadd.f32 %v3130_v47, %v2894_v5 }
 0x2dd   : > { %v3343_v36 = vadd.f32 %v3342_v25, %v3336_v17  ;;  %v3473_v18 = vadd.f32 %v3472_v43, %v3471_v13  ;;  %v3493_v10 = vrot.slane %v3492_v61, 4 }
 0x2df   : > { %v3474_v53 = vrot.slane %v3473_v18, 2  ;;  %v3494_v0 = vadd.f32 %v3493_v10, %v3492_v61 }
 0x2e0   : > { %v3304_v14 = vpop.f32.mrf.mxu1 }
 0x2e1   : > { %v3475_v40 = vadd.f32 %v3474_v53, %v3473_v18  ;;  %v3495_v54 = vrot.slane %v3494_v0, 2  ;;  %v5556_v26 = vadd.f32 %v3304_v14, %v3140_v46 }
 0x2e3   : > { %v3476_v34 = vrot.slane %v3475_v40, 1  ;;  %v3496_v28 = vadd.f32 %v3495_v54, %v3494_v0  ;;  %v3323_v39 = vadd.f32 %v3322_v31, %v5556_v26  ;;  %v3337_v57 = vmul.f32 %v5556_v26, %v5556_v26 }
 0x2e5   : > { %v3477_v2 = vadd.f32 %v3476_v34, %v3475_v40  ;;  %v3497_v3 = vrot.slane %v3496_v28, 1  ;;  %v3324_v20 = vrot.slane %v3323_v39, 4  ;;  %v3344_v29 = vadd.f32 %v3343_v36, %v3337_v57 }
 0x2e7   : > { %v3498_v11 = vadd.f32 %v3497_v3, %v3496_v28  ;;  %v3499_v49 = vmul.f32 0.015625, %v3477_v2  ;;  %v3325_v52 = vadd.f32 %v3324_v20, %v3323_v39  ;;  %v3345_v25 = vrot.slane %v3344_v29, 4 }
 0x2e9   : > { %v3500_v7 = vmul.f32 0.015625, %v3498_v11  ;;  %v3501_v27 = vmul.f32 %v3499_v49, %v3499_v49  ;;  %v3326_v16 = vrot.slane %v3325_v52, 2  ;;  %v3346_v1 = vadd.f32 %v3345_v25, %v3344_v29  ;;  %v3464_v11 = vld [vmem:[%s5605_s9] sm:$0x1] }
 0x2eb   : > { %v3502_v35 = vsub.f32 %v3500_v7, %v3501_v27  ;;  %v3327_v60 = vadd.f32 %v3326_v16, %v3325_v52  ;;  %v3347_v38 = vrot.slane %v3346_v1, 2 }
 0x2ed   : > { %v3503_v55 = vmax.f32 %v3502_v35, 0.0  ;;  %v3328_v6 = vrot.slane %v3327_v60, 1  ;;  %v3348_v19 = vadd.f32 %v3347_v38, %v3346_v1 }
 0x2ef   : > { %v3504_v41 = vadd.f32 1e-05, %v3503_v55  ;;  %v3329_v24 = vadd.f32 %v3328_v6, %v3327_v60  ;;  %v3349_v17 = vrot.slane %v3348_v19, 1 }
 0x2f1   : > { %4483 = vrsqrt.f32 %v3504_v41  ;;  %v3350_v13 = vadd.f32 %v3349_v17, %v3348_v19  ;;  %v3351_v31 = vmul.f32 0.015625, %v3329_v24  ;;  %vm3511_vm1 = vweird.f32 %v3504_v41 }
 0x2f3   : > { %v3352_v37 = vmul.f32 0.015625, %v3350_v13  ;;  %v3353_v43 = vmul.f32 %v3351_v31, %v3351_v31 }
 0x2f5   : > { %v3354_v61 = vsub.f32 %v3352_v37, %v3353_v43 }
 0x2f7   : > { %v4484_v56 = vpop.eup %4483  ;;  %v3355_v18 = vmax.f32 %v3354_v61, 0.0 }
 0x2f8   : > { %v3506_v21 = vmul.f32 %v4484_v56, %v3504_v41  ;;  %vm3512_vm0 = vweird.f32 %v4484_v56  ;;  %v3316_v41 = vld [vmem:[%s5602_s6] sm:$0x1] }
 0x2f9   : > { %v3356_v50 = vadd.f32 1e-05, %v3355_v18  ;;  %vm3513_vm2 = vmor %vm3511_vm1, %vm3512_vm0 }
 0x2fa   : > { %v3507_v33 = vmul.f32 %v4484_v56, %v3506_v21 }
 0x2fb   : > { %4485 = vrsqrt.f32 %v3356_v50  ;;  %vm3363_vm4 = vweird.f32 %v3356_v50 }
 0x2fc   : > { %v3508_v36 = vmul.f32 0.5, %v3507_v33 }
 0x2fe   : > { %v3509_v10 = vsub.f32 1.5, %v3508_v36 }
 0x300   : > { %v3510_v53 = vmul.f32 %v4484_v56, %v3509_v10 }
 0x301   : > { %v4486_v0 = vpop.eup %4485 }
 0x302   : > { %v3514_v40 = vsel %vm3513_vm2, %v4484_v56, %v3510_v53  ;;  %v3358_v54 = vmul.f32 %v4486_v0, %v3356_v50  ;;  %vm3364_vm3 = vweird.f32 %v4486_v0 }
 0x303   : > { %v3515_v34 = vmul.f32 %v3514_v40, %v3463_v8  ;;  %vm3365_vm5 = vmor %vm3363_vm4, %vm3364_vm3 }
 0x304   : > { %v3359_v28 = vmul.f32 %v4486_v0, %v3358_v54 }
 0x305   : > { %v3525_v2 = vmul.f32 %v3515_v34, %v3499_v49  ;;  %v3516_v7 = vperm.slane %v3515_v34, 0 }
 0x306   : > { %v3360_v23 = vmul.f32 0.5, %v3359_v28 }
 0x307   : > { %v3526_v27 = vsub.f32 %v3464_v11, %v3525_v2  ;;  %v3517_v49 = vmul.f32 %v3516_v7, %v5474_v48  ;;  %v3518_v1 = vmul.f32 %v3516_v7, %v5476_v22  ;;  %v3519_v60 = vmul.f32 %v3516_v7, %v5482_v12 }
 0x308   : > { %v3361_v3 = vsub.f32 1.5, %v3360_v23 }
 0x309   : > { %v3528_v14 = vperm.slane %v3526_v27, 0 }
 0x30a   : > { %v3362_v5 = vmul.f32 %v4486_v0, %v3361_v3 }
 0x30b   : > { %v3530_v38 = vadd.f32 %v3528_v14, %v3517_v49  ;;  %v3532_v56 = vadd.f32 %v3528_v14, %v3519_v60 }
 0x30c   : > { %v3366_v35 = vsel %vm3365_vm5, %v4486_v0, %v3362_v5 }
 0x30d   : > { %v3367_v47 = vmul.f32 %v3366_v35, %v3315_v63 }
 0x30f   : > { %v3368_v55 = vperm.slane %v3367_v47, 0  ;;  %v3377_v46 = vmul.f32 %v3367_v47, %v3351_v31 }
 0x311   : > { %v3369_v39 = vmul.f32 %v3368_v55, %v5478_v4  ;;  %v3370_v57 = vmul.f32 %v3368_v55, %v5480_v32  ;;  %v3371_v20 = vmul.f32 %v3368_v55, %v5490_v51  ;;  %v3372_v29 = vmul.f32 %v3368_v55, %v5497_v45 }
 0x312   : > { %v3373_v52 = vmul.f32 %v3368_v55, %v5505_v59  ;;  %v3374_v25 = vmul.f32 %v3368_v55, %v5524_v42  ;;  %v3375_v16 = vmul.f32 %v3368_v55, %v5541_v58  ;;  %v3376_v48 = vmul.f32 %v3368_v55, %v5556_v26 }
 0x313   : > { %v3520_v4 = vmul.f32 %v3516_v7, %v5492_v44  ;;  %v3378_v32 = vsub.f32 %v3316_v41, %v3377_v46  ;;  %v3521_v51 = vmul.f32 %v3516_v7, %v5499_v30  ;;  %v3522_v45 = vmul.f32 %v3516_v7, %v5507_v62 }
 0x314   : > { %v3523_v59 = vmul.f32 %v3516_v7, %v5528_v9  ;;  %v3524_v42 = vmul.f32 %v3516_v7, %v5543_v15  ;;  %v3531_v58 = vadd.f32 %v3528_v14, %v3518_v1 }
 0x315   : > { %v3380_v26 = vperm.slane %v3378_v32, 0  ;;  %v3533_v6 = vadd.f32 %v3528_v14, %v3520_v4  ;;  %v3534_v22 = vadd.f32 %v3528_v14, %v3521_v51  ;;  %v3535_v19 = vadd.f32 %v3528_v14, %v3522_v45 }
 0x316   : > { %v3536_v21 = vadd.f32 %v3528_v14, %v3523_v59  ;;  %v3537_v43 = vadd.f32 %v3528_v14, %v3524_v42 }
 0x317   : > { %v3382_v12 = vadd.f32 %v3380_v26, %v3369_v39  ;;  %v3383_v44 = vadd.f32 %v3380_v26, %v3370_v57  ;;  %v3384_v24 = vadd.f32 %v3380_v26, %v3371_v20  ;;  %v3385_v17 = vadd.f32 %v3380_v26, %v3372_v29 }
 0x318   : > { %v3386_v30 = vadd.f32 %v3380_v26, %v3373_v52  ;;  %v3387_v13 = vadd.f32 %v3380_v26, %v3374_v25  ;;  %v3388_v62 = vadd.f32 %v3380_v26, %v3375_v16  ;;  %v3389_v31 = vadd.f32 %v3380_v26, %v3376_v48 }
 0x319   : > { %v3538_v9 = vadd.f32 %v3530_v38, %v3382_v12  ;;  %v3539_v33 = vadd.f32 %v3531_v58, %v3383_v44  ;;  %v3540_v15 = vadd.f32 %v3532_v56, %v3384_v24  ;;  %v3541_v37 = vadd.f32 %v3533_v6, %v3385_v17 }
 0x31a   : > { %v3542_v61 = vadd.f32 %v3534_v22, %v3386_v30  ;;  %v3543_v36 = vadd.f32 %v3535_v19, %v3387_v13  ;;  %v3544_v18 = vadd.f32 %v3536_v21, %v3388_v62  ;;  %v3545_v0 = vadd.f32 %v3537_v43, %v3389_v31 }
 0x31b   : > { %v3546_v10 = vmax.f32 %v3538_v9, 0.0  ;;  %v3547_v50 = vmax.f32 %v3539_v33, 0.0  ;;  %v3548_v53 = vmax.f32 %v3540_v15, 0.0  ;;  %v3549_v8 = vmax.f32 %v3541_v37, 0.0 }
 0x31c   : > { %v3550_v40 = vmax.f32 %v3542_v61, 0.0  ;;  %v3551_v54 = vmax.f32 %v3543_v36, 0.0  ;;  %v3552_v34 = vmax.f32 %v3544_v18, 0.0  ;;  %v3553_v28 = vmax.f32 %v3545_v0, 0.0 }
 0x31d   : > { %3554 = vst [vmem:[%s359_s27] sm:$0xff] %v3546_v10 }
 0x31e   : > { %3555 = vst [vmem:[%s359_s27 + $0x8] sm:$0xff] %v3547_v50 }
 0x31f   : > { %3556 = vst [vmem:[%s359_s27 + $0x10] sm:$0xff] %v3548_v53 }
 0x320   : > { %3557 = vst [vmem:[%s359_s27 + $0x18] sm:$0xff] %v3549_v8 }
 0x321   : > { %3558 = vst [vmem:[%s359_s27 + $0x20] sm:$0xff] %v3550_v40 }
 0x322   : > { %3559 = vst [vmem:[%s359_s27 + $0x28] sm:$0xff] %v3551_v54 }
 0x323   : > { %3560 = vst [vmem:[%s359_s27 + $0x30] sm:$0xff] %v3552_v34 }
 0x324   : > { %3561 = vst [vmem:[%s359_s27 + $0x38] sm:$0xff] %v3553_v28 }
 0x325 PF: > { %s20_s13 = sadd.s32 1, %s4493_s13  }
 0x326   : > { %p17_p4 = scmp.ge.s32.totalorder %s20_s13, 4  }
 0x328   :  { %19 = sbr.rel (!%p17_p4) target bundleno = 1 (0x1), region = 113 }

</bundles_post_ra>
